<compile_context>
chip_gen: v7x
topology: tpu7x:2x2x1
jax: 0.10.0
libtpu: 0.0.40
codegen_flags: <defaults>
</compile_context>

<pallas_src>
import jax
import jax.numpy as jnp
from jax.experimental import pallas as pl
from jax.experimental.pallas import tpu as pltpu


# ------------------------------ gate math -----------------------------------

def _lstm_cell(gates, c_prev, H):
    """PyTorch gate order (i, f, g, o); f32 elementwise gate math.

    Nonlinearities are applied per-gate (sigmoid over [i|f] and o, tanh over
    g only) -> 4H columns of transcendental work per step instead of 8H.
    Keep H a multiple of 128 at production sizes so slices stay lane-aligned.
    """
    sif = jax.nn.sigmoid(gates[:, 0:2 * H])     # i | f in one EUP pass
    i = sif[:, 0:H]
    f = sif[:, H:2 * H]
    g = jnp.tanh(gates[:, 2 * H:3 * H])
    o = jax.nn.sigmoid(gates[:, 3 * H:4 * H])
    c_new = f * c_prev + i * g
    h_new = o * jnp.tanh(c_new)
    return h_new, c_new


# ------------------------------ fused kernel --------------------------------

def _make_fused_kernel(nlayers, TT, H):
    n_deep = nlayers - 1
    n_wt = 1 + 3 * n_deep          # whh0 + (wih, whh, b) per deep layer

    def kernel(*args):
        # ----- unpack (argument layout fixed by the wrapper) -----
        gates0_ref = args[0]                        # (TT, B, 4H) pipelined VMEM
        h0_ref = args[1]                            # (L, B, H)   pipelined VMEM
        c0_ref = args[2]                            # (L, B, H)   pipelined VMEM
        whh0_hbm = args[3]                          # (H, 4H)     ANY (HBM)
        deep_hbm = args[4:4 + 3 * n_deep]           # per deep layer: wih, whh, b
        out_ref = args[4 + 3 * n_deep]              # (TT, B, H)  output block
        s = 5 + 3 * n_deep
        whh0_sc = args[s]                           # (H, 4H)     VMEM scratch
        deep_sc = args[s + 1:s + 1 + 3 * n_deep]    # VMEM weights/biases
        h_sc = args[s + 1 + 3 * n_deep]             # (L, B, H) f32 carry
        c_sc = args[s + 2 + 3 * n_deep]             # (L, B, H) f32 carry
        wsem = args[s + 3 + 3 * n_deep]             # DMA sems (n_wt,)

        chunk = pl.program_id(1)

        # Weights HBM -> VMEM once per batch block (they then stay resident,
        # single-buffered).  All DMAs are started back-to-back so they overlap
        # each other and the h0/c0 carry init, then waited on as a group.
        @pl.when(chunk == 0)
        def _prologue():
            copies = [pltpu.make_async_copy(whh0_hbm, whh0_sc, wsem.at[0])]
            for k in range(3 * n_deep):
                copies.append(
                    pltpu.make_async_copy(deep_hbm[k], deep_sc[k],
                                          wsem.at[1 + k]))
            for cp in copies:
                cp.start()
            h_sc[...] = h0_ref[...]     # carry init overlaps the weight DMAs
            c_sc[...] = c0_ref[...]
            for cp in copies:
                cp.wait()

        # Hoist loop-invariant weight/bias loads out of the time loop.
        whh0_w = whh0_sc[...]
        wih_w = [deep_sc[3 * k][...] for k in range(n_deep)]
        whh_w = [deep_sc[3 * k + 1][...] for k in range(n_deep)]
        b_w = [deep_sc[3 * k + 2][...] for k in range(n_deep)]   # (1, 4H) f32
        cd = whh0_w.dtype

        # ----- TT recurrent steps, fully unrolled (static indices) -----
        for i in range(TT):
            # Layer 0: input projection + biases were hoisted to the wrapper;
            # only the recurrent matmul remains on the serial critical path.
            gates = gates0_ref[i].astype(jnp.float32) + jnp.dot(
                h_sc[0].astype(cd), whh0_w,
                preferred_element_type=jnp.float32)
            h_new, c_new = _lstm_cell(gates, c_sc[0], H)
            h_sc[0] = h_new
            c_sc[0] = c_new
            x_t = h_new

            # Layers 1..L-1: two MXU pushes (no per-step concat copy),
            # f32 accumulation, tiny (1,4H) bias broadcast add.
            for l in range(1, nlayers):
                k = l - 1
                gates = (
                    jnp.dot(x_t.astype(cd), wih_w[k],
                            preferred_element_type=jnp.float32)
                    + jnp.dot(h_sc[l].astype(cd), whh_w[k],
                              preferred_element_type=jnp.float32)
                    + b_w[k])
                h_new, c_new = _lstm_cell(gates, c_sc[l], H)
                h_sc[l] = h_new
                c_sc[l] = c_new
                x_t = h_new

            # torch.flip(output, [1]): reverse within the chunk here; the
            # across-chunk reversal is done by the output BlockSpec index_map.
            out_ref[TT - 1 - i] = x_t.astype(out_ref.dtype)

    return kernel


# ------------------------------ JAX wrapper ----------------------------------

def decoder_rnn_forward(x, h, params, *, time_chunk=None, batch_blocks=1,
                        compute_dtype=jnp.float32, gates0_dtype=None):
    """DecoderRNN.forward: output, _ = lstm(x, h); return flip(output, [1]).

    x      : (B, T, input_size)  (batch_first=True)
    h      : (h0, c0), each (nlayers, B, nhidden)
    params : per layer (w_ih (4H,Fin), w_hh (4H,H), b_ih (4H,), b_hh (4H,))
    compute_dtype : MXU operand dtype (use jnp.bfloat16 on v6e/v7x at
        production sizes; accumulation, carries and gate math stay f32).
    gates0_dtype  : storage dtype of the hoisted layer-0 gates stream
        (defaults to compute_dtype; bf16 halves its HBM/VMEM footprint).
    batch_blocks  : >1 splits the batch over a leading "parallel" grid axis
        (v7x dual-TensorCore); only used when each block keeps >= 8 rows.
    """
    h0, c0 = h
    B, T, _ = x.shape
    nlayers = len(params)
    H = params[0][1].shape[1]                      # w_hh: (4H, H)
    if gates0_dtype is None:
        gates0_dtype = compute_dtype

    # Batch split across TensorCores (v7x): only if blocks stay vreg-aligned.
    if batch_blocks > 1 and (B % batch_blocks != 0
                             or (B // batch_blocks) % 8 != 0):
        batch_blocks = 1
    B_blk = B // batch_blocks

    # --- VMEM budgeting: footprint(TT) of pipelined buffers + resident
    # weights + carries; shrink TT until it fits ~75% of device VMEM.
    g0_bytes = jnp.dtype(gates0_dtype).itemsize
    w_bytes = jnp.dtype(compute_dtype).itemsize

    def _footprint(tt):
        fp = 2 * tt * B_blk * 4 * H * g0_bytes                 # gates0 dbuf
        fp += 2 * tt * B_blk * H * 4                           # output dbuf
        fp += 2 * 2 * nlayers * B_blk * H * 4                  # h0/c0 buffers
        fp += H * 4 * H * w_bytes                              # whh0 resident
        fp += (nlayers - 1) * (2 * H * 4 * H * w_bytes + 4 * H * 4)
        fp += 2 * nlayers * B_blk * H * 4                      # h/c carries
        return fp

    try:
        vmem_cap = pltpu.get_tpu_info().vmem_capacity_bytes
    except Exception:
        vmem_cap = 64 * 1024 * 1024                            # v7x-safe floor
    budget = int(vmem_cap * 0.75)

    if time_chunk is None:
        cands = [tt for tt in (32, 16, 8, 4, 2, 1) if T % tt == 0]
        TT = next((tt for tt in cands if _footprint(tt) <= budget), cands[-1])
    else:
        TT = time_chunk
    assert T % TT == 0, (T, TT)
    n_chunks = T // TT
    vmem_limit = int(min(max(4 * _footprint(TT), 32 << 20), budget))

    # --- layer-0 input projection, hoisted out of the recurrence: one big
    # MXU-friendly matmul over all T*B rows; the batch-first -> time-major
    # transpose and the (b_ih + b_hh) bias are folded in here.
    w_ih0, w_hh0, b_ih0, b_hh0 = params[0]
    gates0 = jnp.einsum(
        "btf,gf->tbg", x.astype(compute_dtype), w_ih0.astype(compute_dtype),
        preferred_element_type=jnp.float32)
    gates0 = (gates0 + (b_ih0 + b_hh0)[None, None, :]).astype(gates0_dtype)

    whh0_t = jnp.transpose(w_hh0).astype(compute_dtype)        # (H, 4H)

    # --- deeper layers: pre-transposed W_ih^T / W_hh^T (two dots per step,
    # no in-kernel concat) and the two biases pre-added.
    deep_arrays, deep_scratch = [], []
    for l in range(1, nlayers):
        w_ih, w_hh, b_ih, b_hh = params[l]
        deep_arrays += [jnp.transpose(w_ih).astype(compute_dtype),   # (H, 4H)
                        jnp.transpose(w_hh).astype(compute_dtype),   # (H, 4H)
                        (b_ih + b_hh).reshape(1, 4 * H).astype(jnp.float32)]
        deep_scratch += [pltpu.VMEM((H, 4 * H), compute_dtype),
                         pltpu.VMEM((H, 4 * H), compute_dtype),
                         pltpu.VMEM((1, 4 * H), jnp.float32)]

    n_wt = 1 + 3 * (nlayers - 1)
    kernel = _make_fused_kernel(nlayers, TT, H)

    grid_spec = pltpu.PrefetchScalarGridSpec(
        num_scalar_prefetch=0,
        grid=(batch_blocks, n_chunks),
        in_specs=(
            [pl.BlockSpec((TT, B_blk, 4 * H), lambda b, c: (c, b, 0)),   # gates0
             pl.BlockSpec((nlayers, B_blk, H), lambda b, c: (0, b, 0)),  # h0
             pl.BlockSpec((nlayers, B_blk, H), lambda b, c: (0, b, 0))]  # c0
            + [pl.BlockSpec(memory_space=pl.ANY)] * n_wt                 # weights
        ),
        out_specs=pl.BlockSpec((TT, B_blk, H),
                               lambda b, c: (n_chunks - 1 - c, b, 0)),   # flip
        scratch_shapes=(
            [pltpu.VMEM((H, 4 * H), compute_dtype)]                      # whh0
            + deep_scratch                                               # deep w/b
            + [pltpu.VMEM((nlayers, B_blk, H), jnp.float32),             # h carry
               pltpu.VMEM((nlayers, B_blk, H), jnp.float32),             # c carry
               pltpu.SemaphoreType.DMA((n_wt,))]                         # DMA sems
        ),
    )

    out_tm = pl.pallas_call(
        kernel,
        out_shape=jax.ShapeDtypeStruct((T, B, H), jnp.float32),
        grid_spec=grid_spec,
        compiler_params=pltpu.CompilerParams(
            # batch axis parallel (v7x dual-core), recurrence axis serial
            dimension_semantics=("parallel", "arbitrary"),
            vmem_limit_bytes=vmem_limit,
        ),
    )(gates0, h0.astype(jnp.float32), c0.astype(jnp.float32),
      whh0_t, *deep_arrays)

    # TODO(synk): inter-layer dropout (training-mode only) omitted; this is
    # eval-mode semantics (dropout == identity).

    # Output is time-major and already flipped along time by the kernel's
    # output index_map; one cheap layout op back to batch_first remains.
    return jnp.transpose(out_tm, (1, 0, 2))


# --------------------------- pure-JAX reference ------------------------------

def decoder_rnn_ref(x, h, params):
    h0, c0 = h
    cur = x
    for l, (w_ih, w_hh, b_ih, b_hh) in enumerate(params):
        H = w_hh.shape[1]
        hh, cc = h0[l], c0[l]
        outs = []
        for t in range(x.shape[1]):
            g = cur[:, t] @ w_ih.T + b_ih + hh @ w_hh.T + b_hh
            i = jax.nn.sigmoid(g[:, :H])
            f = jax.nn.sigmoid(g[:, H:2 * H])
            gg = jnp.tanh(g[:, 2 * H:3 * H])
            o = jax.nn.sigmoid(g[:, 3 * H:])
            cc = f * cc + i * gg
            hh = o * jnp.tanh(cc)
            outs.append(hh)
        cur = jnp.stack(outs, axis=1)
    return jnp.flip(cur, axis=1)


# ------------------------------- entry point ---------------------------------

if __name__ == "__main__":
    B, T = 2, 8
    input_size, nhidden, nlayers = 16, 32, 2
    dropout = 0.0

    key = jax.random.PRNGKey(0)

    # Deterministic init mirroring init_weights(): uniform(-0.1, 0.1).
    params = []
    for l in range(nlayers):
        fin = input_size if l == 0 else nhidden
        key, k1, k2, k3, k4 = jax.random.split(key, 5)
        w_ih = jax.random.uniform(k1, (4 * nhidden, fin), jnp.float32, -0.1, 0.1)
        w_hh = jax.random.uniform(k2, (4 * nhidden, nhidden), jnp.float32, -0.1, 0.1)
        b_ih = jax.random.uniform(k3, (4 * nhidden,), jnp.float32, -0.1, 0.1)
        b_hh = jax.random.uniform(k4, (4 * nhidden,), jnp.float32, -0.1, 0.1)
        params.append((w_ih, w_hh, b_ih, b_hh))

    key, kx, kh, kc = jax.random.split(key, 4)
    x = jax.random.normal(kx, (B, T, input_size), jnp.float32)
    h0 = jax.random.normal(kh, (nlayers, B, nhidden), jnp.float32)
    c0 = jax.random.normal(kc, (nlayers, B, nhidden), jnp.float32)

    out = decoder_rnn_forward(x, (h0, c0), params)
    out = jax.block_until_ready(out)

    ref = decoder_rnn_ref(x, (h0, c0), params)
    assert out.shape == (B, T, nhidden), out.shape
    max_err = float(jnp.max(jnp.abs(out - ref)))
    assert jnp.allclose(out, ref, atol=1e-5, rtol=1e-5), max_err

    print("KERNEL_OK")
</pallas_src>

<mosaic_0001>
module attributes {stable_mosaic.version = 11 : i64} {
  func.func @kernel(%arg0: i32, %arg1: i32, %arg2: memref<8x2x128xf32, #tpu.memory_space<vmem>>, %arg3: memref<2x2x32xf32, #tpu.memory_space<vmem>>, %arg4: memref<2x2x32xf32, #tpu.memory_space<vmem>>, %arg5: memref<32x128xf32, #tpu.memory_space<any>>, %arg6: memref<32x128xf32, #tpu.memory_space<any>>, %arg7: memref<32x128xf32, #tpu.memory_space<any>>, %arg8: memref<1x128xf32, #tpu.memory_space<any>>, %arg9: memref<8x2x32xf32, #tpu.memory_space<vmem>>, %arg10: memref<32x128xf32, #tpu.memory_space<vmem>>, %arg11: memref<32x128xf32, #tpu.memory_space<vmem>>, %arg12: memref<32x128xf32, #tpu.memory_space<vmem>>, %arg13: memref<1x128xf32, #tpu.memory_space<vmem>>, %arg14: memref<2x2x32xf32, #tpu.memory_space<vmem>>, %arg15: memref<2x2x32xf32, #tpu.memory_space<vmem>>, %arg16: memref<4x!tpu.dma_semaphore, #tpu.memory_space<semaphore_mem>>) attributes {dimension_semantics = [#tpu.dimension_semantics<parallel>, #tpu.dimension_semantics<arbitrary>], iteration_bounds = array<i64: 1, 1>, scalar_prefetch = 0 : i64, scratch_operands = 7 : i64, tpu.core_type = #tpu.core_type<tc>, window_params = [{transform_indices = @transform_0, window_bounds = array<i64: 8, 2, 128>}, {transform_indices = @transform_1, window_bounds = array<i64: 2, 2, 32>}, {transform_indices = @transform_2, window_bounds = array<i64: 2, 2, 32>}, {}, {}, {}, {}, {transform_indices = @transform_7, window_bounds = array<i64: 8, 2, 32>}]} {
    %c0_i32 = arith.constant 0 : i32
    %0 = arith.cmpi eq, %arg1, %c0_i32 : i32
    %1 = arith.extui %0 : i1 to i32
    %c0_i32_0 = arith.constant 0 : i32
    %2 = arith.cmpi ne, %1, %c0_i32_0 : i32
    scf.if %2 {
      %c0_i32_296 = arith.constant 0 : i32
      %599 = tpu.memref_slice %arg16[%c0_i32_296] : memref<4x!tpu.dma_semaphore, #tpu.memory_space<semaphore_mem>> -> memref<1x!tpu.dma_semaphore, #tpu.memory_space<semaphore_mem>>
      %600 = tpu.memref_squeeze %599 : memref<1x!tpu.dma_semaphore, #tpu.memory_space<semaphore_mem>> -> memref<!tpu.dma_semaphore, #tpu.memory_space<semaphore_mem>>
      tpu.enqueue_dma source(%arg5 : memref<32x128xf32, #tpu.memory_space<any>>) target(%arg10 : memref<32x128xf32, #tpu.memory_space<vmem>>) target_semaphore(%600 : memref<!tpu.dma_semaphore, #tpu.memory_space<semaphore_mem>>)
      %c1_i32 = arith.constant 1 : i32
      %601 = tpu.memref_slice %arg16[%c1_i32] : memref<4x!tpu.dma_semaphore, #tpu.memory_space<semaphore_mem>> -> memref<1x!tpu.dma_semaphore, #tpu.memory_space<semaphore_mem>>
      %602 = tpu.memref_squeeze %601 : memref<1x!tpu.dma_semaphore, #tpu.memory_space<semaphore_mem>> -> memref<!tpu.dma_semaphore, #tpu.memory_space<semaphore_mem>>
      tpu.enqueue_dma source(%arg6 : memref<32x128xf32, #tpu.memory_space<any>>) target(%arg11 : memref<32x128xf32, #tpu.memory_space<vmem>>) target_semaphore(%602 : memref<!tpu.dma_semaphore, #tpu.memory_space<semaphore_mem>>)
      %c2_i32 = arith.constant 2 : i32
      %603 = tpu.memref_slice %arg16[%c2_i32] : memref<4x!tpu.dma_semaphore, #tpu.memory_space<semaphore_mem>> -> memref<1x!tpu.dma_semaphore, #tpu.memory_space<semaphore_mem>>
      %604 = tpu.memref_squeeze %603 : memref<1x!tpu.dma_semaphore, #tpu.memory_space<semaphore_mem>> -> memref<!tpu.dma_semaphore, #tpu.memory_space<semaphore_mem>>
      tpu.enqueue_dma source(%arg7 : memref<32x128xf32, #tpu.memory_space<any>>) target(%arg12 : memref<32x128xf32, #tpu.memory_space<vmem>>) target_semaphore(%604 : memref<!tpu.dma_semaphore, #tpu.memory_space<semaphore_mem>>)
      %c3_i32 = arith.constant 3 : i32
      %605 = tpu.memref_slice %arg16[%c3_i32] : memref<4x!tpu.dma_semaphore, #tpu.memory_space<semaphore_mem>> -> memref<1x!tpu.dma_semaphore, #tpu.memory_space<semaphore_mem>>
      %606 = tpu.memref_squeeze %605 : memref<1x!tpu.dma_semaphore, #tpu.memory_space<semaphore_mem>> -> memref<!tpu.dma_semaphore, #tpu.memory_space<semaphore_mem>>
      tpu.enqueue_dma source(%arg8 : memref<1x128xf32, #tpu.memory_space<any>>) target(%arg13 : memref<1x128xf32, #tpu.memory_space<vmem>>) target_semaphore(%606 : memref<!tpu.dma_semaphore, #tpu.memory_space<semaphore_mem>>)
      %c0_297 = arith.constant 0 : index
      %c0_298 = arith.constant 0 : index
      %c0_299 = arith.constant 0 : index
      %607 = vector.load %arg3[%c0_297, %c0_298, %c0_299] : memref<2x2x32xf32, #tpu.memory_space<vmem>>, vector<2x2x32xf32>
      %c0_300 = arith.constant 0 : index
      %c0_301 = arith.constant 0 : index
      %c0_302 = arith.constant 0 : index
      %608 = vector.load %arg14[%c0_300, %c0_301, %c0_302] : memref<2x2x32xf32, #tpu.memory_space<vmem>>, vector<2x2x32xf32>
      tpu.vector_store %arg14[%c0_300, %c0_301, %c0_302], %607 {strides = array<i32>} : memref<2x2x32xf32, #tpu.memory_space<vmem>>, vector<2x2x32xf32>,
      %c0_303 = arith.constant 0 : index
      %c0_304 = arith.constant 0 : index
      %c0_305 = arith.constant 0 : index
      %609 = vector.load %arg4[%c0_303, %c0_304, %c0_305] : memref<2x2x32xf32, #tpu.memory_space<vmem>>, vector<2x2x32xf32>
      %c0_306 = arith.constant 0 : index
      %c0_307 = arith.constant 0 : index
      %c0_308 = arith.constant 0 : index
      %610 = vector.load %arg15[%c0_306, %c0_307, %c0_308] : memref<2x2x32xf32, #tpu.memory_space<vmem>>, vector<2x2x32xf32>
      tpu.vector_store %arg15[%c0_306, %c0_307, %c0_308], %609 {strides = array<i32>} : memref<2x2x32xf32, #tpu.memory_space<vmem>>, vector<2x2x32xf32>,
      %c0_i32_309 = arith.constant 0 : i32
      %611 = tpu.memref_slice %arg16[%c0_i32_309] : memref<4x!tpu.dma_semaphore, #tpu.memory_space<semaphore_mem>> -> memref<1x!tpu.dma_semaphore, #tpu.memory_space<semaphore_mem>>
      %612 = tpu.memref_squeeze %611 : memref<1x!tpu.dma_semaphore, #tpu.memory_space<semaphore_mem>> -> memref<!tpu.dma_semaphore, #tpu.memory_space<semaphore_mem>>
      tpu.wait_dma2 semaphore(%612 : memref<!tpu.dma_semaphore, #tpu.memory_space<semaphore_mem>>) src(%arg5 : memref<32x128xf32, #tpu.memory_space<any>>) dst(%arg10 : memref<32x128xf32, #tpu.memory_space<vmem>>)
      %c1_i32_310 = arith.constant 1 : i32
      %613 = tpu.memref_slice %arg16[%c1_i32_310] : memref<4x!tpu.dma_semaphore, #tpu.memory_space<semaphore_mem>> -> memref<1x!tpu.dma_semaphore, #tpu.memory_space<semaphore_mem>>
      %614 = tpu.memref_squeeze %613 : memref<1x!tpu.dma_semaphore, #tpu.memory_space<semaphore_mem>> -> memref<!tpu.dma_semaphore, #tpu.memory_space<semaphore_mem>>
      tpu.wait_dma2 semaphore(%614 : memref<!tpu.dma_semaphore, #tpu.memory_space<semaphore_mem>>) src(%arg6 : memref<32x128xf32, #tpu.memory_space<any>>) dst(%arg11 : memref<32x128xf32, #tpu.memory_space<vmem>>)
      %c2_i32_311 = arith.constant 2 : i32
      %615 = tpu.memref_slice %arg16[%c2_i32_311] : memref<4x!tpu.dma_semaphore, #tpu.memory_space<semaphore_mem>> -> memref<1x!tpu.dma_semaphore, #tpu.memory_space<semaphore_mem>>
      %616 = tpu.memref_squeeze %615 : memref<1x!tpu.dma_semaphore, #tpu.memory_space<semaphore_mem>> -> memref<!tpu.dma_semaphore, #tpu.memory_space<semaphore_mem>>
      tpu.wait_dma2 semaphore(%616 : memref<!tpu.dma_semaphore, #tpu.memory_space<semaphore_mem>>) src(%arg7 : memref<32x128xf32, #tpu.memory_space<any>>) dst(%arg12 : memref<32x128xf32, #tpu.memory_space<vmem>>)
      %c3_i32_312 = arith.constant 3 : i32
      %617 = tpu.memref_slice %arg16[%c3_i32_312] : memref<4x!tpu.dma_semaphore, #tpu.memory_space<semaphore_mem>> -> memref<1x!tpu.dma_semaphore, #tpu.memory_space<semaphore_mem>>
      %618 = tpu.memref_squeeze %617 : memref<1x!tpu.dma_semaphore, #tpu.memory_space<semaphore_mem>> -> memref<!tpu.dma_semaphore, #tpu.memory_space<semaphore_mem>>
      tpu.wait_dma2 semaphore(%618 : memref<!tpu.dma_semaphore, #tpu.memory_space<semaphore_mem>>) src(%arg8 : memref<1x128xf32, #tpu.memory_space<any>>) dst(%arg13 : memref<1x128xf32, #tpu.memory_space<vmem>>)
    } else {
    }
    %c0 = arith.constant 0 : index
    %c0_1 = arith.constant 0 : index
    %3 = vector.load %arg10[%c0, %c0_1] : memref<32x128xf32, #tpu.memory_space<vmem>>, vector<32x128xf32>
    %c0_2 = arith.constant 0 : index
    %c0_3 = arith.constant 0 : index
    %4 = vector.load %arg11[%c0_2, %c0_3] : memref<32x128xf32, #tpu.memory_space<vmem>>, vector<32x128xf32>
    %c0_4 = arith.constant 0 : index
    %c0_5 = arith.constant 0 : index
    %5 = vector.load %arg12[%c0_4, %c0_5] : memref<32x128xf32, #tpu.memory_space<vmem>>, vector<32x128xf32>
    %c0_6 = arith.constant 0 : index
    %c0_7 = arith.constant 0 : index
    %6 = vector.load %arg13[%c0_6, %c0_7] : memref<1x128xf32, #tpu.memory_space<vmem>>, vector<1x128xf32>
    %c0_8 = arith.constant 0 : index
    %c0_9 = arith.constant 0 : index
    %c0_10 = arith.constant 0 : index
    %7 = vector.load %arg2[%c0_8, %c0_9, %c0_10] : memref<8x2x128xf32, #tpu.memory_space<vmem>>, vector<1x2x128xf32>
    %8 = vector.shape_cast %7 : vector<1x2x128xf32> to vector<2x128xf32>
    %c0_11 = arith.constant 0 : index
    %c0_12 = arith.constant 0 : index
    %c0_13 = arith.constant 0 : index
    %9 = vector.load %arg14[%c0_11, %c0_12, %c0_13] : memref<2x2x32xf32, #tpu.memory_space<vmem>>, vector<1x2x32xf32>
    %10 = vector.shape_cast %9 : vector<1x2x32xf32> to vector<2x32xf32>
    %cst = arith.constant dense<0.000000e+00> : vector<2x128xf32>
    %11 = tpu.matmul %10, %3, %cst {dimension_numbers = #tpu.dot_dimension_numbers<[1], [0], [0], [1], [0, 0, 1, 1], [], []>} : vector<2x32xf32>, vector<32x128xf32>, vector<2x128xf32> -> vector<2x128xf32>
    %12 = arith.addf %8, %11 : vector<2x128xf32>
    %c0_14 = arith.constant 0 : index
    %c0_15 = arith.constant 0 : index
    %c0_16 = arith.constant 0 : index
    %13 = vector.load %arg15[%c0_14, %c0_15, %c0_16] : memref<2x2x32xf32, #tpu.memory_space<vmem>>, vector<1x2x32xf32>
    %14 = vector.shape_cast %13 : vector<1x2x32xf32> to vector<2x32xf32>
    %15 = vector.extract_strided_slice %12 {offsets = [0, 0], sizes = [2, 64], strides = [1, 1]} : vector<2x128xf32> to vector<2x64xf32>
    %16 = arith.negf %15 : vector<2x64xf32>
    %17 = math.exp %16 : vector<2x64xf32>
    %cst_17 = arith.constant 1.000000e+00 : f32
    %18 = vector.broadcast %cst_17 : f32 to vector<2x64xf32>
    %19 = arith.addf %18, %17 : vector<2x64xf32>
    %20 = arith.divf %18, %19 : vector<2x64xf32>
    %21 = vector.extract_strided_slice %20 {offsets = [0, 0], sizes = [2, 32], strides = [1, 1]} : vector<2x64xf32> to vector<2x32xf32>
    %22 = vector.extract_strided_slice %20 {offsets = [0, 32], sizes = [2, 32], strides = [1, 1]} : vector<2x64xf32> to vector<2x32xf32>
    %23 = vector.extract_strided_slice %12 {offsets = [0, 64], sizes = [2, 32], strides = [1, 1]} : vector<2x128xf32> to vector<2x32xf32>
    %24 = math.tanh %23 : vector<2x32xf32>
    %25 = vector.extract_strided_slice %12 {offsets = [0, 96], sizes = [2, 32], strides = [1, 1]} : vector<2x128xf32> to vector<2x32xf32>
    %26 = arith.negf %25 : vector<2x32xf32>
    %27 = math.exp %26 : vector<2x32xf32>
    %cst_18 = arith.constant 1.000000e+00 : f32
    %28 = vector.broadcast %cst_18 : f32 to vector<2x32xf32>
    %29 = arith.addf %28, %27 : vector<2x32xf32>
    %30 = arith.divf %28, %29 : vector<2x32xf32>
    %31 = arith.mulf %22, %14 : vector<2x32xf32>
    %32 = arith.mulf %21, %24 : vector<2x32xf32>
    %33 = arith.addf %31, %32 : vector<2x32xf32>
    %34 = math.tanh %33 : vector<2x32xf32>
    %35 = arith.mulf %30, %34 : vector<2x32xf32>
    %c0_19 = arith.constant 0 : index
    %c0_20 = arith.constant 0 : index
    %c0_21 = arith.constant 0 : index
    %36 = vector.load %arg14[%c0_19, %c0_20, %c0_21] : memref<2x2x32xf32, #tpu.memory_space<vmem>>, vector<1x2x32xf32>
    %37 = vector.shape_cast %36 : vector<1x2x32xf32> to vector<2x32xf32>
    %38 = vector.shape_cast %35 : vector<2x32xf32> to vector<1x2x32xf32>
    tpu.vector_store %arg14[%c0_19, %c0_20, %c0_21], %38 {strides = array<i32>} : memref<2x2x32xf32, #tpu.memory_space<vmem>>, vector<1x2x32xf32>,
    %c0_22 = arith.constant 0 : index
    %c0_23 = arith.constant 0 : index
    %c0_24 = arith.constant 0 : index
    %39 = vector.load %arg15[%c0_22, %c0_23, %c0_24] : memref<2x2x32xf32, #tpu.memory_space<vmem>>, vector<1x2x32xf32>
    %40 = vector.shape_cast %39 : vector<1x2x32xf32> to vector<2x32xf32>
    %41 = vector.shape_cast %33 : vector<2x32xf32> to vector<1x2x32xf32>
    tpu.vector_store %arg15[%c0_22, %c0_23, %c0_24], %41 {strides = array<i32>} : memref<2x2x32xf32, #tpu.memory_space<vmem>>, vector<1x2x32xf32>,
    %cst_25 = arith.constant dense<0.000000e+00> : vector<2x128xf32>
    %42 = tpu.matmul %35, %4, %cst_25 {dimension_numbers = #tpu.dot_dimension_numbers<[1], [0], [0], [1], [0, 0, 1, 1], [], []>} : vector<2x32xf32>, vector<32x128xf32>, vector<2x128xf32> -> vector<2x128xf32>
    %c1 = arith.constant 1 : index
    %c0_26 = arith.constant 0 : index
    %c0_27 = arith.constant 0 : index
    %43 = vector.load %arg14[%c1, %c0_26, %c0_27] : memref<2x2x32xf32, #tpu.memory_space<vmem>>, vector<1x2x32xf32>
    %44 = vector.shape_cast %43 : vector<1x2x32xf32> to vector<2x32xf32>
    %cst_28 = arith.constant dense<0.000000e+00> : vector<2x128xf32>
    %45 = tpu.matmul %44, %5, %cst_28 {dimension_numbers = #tpu.dot_dimension_numbers<[1], [0], [0], [1], [0, 0, 1, 1], [], []>} : vector<2x32xf32>, vector<32x128xf32>, vector<2x128xf32> -> vector<2x128xf32>
    %46 = arith.addf %42, %45 : vector<2x128xf32>
    %47 = vector.broadcast %6 : vector<1x128xf32> to vector<2x128xf32>
    %48 = arith.addf %46, %47 : vector<2x128xf32>
    %c1_29 = arith.constant 1 : index
    %c0_30 = arith.constant 0 : index
    %c0_31 = arith.constant 0 : index
    %49 = vector.load %arg15[%c1_29, %c0_30, %c0_31] : memref<2x2x32xf32, #tpu.memory_space<vmem>>, vector<1x2x32xf32>
    %50 = vector.shape_cast %49 : vector<1x2x32xf32> to vector<2x32xf32>
    %51 = vector.extract_strided_slice %48 {offsets = [0, 0], sizes = [2, 64], strides = [1, 1]} : vector<2x128xf32> to vector<2x64xf32>
    %52 = arith.negf %51 : vector<2x64xf32>
    %53 = math.exp %52 : vector<2x64xf32>
    %cst_32 = arith.constant 1.000000e+00 : f32
    %54 = vector.broadcast %cst_32 : f32 to vector<2x64xf32>
    %55 = arith.addf %54, %53 : vector<2x64xf32>
    %56 = arith.divf %54, %55 : vector<2x64xf32>
    %57 = vector.extract_strided_slice %56 {offsets = [0, 0], sizes = [2, 32], strides = [1, 1]} : vector<2x64xf32> to vector<2x32xf32>
    %58 = vector.extract_strided_slice %56 {offsets = [0, 32], sizes = [2, 32], strides = [1, 1]} : vector<2x64xf32> to vector<2x32xf32>
    %59 = vector.extract_strided_slice %48 {offsets = [0, 64], sizes = [2, 32], strides = [1, 1]} : vector<2x128xf32> to vector<2x32xf32>
    %60 = math.tanh %59 : vector<2x32xf32>
    %61 = vector.extract_strided_slice %48 {offsets = [0, 96], sizes = [2, 32], strides = [1, 1]} : vector<2x128xf32> to vector<2x32xf32>
    %62 = arith.negf %61 : vector<2x32xf32>
    %63 = math.exp %62 : vector<2x32xf32>
    %cst_33 = arith.constant 1.000000e+00 : f32
    %64 = vector.broadcast %cst_33 : f32 to vector<2x32xf32>
    %65 = arith.addf %64, %63 : vector<2x32xf32>
    %66 = arith.divf %64, %65 : vector<2x32xf32>
    %67 = arith.mulf %58, %50 : vector<2x32xf32>
    %68 = arith.mulf %57, %60 : vector<2x32xf32>
    %69 = arith.addf %67, %68 : vector<2x32xf32>
    %70 = math.tanh %69 : vector<2x32xf32>
    %71 = arith.mulf %66, %70 : vector<2x32xf32>
    %c1_34 = arith.constant 1 : index
    %c0_35 = arith.constant 0 : index
    %c0_36 = arith.constant 0 : index
    %72 = vector.load %arg14[%c1_34, %c0_35, %c0_36] : memref<2x2x32xf32, #tpu.memory_space<vmem>>, vector<1x2x32xf32>
    %73 = vector.shape_cast %72 : vector<1x2x32xf32> to vector<2x32xf32>
    %74 = vector.shape_cast %71 : vector<2x32xf32> to vector<1x2x32xf32>
    tpu.vector_store %arg14[%c1_34, %c0_35, %c0_36], %74 {strides = array<i32>} : memref<2x2x32xf32, #tpu.memory_space<vmem>>, vector<1x2x32xf32>,
    %c1_37 = arith.constant 1 : index
    %c0_38 = arith.constant 0 : index
    %c0_39 = arith.constant 0 : index
    %75 = vector.load %arg15[%c1_37, %c0_38, %c0_39] : memref<2x2x32xf32, #tpu.memory_space<vmem>>, vector<1x2x32xf32>
    %76 = vector.shape_cast %75 : vector<1x2x32xf32> to vector<2x32xf32>
    %77 = vector.shape_cast %69 : vector<2x32xf32> to vector<1x2x32xf32>
    tpu.vector_store %arg15[%c1_37, %c0_38, %c0_39], %77 {strides = array<i32>} : memref<2x2x32xf32, #tpu.memory_space<vmem>>, vector<1x2x32xf32>,
    %c7 = arith.constant 7 : index
    %c0_40 = arith.constant 0 : index
    %c0_41 = arith.constant 0 : index
    %78 = vector.load %arg9[%c7, %c0_40, %c0_41] : memref<8x2x32xf32, #tpu.memory_space<vmem>>, vector<1x2x32xf32>
    %79 = vector.shape_cast %78 : vector<1x2x32xf32> to vector<2x32xf32>
    %80 = vector.shape_cast %71 : vector<2x32xf32> to vector<1x2x32xf32>
    tpu.vector_store %arg9[%c7, %c0_40, %c0_41], %80 {strides = array<i32>} : memref<8x2x32xf32, #tpu.memory_space<vmem>>, vector<1x2x32xf32>,
    %c1_42 = arith.constant 1 : index
    %c0_43 = arith.constant 0 : index
    %c0_44 = arith.constant 0 : index
    %81 = vector.load %arg2[%c1_42, %c0_43, %c0_44] : memref<8x2x128xf32, #tpu.memory_space<vmem>>, vector<1x2x128xf32>
    %82 = vector.shape_cast %81 : vector<1x2x128xf32> to vector<2x128xf32>
    %c0_45 = arith.constant 0 : index
    %c0_46 = arith.constant 0 : index
    %c0_47 = arith.constant 0 : index
    %83 = vector.load %arg14[%c0_45, %c0_46, %c0_47] : memref<2x2x32xf32, #tpu.memory_space<vmem>>, vector<1x2x32xf32>
    %84 = vector.shape_cast %83 : vector<1x2x32xf32> to vector<2x32xf32>
    %cst_48 = arith.constant dense<0.000000e+00> : vector<2x128xf32>
    %85 = tpu.matmul %84, %3, %cst_48 {dimension_numbers = #tpu.dot_dimension_numbers<[1], [0], [0], [1], [0, 0, 1, 1], [], []>} : vector<2x32xf32>, vector<32x128xf32>, vector<2x128xf32> -> vector<2x128xf32>
    %86 = arith.addf %82, %85 : vector<2x128xf32>
    %c0_49 = arith.constant 0 : index
    %c0_50 = arith.constant 0 : index
    %c0_51 = arith.constant 0 : index
    %87 = vector.load %arg15[%c0_49, %c0_50, %c0_51] : memref<2x2x32xf32, #tpu.memory_space<vmem>>, vector<1x2x32xf32>
    %88 = vector.shape_cast %87 : vector<1x2x32xf32> to vector<2x32xf32>
    %89 = vector.extract_strided_slice %86 {offsets = [0, 0], sizes = [2, 64], strides = [1, 1]} : vector<2x128xf32> to vector<2x64xf32>
    %90 = arith.negf %89 : vector<2x64xf32>
    %91 = math.exp %90 : vector<2x64xf32>
    %cst_52 = arith.constant 1.000000e+00 : f32
    %92 = vector.broadcast %cst_52 : f32 to vector<2x64xf32>
    %93 = arith.addf %92, %91 : vector<2x64xf32>
    %94 = arith.divf %92, %93 : vector<2x64xf32>
    %95 = vector.extract_strided_slice %94 {offsets = [0, 0], sizes = [2, 32], strides = [1, 1]} : vector<2x64xf32> to vector<2x32xf32>
    %96 = vector.extract_strided_slice %94 {offsets = [0, 32], sizes = [2, 32], strides = [1, 1]} : vector<2x64xf32> to vector<2x32xf32>
    %97 = vector.extract_strided_slice %86 {offsets = [0, 64], sizes = [2, 32], strides = [1, 1]} : vector<2x128xf32> to vector<2x32xf32>
    %98 = math.tanh %97 : vector<2x32xf32>
    %99 = vector.extract_strided_slice %86 {offsets = [0, 96], sizes = [2, 32], strides = [1, 1]} : vector<2x128xf32> to vector<2x32xf32>
    %100 = arith.negf %99 : vector<2x32xf32>
    %101 = math.exp %100 : vector<2x32xf32>
    %cst_53 = arith.constant 1.000000e+00 : f32
    %102 = vector.broadcast %cst_53 : f32 to vector<2x32xf32>
    %103 = arith.addf %102, %101 : vector<2x32xf32>
    %104 = arith.divf %102, %103 : vector<2x32xf32>
    %105 = arith.mulf %96, %88 : vector<2x32xf32>
    %106 = arith.mulf %95, %98 : vector<2x32xf32>
    %107 = arith.addf %105, %106 : vector<2x32xf32>
    %108 = math.tanh %107 : vector<2x32xf32>
    %109 = arith.mulf %104, %108 : vector<2x32xf32>
    %c0_54 = arith.constant 0 : index
    %c0_55 = arith.constant 0 : index
    %c0_56 = arith.constant 0 : index
    %110 = vector.load %arg14[%c0_54, %c0_55, %c0_56] : memref<2x2x32xf32, #tpu.memory_space<vmem>>, vector<1x2x32xf32>
    %111 = vector.shape_cast %110 : vector<1x2x32xf32> to vector<2x32xf32>
    %112 = vector.shape_cast %109 : vector<2x32xf32> to vector<1x2x32xf32>
    tpu.vector_store %arg14[%c0_54, %c0_55, %c0_56], %112 {strides = array<i32>} : memref<2x2x32xf32, #tpu.memory_space<vmem>>, vector<1x2x32xf32>,
    %c0_57 = arith.constant 0 : index
    %c0_58 = arith.constant 0 : index
    %c0_59 = arith.constant 0 : index
    %113 = vector.load %arg15[%c0_57, %c0_58, %c0_59] : memref<2x2x32xf32, #tpu.memory_space<vmem>>, vector<1x2x32xf32>
    %114 = vector.shape_cast %113 : vector<1x2x32xf32> to vector<2x32xf32>
    %115 = vector.shape_cast %107 : vector<2x32xf32> to vector<1x2x32xf32>
    tpu.vector_store %arg15[%c0_57, %c0_58, %c0_59], %115 {strides = array<i32>} : memref<2x2x32xf32, #tpu.memory_space<vmem>>, vector<1x2x32xf32>,
    %cst_60 = arith.constant dense<0.000000e+00> : vector<2x128xf32>
    %116 = tpu.matmul %109, %4, %cst_60 {dimension_numbers = #tpu.dot_dimension_numbers<[1], [0], [0], [1], [0, 0, 1, 1], [], []>} : vector<2x32xf32>, vector<32x128xf32>, vector<2x128xf32> -> vector<2x128xf32>
    %c1_61 = arith.constant 1 : index
    %c0_62 = arith.constant 0 : index
    %c0_63 = arith.constant 0 : index
    %117 = vector.load %arg14[%c1_61, %c0_62, %c0_63] : memref<2x2x32xf32, #tpu.memory_space<vmem>>, vector<1x2x32xf32>
    %118 = vector.shape_cast %117 : vector<1x2x32xf32> to vector<2x32xf32>
    %cst_64 = arith.constant dense<0.000000e+00> : vector<2x128xf32>
    %119 = tpu.matmul %118, %5, %cst_64 {dimension_numbers = #tpu.dot_dimension_numbers<[1], [0], [0], [1], [0, 0, 1, 1], [], []>} : vector<2x32xf32>, vector<32x128xf32>, vector<2x128xf32> -> vector<2x128xf32>
    %120 = arith.addf %116, %119 : vector<2x128xf32>
    %121 = vector.broadcast %6 : vector<1x128xf32> to vector<2x128xf32>
    %122 = arith.addf %120, %121 : vector<2x128xf32>
    %c1_65 = arith.constant 1 : index
    %c0_66 = arith.constant 0 : index
    %c0_67 = arith.constant 0 : index
    %123 = vector.load %arg15[%c1_65, %c0_66, %c0_67] : memref<2x2x32xf32, #tpu.memory_space<vmem>>, vector<1x2x32xf32>
    %124 = vector.shape_cast %123 : vector<1x2x32xf32> to vector<2x32xf32>
    %125 = vector.extract_strided_slice %122 {offsets = [0, 0], sizes = [2, 64], strides = [1, 1]} : vector<2x128xf32> to vector<2x64xf32>
    %126 = arith.negf %125 : vector<2x64xf32>
    %127 = math.exp %126 : vector<2x64xf32>
    %cst_68 = arith.constant 1.000000e+00 : f32
    %128 = vector.broadcast %cst_68 : f32 to vector<2x64xf32>
    %129 = arith.addf %128, %127 : vector<2x64xf32>
    %130 = arith.divf %128, %129 : vector<2x64xf32>
    %131 = vector.extract_strided_slice %130 {offsets = [0, 0], sizes = [2, 32], strides = [1, 1]} : vector<2x64xf32> to vector<2x32xf32>
    %132 = vector.extract_strided_slice %130 {offsets = [0, 32], sizes = [2, 32], strides = [1, 1]} : vector<2x64xf32> to vector<2x32xf32>
    %133 = vector.extract_strided_slice %122 {offsets = [0, 64], sizes = [2, 32], strides = [1, 1]} : vector<2x128xf32> to vector<2x32xf32>
    %134 = math.tanh %133 : vector<2x32xf32>
    %135 = vector.extract_strided_slice %122 {offsets = [0, 96], sizes = [2, 32], strides = [1, 1]} : vector<2x128xf32> to vector<2x32xf32>
    %136 = arith.negf %135 : vector<2x32xf32>
    %137 = math.exp %136 : vector<2x32xf32>
    %cst_69 = arith.constant 1.000000e+00 : f32
    %138 = vector.broadcast %cst_69 : f32 to vector<2x32xf32>
    %139 = arith.addf %138, %137 : vector<2x32xf32>
    %140 = arith.divf %138, %139 : vector<2x32xf32>
    %141 = arith.mulf %132, %124 : vector<2x32xf32>
    %142 = arith.mulf %131, %134 : vector<2x32xf32>
    %143 = arith.addf %141, %142 : vector<2x32xf32>
    %144 = math.tanh %143 : vector<2x32xf32>
    %145 = arith.mulf %140, %144 : vector<2x32xf32>
    %c1_70 = arith.constant 1 : index
    %c0_71 = arith.constant 0 : index
    %c0_72 = arith.constant 0 : index
    %146 = vector.load %arg14[%c1_70, %c0_71, %c0_72] : memref<2x2x32xf32, #tpu.memory_space<vmem>>, vector<1x2x32xf32>
    %147 = vector.shape_cast %146 : vector<1x2x32xf32> to vector<2x32xf32>
    %148 = vector.shape_cast %145 : vector<2x32xf32> to vector<1x2x32xf32>
    tpu.vector_store %arg14[%c1_70, %c0_71, %c0_72], %148 {strides = array<i32>} : memref<2x2x32xf32, #tpu.memory_space<vmem>>, vector<1x2x32xf32>,
    %c1_73 = arith.constant 1 : index
    %c0_74 = arith.constant 0 : index
    %c0_75 = arith.constant 0 : index
    %149 = vector.load %arg15[%c1_73, %c0_74, %c0_75] : memref<2x2x32xf32, #tpu.memory_space<vmem>>, vector<1x2x32xf32>
    %150 = vector.shape_cast %149 : vector<1x2x32xf32> to vector<2x32xf32>
    %151 = vector.shape_cast %143 : vector<2x32xf32> to vector<1x2x32xf32>
    tpu.vector_store %arg15[%c1_73, %c0_74, %c0_75], %151 {strides = array<i32>} : memref<2x2x32xf32, #tpu.memory_space<vmem>>, vector<1x2x32xf32>,
    %c6 = arith.constant 6 : index
    %c0_76 = arith.constant 0 : index
    %c0_77 = arith.constant 0 : index
    %152 = vector.load %arg9[%c6, %c0_76, %c0_77] : memref<8x2x32xf32, #tpu.memory_space<vmem>>, vector<1x2x32xf32>
    %153 = vector.shape_cast %152 : vector<1x2x32xf32> to vector<2x32xf32>
    %154 = vector.shape_cast %145 : vector<2x32xf32> to vector<1x2x32xf32>
    tpu.vector_store %arg9[%c6, %c0_76, %c0_77], %154 {strides = array<i32>} : memref<8x2x32xf32, #tpu.memory_space<vmem>>, vector<1x2x32xf32>,
    %c2 = arith.constant 2 : index
    %c0_78 = arith.constant 0 : index
    %c0_79 = arith.constant 0 : index
    %155 = vector.load %arg2[%c2, %c0_78, %c0_79] : memref<8x2x128xf32, #tpu.memory_space<vmem>>, vector<1x2x128xf32>
    %156 = vector.shape_cast %155 : vector<1x2x128xf32> to vector<2x128xf32>
    %c0_80 = arith.constant 0 : index
    %c0_81 = arith.constant 0 : index
    %c0_82 = arith.constant 0 : index
    %157 = vector.load %arg14[%c0_80, %c0_81, %c0_82] : memref<2x2x32xf32, #tpu.memory_space<vmem>>, vector<1x2x32xf32>
    %158 = vector.shape_cast %157 : vector<1x2x32xf32> to vector<2x32xf32>
    %cst_83 = arith.constant dense<0.000000e+00> : vector<2x128xf32>
    %159 = tpu.matmul %158, %3, %cst_83 {dimension_numbers = #tpu.dot_dimension_numbers<[1], [0], [0], [1], [0, 0, 1, 1], [], []>} : vector<2x32xf32>, vector<32x128xf32>, vector<2x128xf32> -> vector<2x128xf32>
    %160 = arith.addf %156, %159 : vector<2x128xf32>
    %c0_84 = arith.constant 0 : index
    %c0_85 = arith.constant 0 : index
    %c0_86 = arith.constant 0 : index
    %161 = vector.load %arg15[%c0_84, %c0_85, %c0_86] : memref<2x2x32xf32, #tpu.memory_space<vmem>>, vector<1x2x32xf32>
    %162 = vector.shape_cast %161 : vector<1x2x32xf32> to vector<2x32xf32>
    %163 = vector.extract_strided_slice %160 {offsets = [0, 0], sizes = [2, 64], strides = [1, 1]} : vector<2x128xf32> to vector<2x64xf32>
    %164 = arith.negf %163 : vector<2x64xf32>
    %165 = math.exp %164 : vector<2x64xf32>
    %cst_87 = arith.constant 1.000000e+00 : f32
    %166 = vector.broadcast %cst_87 : f32 to vector<2x64xf32>
    %167 = arith.addf %166, %165 : vector<2x64xf32>
    %168 = arith.divf %166, %167 : vector<2x64xf32>
    %169 = vector.extract_strided_slice %168 {offsets = [0, 0], sizes = [2, 32], strides = [1, 1]} : vector<2x64xf32> to vector<2x32xf32>
    %170 = vector.extract_strided_slice %168 {offsets = [0, 32], sizes = [2, 32], strides = [1, 1]} : vector<2x64xf32> to vector<2x32xf32>
    %171 = vector.extract_strided_slice %160 {offsets = [0, 64], sizes = [2, 32], strides = [1, 1]} : vector<2x128xf32> to vector<2x32xf32>
    %172 = math.tanh %171 : vector<2x32xf32>
    %173 = vector.extract_strided_slice %160 {offsets = [0, 96], sizes = [2, 32], strides = [1, 1]} : vector<2x128xf32> to vector<2x32xf32>
    %174 = arith.negf %173 : vector<2x32xf32>
    %175 = math.exp %174 : vector<2x32xf32>
    %cst_88 = arith.constant 1.000000e+00 : f32
    %176 = vector.broadcast %cst_88 : f32 to vector<2x32xf32>
    %177 = arith.addf %176, %175 : vector<2x32xf32>
    %178 = arith.divf %176, %177 : vector<2x32xf32>
    %179 = arith.mulf %170, %162 : vector<2x32xf32>
    %180 = arith.mulf %169, %172 : vector<2x32xf32>
    %181 = arith.addf %179, %180 : vector<2x32xf32>
    %182 = math.tanh %181 : vector<2x32xf32>
    %183 = arith.mulf %178, %182 : vector<2x32xf32>
    %c0_89 = arith.constant 0 : index
    %c0_90 = arith.constant 0 : index
    %c0_91 = arith.constant 0 : index
    %184 = vector.load %arg14[%c0_89, %c0_90, %c0_91] : memref<2x2x32xf32, #tpu.memory_space<vmem>>, vector<1x2x32xf32>
    %185 = vector.shape_cast %184 : vector<1x2x32xf32> to vector<2x32xf32>
    %186 = vector.shape_cast %183 : vector<2x32xf32> to vector<1x2x32xf32>
    tpu.vector_store %arg14[%c0_89, %c0_90, %c0_91], %186 {strides = array<i32>} : memref<2x2x32xf32, #tpu.memory_space<vmem>>, vector<1x2x32xf32>,
    %c0_92 = arith.constant 0 : index
    %c0_93 = arith.constant 0 : index
    %c0_94 = arith.constant 0 : index
    %187 = vector.load %arg15[%c0_92, %c0_93, %c0_94] : memref<2x2x32xf32, #tpu.memory_space<vmem>>, vector<1x2x32xf32>
    %188 = vector.shape_cast %187 : vector<1x2x32xf32> to vector<2x32xf32>
    %189 = vector.shape_cast %181 : vector<2x32xf32> to vector<1x2x32xf32>
    tpu.vector_store %arg15[%c0_92, %c0_93, %c0_94], %189 {strides = array<i32>} : memref<2x2x32xf32, #tpu.memory_space<vmem>>, vector<1x2x32xf32>,
    %cst_95 = arith.constant dense<0.000000e+00> : vector<2x128xf32>
    %190 = tpu.matmul %183, %4, %cst_95 {dimension_numbers = #tpu.dot_dimension_numbers<[1], [0], [0], [1], [0, 0, 1, 1], [], []>} : vector<2x32xf32>, vector<32x128xf32>, vector<2x128xf32> -> vector<2x128xf32>
    %c1_96 = arith.constant 1 : index
    %c0_97 = arith.constant 0 : index
    %c0_98 = arith.constant 0 : index
    %191 = vector.load %arg14[%c1_96, %c0_97, %c0_98] : memref<2x2x32xf32, #tpu.memory_space<vmem>>, vector<1x2x32xf32>
    %192 = vector.shape_cast %191 : vector<1x2x32xf32> to vector<2x32xf32>
    %cst_99 = arith.constant dense<0.000000e+00> : vector<2x128xf32>
    %193 = tpu.matmul %192, %5, %cst_99 {dimension_numbers = #tpu.dot_dimension_numbers<[1], [0], [0], [1], [0, 0, 1, 1], [], []>} : vector<2x32xf32>, vector<32x128xf32>, vector<2x128xf32> -> vector<2x128xf32>
    %194 = arith.addf %190, %193 : vector<2x128xf32>
    %195 = vector.broadcast %6 : vector<1x128xf32> to vector<2x128xf32>
    %196 = arith.addf %194, %195 : vector<2x128xf32>
    %c1_100 = arith.constant 1 : index
    %c0_101 = arith.constant 0 : index
    %c0_102 = arith.constant 0 : index
    %197 = vector.load %arg15[%c1_100, %c0_101, %c0_102] : memref<2x2x32xf32, #tpu.memory_space<vmem>>, vector<1x2x32xf32>
    %198 = vector.shape_cast %197 : vector<1x2x32xf32> to vector<2x32xf32>
    %199 = vector.extract_strided_slice %196 {offsets = [0, 0], sizes = [2, 64], strides = [1, 1]} : vector<2x128xf32> to vector<2x64xf32>
    %200 = arith.negf %199 : vector<2x64xf32>
    %201 = math.exp %200 : vector<2x64xf32>
    %cst_103 = arith.constant 1.000000e+00 : f32
    %202 = vector.broadcast %cst_103 : f32 to vector<2x64xf32>
    %203 = arith.addf %202, %201 : vector<2x64xf32>
    %204 = arith.divf %202, %203 : vector<2x64xf32>
    %205 = vector.extract_strided_slice %204 {offsets = [0, 0], sizes = [2, 32], strides = [1, 1]} : vector<2x64xf32> to vector<2x32xf32>
    %206 = vector.extract_strided_slice %204 {offsets = [0, 32], sizes = [2, 32], strides = [1, 1]} : vector<2x64xf32> to vector<2x32xf32>
    %207 = vector.extract_strided_slice %196 {offsets = [0, 64], sizes = [2, 32], strides = [1, 1]} : vector<2x128xf32> to vector<2x32xf32>
    %208 = math.tanh %207 : vector<2x32xf32>
    %209 = vector.extract_strided_slice %196 {offsets = [0, 96], sizes = [2, 32], strides = [1, 1]} : vector<2x128xf32> to vector<2x32xf32>
    %210 = arith.negf %209 : vector<2x32xf32>
    %211 = math.exp %210 : vector<2x32xf32>
    %cst_104 = arith.constant 1.000000e+00 : f32
    %212 = vector.broadcast %cst_104 : f32 to vector<2x32xf32>
    %213 = arith.addf %212, %211 : vector<2x32xf32>
    %214 = arith.divf %212, %213 : vector<2x32xf32>
    %215 = arith.mulf %206, %198 : vector<2x32xf32>
    %216 = arith.mulf %205, %208 : vector<2x32xf32>
    %217 = arith.addf %215, %216 : vector<2x32xf32>
    %218 = math.tanh %217 : vector<2x32xf32>
    %219 = arith.mulf %214, %218 : vector<2x32xf32>
    %c1_105 = arith.constant 1 : index
    %c0_106 = arith.constant 0 : index
    %c0_107 = arith.constant 0 : index
    %220 = vector.load %arg14[%c1_105, %c0_106, %c0_107] : memref<2x2x32xf32, #tpu.memory_space<vmem>>, vector<1x2x32xf32>
    %221 = vector.shape_cast %220 : vector<1x2x32xf32> to vector<2x32xf32>
    %222 = vector.shape_cast %219 : vector<2x32xf32> to vector<1x2x32xf32>
    tpu.vector_store %arg14[%c1_105, %c0_106, %c0_107], %222 {strides = array<i32>} : memref<2x2x32xf32, #tpu.memory_space<vmem>>, vector<1x2x32xf32>,
    %c1_108 = arith.constant 1 : index
    %c0_109 = arith.constant 0 : index
    %c0_110 = arith.constant 0 : index
    %223 = vector.load %arg15[%c1_108, %c0_109, %c0_110] : memref<2x2x32xf32, #tpu.memory_space<vmem>>, vector<1x2x32xf32>
    %224 = vector.shape_cast %223 : vector<1x2x32xf32> to vector<2x32xf32>
    %225 = vector.shape_cast %217 : vector<2x32xf32> to vector<1x2x32xf32>
    tpu.vector_store %arg15[%c1_108, %c0_109, %c0_110], %225 {strides = array<i32>} : memref<2x2x32xf32, #tpu.memory_space<vmem>>, vector<1x2x32xf32>,
    %c5 = arith.constant 5 : index
    %c0_111 = arith.constant 0 : index
    %c0_112 = arith.constant 0 : index
    %226 = vector.load %arg9[%c5, %c0_111, %c0_112] : memref<8x2x32xf32, #tpu.memory_space<vmem>>, vector<1x2x32xf32>
    %227 = vector.shape_cast %226 : vector<1x2x32xf32> to vector<2x32xf32>
    %228 = vector.shape_cast %219 : vector<2x32xf32> to vector<1x2x32xf32>
    tpu.vector_store %arg9[%c5, %c0_111, %c0_112], %228 {strides = array<i32>} : memref<8x2x32xf32, #tpu.memory_space<vmem>>, vector<1x2x32xf32>,
    %c3 = arith.constant 3 : index
    %c0_113 = arith.constant 0 : index
    %c0_114 = arith.constant 0 : index
    %229 = vector.load %arg2[%c3, %c0_113, %c0_114] : memref<8x2x128xf32, #tpu.memory_space<vmem>>, vector<1x2x128xf32>
    %230 = vector.shape_cast %229 : vector<1x2x128xf32> to vector<2x128xf32>
    %c0_115 = arith.constant 0 : index
    %c0_116 = arith.constant 0 : index
    %c0_117 = arith.constant 0 : index
    %231 = vector.load %arg14[%c0_115, %c0_116, %c0_117] : memref<2x2x32xf32, #tpu.memory_space<vmem>>, vector<1x2x32xf32>
    %232 = vector.shape_cast %231 : vector<1x2x32xf32> to vector<2x32xf32>
    %cst_118 = arith.constant dense<0.000000e+00> : vector<2x128xf32>
    %233 = tpu.matmul %232, %3, %cst_118 {dimension_numbers = #tpu.dot_dimension_numbers<[1], [0], [0], [1], [0, 0, 1, 1], [], []>} : vector<2x32xf32>, vector<32x128xf32>, vector<2x128xf32> -> vector<2x128xf32>
    %234 = arith.addf %230, %233 : vector<2x128xf32>
    %c0_119 = arith.constant 0 : index
    %c0_120 = arith.constant 0 : index
    %c0_121 = arith.constant 0 : index
    %235 = vector.load %arg15[%c0_119, %c0_120, %c0_121] : memref<2x2x32xf32, #tpu.memory_space<vmem>>, vector<1x2x32xf32>
    %236 = vector.shape_cast %235 : vector<1x2x32xf32> to vector<2x32xf32>
    %237 = vector.extract_strided_slice %234 {offsets = [0, 0], sizes = [2, 64], strides = [1, 1]} : vector<2x128xf32> to vector<2x64xf32>
    %238 = arith.negf %237 : vector<2x64xf32>
    %239 = math.exp %238 : vector<2x64xf32>
    %cst_122 = arith.constant 1.000000e+00 : f32
    %240 = vector.broadcast %cst_122 : f32 to vector<2x64xf32>
    %241 = arith.addf %240, %239 : vector<2x64xf32>
    %242 = arith.divf %240, %241 : vector<2x64xf32>
    %243 = vector.extract_strided_slice %242 {offsets = [0, 0], sizes = [2, 32], strides = [1, 1]} : vector<2x64xf32> to vector<2x32xf32>
    %244 = vector.extract_strided_slice %242 {offsets = [0, 32], sizes = [2, 32], strides = [1, 1]} : vector<2x64xf32> to vector<2x32xf32>
    %245 = vector.extract_strided_slice %234 {offsets = [0, 64], sizes = [2, 32], strides = [1, 1]} : vector<2x128xf32> to vector<2x32xf32>
    %246 = math.tanh %245 : vector<2x32xf32>
    %247 = vector.extract_strided_slice %234 {offsets = [0, 96], sizes = [2, 32], strides = [1, 1]} : vector<2x128xf32> to vector<2x32xf32>
    %248 = arith.negf %247 : vector<2x32xf32>
    %249 = math.exp %248 : vector<2x32xf32>
    %cst_123 = arith.constant 1.000000e+00 : f32
    %250 = vector.broadcast %cst_123 : f32 to vector<2x32xf32>
    %251 = arith.addf %250, %249 : vector<2x32xf32>
    %252 = arith.divf %250, %251 : vector<2x32xf32>
    %253 = arith.mulf %244, %236 : vector<2x32xf32>
    %254 = arith.mulf %243, %246 : vector<2x32xf32>
    %255 = arith.addf %253, %254 : vector<2x32xf32>
    %256 = math.tanh %255 : vector<2x32xf32>
    %257 = arith.mulf %252, %256 : vector<2x32xf32>
    %c0_124 = arith.constant 0 : index
    %c0_125 = arith.constant 0 : index
    %c0_126 = arith.constant 0 : index
    %258 = vector.load %arg14[%c0_124, %c0_125, %c0_126] : memref<2x2x32xf32, #tpu.memory_space<vmem>>, vector<1x2x32xf32>
    %259 = vector.shape_cast %258 : vector<1x2x32xf32> to vector<2x32xf32>
    %260 = vector.shape_cast %257 : vector<2x32xf32> to vector<1x2x32xf32>
    tpu.vector_store %arg14[%c0_124, %c0_125, %c0_126], %260 {strides = array<i32>} : memref<2x2x32xf32, #tpu.memory_space<vmem>>, vector<1x2x32xf32>,
    %c0_127 = arith.constant 0 : index
    %c0_128 = arith.constant 0 : index
    %c0_129 = arith.constant 0 : index
    %261 = vector.load %arg15[%c0_127, %c0_128, %c0_129] : memref<2x2x32xf32, #tpu.memory_space<vmem>>, vector<1x2x32xf32>
    %262 = vector.shape_cast %261 : vector<1x2x32xf32> to vector<2x32xf32>
    %263 = vector.shape_cast %255 : vector<2x32xf32> to vector<1x2x32xf32>
    tpu.vector_store %arg15[%c0_127, %c0_128, %c0_129], %263 {strides = array<i32>} : memref<2x2x32xf32, #tpu.memory_space<vmem>>, vector<1x2x32xf32>,
    %cst_130 = arith.constant dense<0.000000e+00> : vector<2x128xf32>
    %264 = tpu.matmul %257, %4, %cst_130 {dimension_numbers = #tpu.dot_dimension_numbers<[1], [0], [0], [1], [0, 0, 1, 1], [], []>} : vector<2x32xf32>, vector<32x128xf32>, vector<2x128xf32> -> vector<2x128xf32>
    %c1_131 = arith.constant 1 : index
    %c0_132 = arith.constant 0 : index
    %c0_133 = arith.constant 0 : index
    %265 = vector.load %arg14[%c1_131, %c0_132, %c0_133] : memref<2x2x32xf32, #tpu.memory_space<vmem>>, vector<1x2x32xf32>
    %266 = vector.shape_cast %265 : vector<1x2x32xf32> to vector<2x32xf32>
    %cst_134 = arith.constant dense<0.000000e+00> : vector<2x128xf32>
    %267 = tpu.matmul %266, %5, %cst_134 {dimension_numbers = #tpu.dot_dimension_numbers<[1], [0], [0], [1], [0, 0, 1, 1], [], []>} : vector<2x32xf32>, vector<32x128xf32>, vector<2x128xf32> -> vector<2x128xf32>
    %268 = arith.addf %264, %267 : vector<2x128xf32>
    %269 = vector.broadcast %6 : vector<1x128xf32> to vector<2x128xf32>
    %270 = arith.addf %268, %269 : vector<2x128xf32>
    %c1_135 = arith.constant 1 : index
    %c0_136 = arith.constant 0 : index
    %c0_137 = arith.constant 0 : index
    %271 = vector.load %arg15[%c1_135, %c0_136, %c0_137] : memref<2x2x32xf32, #tpu.memory_space<vmem>>, vector<1x2x32xf32>
    %272 = vector.shape_cast %271 : vector<1x2x32xf32> to vector<2x32xf32>
    %273 = vector.extract_strided_slice %270 {offsets = [0, 0], sizes = [2, 64], strides = [1, 1]} : vector<2x128xf32> to vector<2x64xf32>
    %274 = arith.negf %273 : vector<2x64xf32>
    %275 = math.exp %274 : vector<2x64xf32>
    %cst_138 = arith.constant 1.000000e+00 : f32
    %276 = vector.broadcast %cst_138 : f32 to vector<2x64xf32>
    %277 = arith.addf %276, %275 : vector<2x64xf32>
    %278 = arith.divf %276, %277 : vector<2x64xf32>
    %279 = vector.extract_strided_slice %278 {offsets = [0, 0], sizes = [2, 32], strides = [1, 1]} : vector<2x64xf32> to vector<2x32xf32>
    %280 = vector.extract_strided_slice %278 {offsets = [0, 32], sizes = [2, 32], strides = [1, 1]} : vector<2x64xf32> to vector<2x32xf32>
    %281 = vector.extract_strided_slice %270 {offsets = [0, 64], sizes = [2, 32], strides = [1, 1]} : vector<2x128xf32> to vector<2x32xf32>
    %282 = math.tanh %281 : vector<2x32xf32>
    %283 = vector.extract_strided_slice %270 {offsets = [0, 96], sizes = [2, 32], strides = [1, 1]} : vector<2x128xf32> to vector<2x32xf32>
    %284 = arith.negf %283 : vector<2x32xf32>
    %285 = math.exp %284 : vector<2x32xf32>
    %cst_139 = arith.constant 1.000000e+00 : f32
    %286 = vector.broadcast %cst_139 : f32 to vector<2x32xf32>
    %287 = arith.addf %286, %285 : vector<2x32xf32>
    %288 = arith.divf %286, %287 : vector<2x32xf32>
    %289 = arith.mulf %280, %272 : vector<2x32xf32>
    %290 = arith.mulf %279, %282 : vector<2x32xf32>
    %291 = arith.addf %289, %290 : vector<2x32xf32>
    %292 = math.tanh %291 : vector<2x32xf32>
    %293 = arith.mulf %288, %292 : vector<2x32xf32>
    %c1_140 = arith.constant 1 : index
    %c0_141 = arith.constant 0 : index
    %c0_142 = arith.constant 0 : index
    %294 = vector.load %arg14[%c1_140, %c0_141, %c0_142] : memref<2x2x32xf32, #tpu.memory_space<vmem>>, vector<1x2x32xf32>
    %295 = vector.shape_cast %294 : vector<1x2x32xf32> to vector<2x32xf32>
    %296 = vector.shape_cast %293 : vector<2x32xf32> to vector<1x2x32xf32>
    tpu.vector_store %arg14[%c1_140, %c0_141, %c0_142], %296 {strides = array<i32>} : memref<2x2x32xf32, #tpu.memory_space<vmem>>, vector<1x2x32xf32>,
    %c1_143 = arith.constant 1 : index
    %c0_144 = arith.constant 0 : index
    %c0_145 = arith.constant 0 : index
    %297 = vector.load %arg15[%c1_143, %c0_144, %c0_145] : memref<2x2x32xf32, #tpu.memory_space<vmem>>, vector<1x2x32xf32>
    %298 = vector.shape_cast %297 : vector<1x2x32xf32> to vector<2x32xf32>
    %299 = vector.shape_cast %291 : vector<2x32xf32> to vector<1x2x32xf32>
    tpu.vector_store %arg15[%c1_143, %c0_144, %c0_145], %299 {strides = array<i32>} : memref<2x2x32xf32, #tpu.memory_space<vmem>>, vector<1x2x32xf32>,
    %c4 = arith.constant 4 : index
    %c0_146 = arith.constant 0 : index
    %c0_147 = arith.constant 0 : index
    %300 = vector.load %arg9[%c4, %c0_146, %c0_147] : memref<8x2x32xf32, #tpu.memory_space<vmem>>, vector<1x2x32xf32>
    %301 = vector.shape_cast %300 : vector<1x2x32xf32> to vector<2x32xf32>
    %302 = vector.shape_cast %293 : vector<2x32xf32> to vector<1x2x32xf32>
    tpu.vector_store %arg9[%c4, %c0_146, %c0_147], %302 {strides = array<i32>} : memref<8x2x32xf32, #tpu.memory_space<vmem>>, vector<1x2x32xf32>,
    %c4_148 = arith.constant 4 : index
    %c0_149 = arith.constant 0 : index
    %c0_150 = arith.constant 0 : index
    %303 = vector.load %arg2[%c4_148, %c0_149, %c0_150] : memref<8x2x128xf32, #tpu.memory_space<vmem>>, vector<1x2x128xf32>
    %304 = vector.shape_cast %303 : vector<1x2x128xf32> to vector<2x128xf32>
    %c0_151 = arith.constant 0 : index
    %c0_152 = arith.constant 0 : index
    %c0_153 = arith.constant 0 : index
    %305 = vector.load %arg14[%c0_151, %c0_152, %c0_153] : memref<2x2x32xf32, #tpu.memory_space<vmem>>, vector<1x2x32xf32>
    %306 = vector.shape_cast %305 : vector<1x2x32xf32> to vector<2x32xf32>
    %cst_154 = arith.constant dense<0.000000e+00> : vector<2x128xf32>
    %307 = tpu.matmul %306, %3, %cst_154 {dimension_numbers = #tpu.dot_dimension_numbers<[1], [0], [0], [1], [0, 0, 1, 1], [], []>} : vector<2x32xf32>, vector<32x128xf32>, vector<2x128xf32> -> vector<2x128xf32>
    %308 = arith.addf %304, %307 : vector<2x128xf32>
    %c0_155 = arith.constant 0 : index
    %c0_156 = arith.constant 0 : index
    %c0_157 = arith.constant 0 : index
    %309 = vector.load %arg15[%c0_155, %c0_156, %c0_157] : memref<2x2x32xf32, #tpu.memory_space<vmem>>, vector<1x2x32xf32>
    %310 = vector.shape_cast %309 : vector<1x2x32xf32> to vector<2x32xf32>
    %311 = vector.extract_strided_slice %308 {offsets = [0, 0], sizes = [2, 64], strides = [1, 1]} : vector<2x128xf32> to vector<2x64xf32>
    %312 = arith.negf %311 : vector<2x64xf32>
    %313 = math.exp %312 : vector<2x64xf32>
    %cst_158 = arith.constant 1.000000e+00 : f32
    %314 = vector.broadcast %cst_158 : f32 to vector<2x64xf32>
    %315 = arith.addf %314, %313 : vector<2x64xf32>
    %316 = arith.divf %314, %315 : vector<2x64xf32>
    %317 = vector.extract_strided_slice %316 {offsets = [0, 0], sizes = [2, 32], strides = [1, 1]} : vector<2x64xf32> to vector<2x32xf32>
    %318 = vector.extract_strided_slice %316 {offsets = [0, 32], sizes = [2, 32], strides = [1, 1]} : vector<2x64xf32> to vector<2x32xf32>
    %319 = vector.extract_strided_slice %308 {offsets = [0, 64], sizes = [2, 32], strides = [1, 1]} : vector<2x128xf32> to vector<2x32xf32>
    %320 = math.tanh %319 : vector<2x32xf32>
    %321 = vector.extract_strided_slice %308 {offsets = [0, 96], sizes = [2, 32], strides = [1, 1]} : vector<2x128xf32> to vector<2x32xf32>
    %322 = arith.negf %321 : vector<2x32xf32>
    %323 = math.exp %322 : vector<2x32xf32>
    %cst_159 = arith.constant 1.000000e+00 : f32
    %324 = vector.broadcast %cst_159 : f32 to vector<2x32xf32>
    %325 = arith.addf %324, %323 : vector<2x32xf32>
    %326 = arith.divf %324, %325 : vector<2x32xf32>
    %327 = arith.mulf %318, %310 : vector<2x32xf32>
    %328 = arith.mulf %317, %320 : vector<2x32xf32>
    %329 = arith.addf %327, %328 : vector<2x32xf32>
    %330 = math.tanh %329 : vector<2x32xf32>
    %331 = arith.mulf %326, %330 : vector<2x32xf32>
    %c0_160 = arith.constant 0 : index
    %c0_161 = arith.constant 0 : index
    %c0_162 = arith.constant 0 : index
    %332 = vector.load %arg14[%c0_160, %c0_161, %c0_162] : memref<2x2x32xf32, #tpu.memory_space<vmem>>, vector<1x2x32xf32>
    %333 = vector.shape_cast %332 : vector<1x2x32xf32> to vector<2x32xf32>
    %334 = vector.shape_cast %331 : vector<2x32xf32> to vector<1x2x32xf32>
    tpu.vector_store %arg14[%c0_160, %c0_161, %c0_162], %334 {strides = array<i32>} : memref<2x2x32xf32, #tpu.memory_space<vmem>>, vector<1x2x32xf32>,
    %c0_163 = arith.constant 0 : index
    %c0_164 = arith.constant 0 : index
    %c0_165 = arith.constant 0 : index
    %335 = vector.load %arg15[%c0_163, %c0_164, %c0_165] : memref<2x2x32xf32, #tpu.memory_space<vmem>>, vector<1x2x32xf32>
    %336 = vector.shape_cast %335 : vector<1x2x32xf32> to vector<2x32xf32>
    %337 = vector.shape_cast %329 : vector<2x32xf32> to vector<1x2x32xf32>
    tpu.vector_store %arg15[%c0_163, %c0_164, %c0_165], %337 {strides = array<i32>} : memref<2x2x32xf32, #tpu.memory_space<vmem>>, vector<1x2x32xf32>,
    %cst_166 = arith.constant dense<0.000000e+00> : vector<2x128xf32>
    %338 = tpu.matmul %331, %4, %cst_166 {dimension_numbers = #tpu.dot_dimension_numbers<[1], [0], [0], [1], [0, 0, 1, 1], [], []>} : vector<2x32xf32>, vector<32x128xf32>, vector<2x128xf32> -> vector<2x128xf32>
    %c1_167 = arith.constant 1 : index
    %c0_168 = arith.constant 0 : index
    %c0_169 = arith.constant 0 : index
    %339 = vector.load %arg14[%c1_167, %c0_168, %c0_169] : memref<2x2x32xf32, #tpu.memory_space<vmem>>, vector<1x2x32xf32>
    %340 = vector.shape_cast %339 : vector<1x2x32xf32> to vector<2x32xf32>
    %cst_170 = arith.constant dense<0.000000e+00> : vector<2x128xf32>
    %341 = tpu.matmul %340, %5, %cst_170 {dimension_numbers = #tpu.dot_dimension_numbers<[1], [0], [0], [1], [0, 0, 1, 1], [], []>} : vector<2x32xf32>, vector<32x128xf32>, vector<2x128xf32> -> vector<2x128xf32>
    %342 = arith.addf %338, %341 : vector<2x128xf32>
    %343 = vector.broadcast %6 : vector<1x128xf32> to vector<2x128xf32>
    %344 = arith.addf %342, %343 : vector<2x128xf32>
    %c1_171 = arith.constant 1 : index
    %c0_172 = arith.constant 0 : index
    %c0_173 = arith.constant 0 : index
    %345 = vector.load %arg15[%c1_171, %c0_172, %c0_173] : memref<2x2x32xf32, #tpu.memory_space<vmem>>, vector<1x2x32xf32>
    %346 = vector.shape_cast %345 : vector<1x2x32xf32> to vector<2x32xf32>
    %347 = vector.extract_strided_slice %344 {offsets = [0, 0], sizes = [2, 64], strides = [1, 1]} : vector<2x128xf32> to vector<2x64xf32>
    %348 = arith.negf %347 : vector<2x64xf32>
    %349 = math.exp %348 : vector<2x64xf32>
    %cst_174 = arith.constant 1.000000e+00 : f32
    %350 = vector.broadcast %cst_174 : f32 to vector<2x64xf32>
    %351 = arith.addf %350, %349 : vector<2x64xf32>
    %352 = arith.divf %350, %351 : vector<2x64xf32>
    %353 = vector.extract_strided_slice %352 {offsets = [0, 0], sizes = [2, 32], strides = [1, 1]} : vector<2x64xf32> to vector<2x32xf32>
    %354 = vector.extract_strided_slice %352 {offsets = [0, 32], sizes = [2, 32], strides = [1, 1]} : vector<2x64xf32> to vector<2x32xf32>
    %355 = vector.extract_strided_slice %344 {offsets = [0, 64], sizes = [2, 32], strides = [1, 1]} : vector<2x128xf32> to vector<2x32xf32>
    %356 = math.tanh %355 : vector<2x32xf32>
    %357 = vector.extract_strided_slice %344 {offsets = [0, 96], sizes = [2, 32], strides = [1, 1]} : vector<2x128xf32> to vector<2x32xf32>
    %358 = arith.negf %357 : vector<2x32xf32>
    %359 = math.exp %358 : vector<2x32xf32>
    %cst_175 = arith.constant 1.000000e+00 : f32
    %360 = vector.broadcast %cst_175 : f32 to vector<2x32xf32>
    %361 = arith.addf %360, %359 : vector<2x32xf32>
    %362 = arith.divf %360, %361 : vector<2x32xf32>
    %363 = arith.mulf %354, %346 : vector<2x32xf32>
    %364 = arith.mulf %353, %356 : vector<2x32xf32>
    %365 = arith.addf %363, %364 : vector<2x32xf32>
    %366 = math.tanh %365 : vector<2x32xf32>
    %367 = arith.mulf %362, %366 : vector<2x32xf32>
    %c1_176 = arith.constant 1 : index
    %c0_177 = arith.constant 0 : index
    %c0_178 = arith.constant 0 : index
    %368 = vector.load %arg14[%c1_176, %c0_177, %c0_178] : memref<2x2x32xf32, #tpu.memory_space<vmem>>, vector<1x2x32xf32>
    %369 = vector.shape_cast %368 : vector<1x2x32xf32> to vector<2x32xf32>
    %370 = vector.shape_cast %367 : vector<2x32xf32> to vector<1x2x32xf32>
    tpu.vector_store %arg14[%c1_176, %c0_177, %c0_178], %370 {strides = array<i32>} : memref<2x2x32xf32, #tpu.memory_space<vmem>>, vector<1x2x32xf32>,
    %c1_179 = arith.constant 1 : index
    %c0_180 = arith.constant 0 : index
    %c0_181 = arith.constant 0 : index
    %371 = vector.load %arg15[%c1_179, %c0_180, %c0_181] : memref<2x2x32xf32, #tpu.memory_space<vmem>>, vector<1x2x32xf32>
    %372 = vector.shape_cast %371 : vector<1x2x32xf32> to vector<2x32xf32>
    %373 = vector.shape_cast %365 : vector<2x32xf32> to vector<1x2x32xf32>
    tpu.vector_store %arg15[%c1_179, %c0_180, %c0_181], %373 {strides = array<i32>} : memref<2x2x32xf32, #tpu.memory_space<vmem>>, vector<1x2x32xf32>,
    %c3_182 = arith.constant 3 : index
    %c0_183 = arith.constant 0 : index
    %c0_184 = arith.constant 0 : index
    %374 = vector.load %arg9[%c3_182, %c0_183, %c0_184] : memref<8x2x32xf32, #tpu.memory_space<vmem>>, vector<1x2x32xf32>
    %375 = vector.shape_cast %374 : vector<1x2x32xf32> to vector<2x32xf32>
    %376 = vector.shape_cast %367 : vector<2x32xf32> to vector<1x2x32xf32>
    tpu.vector_store %arg9[%c3_182, %c0_183, %c0_184], %376 {strides = array<i32>} : memref<8x2x32xf32, #tpu.memory_space<vmem>>, vector<1x2x32xf32>,
    %c5_185 = arith.constant 5 : index
    %c0_186 = arith.constant 0 : index
    %c0_187 = arith.constant 0 : index
    %377 = vector.load %arg2[%c5_185, %c0_186, %c0_187] : memref<8x2x128xf32, #tpu.memory_space<vmem>>, vector<1x2x128xf32>
    %378 = vector.shape_cast %377 : vector<1x2x128xf32> to vector<2x128xf32>
    %c0_188 = arith.constant 0 : index
    %c0_189 = arith.constant 0 : index
    %c0_190 = arith.constant 0 : index
    %379 = vector.load %arg14[%c0_188, %c0_189, %c0_190] : memref<2x2x32xf32, #tpu.memory_space<vmem>>, vector<1x2x32xf32>
    %380 = vector.shape_cast %379 : vector<1x2x32xf32> to vector<2x32xf32>
    %cst_191 = arith.constant dense<0.000000e+00> : vector<2x128xf32>
    %381 = tpu.matmul %380, %3, %cst_191 {dimension_numbers = #tpu.dot_dimension_numbers<[1], [0], [0], [1], [0, 0, 1, 1], [], []>} : vector<2x32xf32>, vector<32x128xf32>, vector<2x128xf32> -> vector<2x128xf32>
    %382 = arith.addf %378, %381 : vector<2x128xf32>
    %c0_192 = arith.constant 0 : index
    %c0_193 = arith.constant 0 : index
    %c0_194 = arith.constant 0 : index
    %383 = vector.load %arg15[%c0_192, %c0_193, %c0_194] : memref<2x2x32xf32, #tpu.memory_space<vmem>>, vector<1x2x32xf32>
    %384 = vector.shape_cast %383 : vector<1x2x32xf32> to vector<2x32xf32>
    %385 = vector.extract_strided_slice %382 {offsets = [0, 0], sizes = [2, 64], strides = [1, 1]} : vector<2x128xf32> to vector<2x64xf32>
    %386 = arith.negf %385 : vector<2x64xf32>
    %387 = math.exp %386 : vector<2x64xf32>
    %cst_195 = arith.constant 1.000000e+00 : f32
    %388 = vector.broadcast %cst_195 : f32 to vector<2x64xf32>
    %389 = arith.addf %388, %387 : vector<2x64xf32>
    %390 = arith.divf %388, %389 : vector<2x64xf32>
    %391 = vector.extract_strided_slice %390 {offsets = [0, 0], sizes = [2, 32], strides = [1, 1]} : vector<2x64xf32> to vector<2x32xf32>
    %392 = vector.extract_strided_slice %390 {offsets = [0, 32], sizes = [2, 32], strides = [1, 1]} : vector<2x64xf32> to vector<2x32xf32>
    %393 = vector.extract_strided_slice %382 {offsets = [0, 64], sizes = [2, 32], strides = [1, 1]} : vector<2x128xf32> to vector<2x32xf32>
    %394 = math.tanh %393 : vector<2x32xf32>
    %395 = vector.extract_strided_slice %382 {offsets = [0, 96], sizes = [2, 32], strides = [1, 1]} : vector<2x128xf32> to vector<2x32xf32>
    %396 = arith.negf %395 : vector<2x32xf32>
    %397 = math.exp %396 : vector<2x32xf32>
    %cst_196 = arith.constant 1.000000e+00 : f32
    %398 = vector.broadcast %cst_196 : f32 to vector<2x32xf32>
    %399 = arith.addf %398, %397 : vector<2x32xf32>
    %400 = arith.divf %398, %399 : vector<2x32xf32>
    %401 = arith.mulf %392, %384 : vector<2x32xf32>
    %402 = arith.mulf %391, %394 : vector<2x32xf32>
    %403 = arith.addf %401, %402 : vector<2x32xf32>
    %404 = math.tanh %403 : vector<2x32xf32>
    %405 = arith.mulf %400, %404 : vector<2x32xf32>
    %c0_197 = arith.constant 0 : index
    %c0_198 = arith.constant 0 : index
    %c0_199 = arith.constant 0 : index
    %406 = vector.load %arg14[%c0_197, %c0_198, %c0_199] : memref<2x2x32xf32, #tpu.memory_space<vmem>>, vector<1x2x32xf32>
    %407 = vector.shape_cast %406 : vector<1x2x32xf32> to vector<2x32xf32>
    %408 = vector.shape_cast %405 : vector<2x32xf32> to vector<1x2x32xf32>
    tpu.vector_store %arg14[%c0_197, %c0_198, %c0_199], %408 {strides = array<i32>} : memref<2x2x32xf32, #tpu.memory_space<vmem>>, vector<1x2x32xf32>,
    %c0_200 = arith.constant 0 : index
    %c0_201 = arith.constant 0 : index
    %c0_202 = arith.constant 0 : index
    %409 = vector.load %arg15[%c0_200, %c0_201, %c0_202] : memref<2x2x32xf32, #tpu.memory_space<vmem>>, vector<1x2x32xf32>
    %410 = vector.shape_cast %409 : vector<1x2x32xf32> to vector<2x32xf32>
    %411 = vector.shape_cast %403 : vector<2x32xf32> to vector<1x2x32xf32>
    tpu.vector_store %arg15[%c0_200, %c0_201, %c0_202], %411 {strides = array<i32>} : memref<2x2x32xf32, #tpu.memory_space<vmem>>, vector<1x2x32xf32>,
    %cst_203 = arith.constant dense<0.000000e+00> : vector<2x128xf32>
    %412 = tpu.matmul %405, %4, %cst_203 {dimension_numbers = #tpu.dot_dimension_numbers<[1], [0], [0], [1], [0, 0, 1, 1], [], []>} : vector<2x32xf32>, vector<32x128xf32>, vector<2x128xf32> -> vector<2x128xf32>
    %c1_204 = arith.constant 1 : index
    %c0_205 = arith.constant 0 : index
    %c0_206 = arith.constant 0 : index
    %413 = vector.load %arg14[%c1_204, %c0_205, %c0_206] : memref<2x2x32xf32, #tpu.memory_space<vmem>>, vector<1x2x32xf32>
    %414 = vector.shape_cast %413 : vector<1x2x32xf32> to vector<2x32xf32>
    %cst_207 = arith.constant dense<0.000000e+00> : vector<2x128xf32>
    %415 = tpu.matmul %414, %5, %cst_207 {dimension_numbers = #tpu.dot_dimension_numbers<[1], [0], [0], [1], [0, 0, 1, 1], [], []>} : vector<2x32xf32>, vector<32x128xf32>, vector<2x128xf32> -> vector<2x128xf32>
    %416 = arith.addf %412, %415 : vector<2x128xf32>
    %417 = vector.broadcast %6 : vector<1x128xf32> to vector<2x128xf32>
    %418 = arith.addf %416, %417 : vector<2x128xf32>
    %c1_208 = arith.constant 1 : index
    %c0_209 = arith.constant 0 : index
    %c0_210 = arith.constant 0 : index
    %419 = vector.load %arg15[%c1_208, %c0_209, %c0_210] : memref<2x2x32xf32, #tpu.memory_space<vmem>>, vector<1x2x32xf32>
    %420 = vector.shape_cast %419 : vector<1x2x32xf32> to vector<2x32xf32>
    %421 = vector.extract_strided_slice %418 {offsets = [0, 0], sizes = [2, 64], strides = [1, 1]} : vector<2x128xf32> to vector<2x64xf32>
    %422 = arith.negf %421 : vector<2x64xf32>
    %423 = math.exp %422 : vector<2x64xf32>
    %cst_211 = arith.constant 1.000000e+00 : f32
    %424 = vector.broadcast %cst_211 : f32 to vector<2x64xf32>
    %425 = arith.addf %424, %423 : vector<2x64xf32>
    %426 = arith.divf %424, %425 : vector<2x64xf32>
    %427 = vector.extract_strided_slice %426 {offsets = [0, 0], sizes = [2, 32], strides = [1, 1]} : vector<2x64xf32> to vector<2x32xf32>
    %428 = vector.extract_strided_slice %426 {offsets = [0, 32], sizes = [2, 32], strides = [1, 1]} : vector<2x64xf32> to vector<2x32xf32>
    %429 = vector.extract_strided_slice %418 {offsets = [0, 64], sizes = [2, 32], strides = [1, 1]} : vector<2x128xf32> to vector<2x32xf32>
    %430 = math.tanh %429 : vector<2x32xf32>
    %431 = vector.extract_strided_slice %418 {offsets = [0, 96], sizes = [2, 32], strides = [1, 1]} : vector<2x128xf32> to vector<2x32xf32>
    %432 = arith.negf %431 : vector<2x32xf32>
    %433 = math.exp %432 : vector<2x32xf32>
    %cst_212 = arith.constant 1.000000e+00 : f32
    %434 = vector.broadcast %cst_212 : f32 to vector<2x32xf32>
    %435 = arith.addf %434, %433 : vector<2x32xf32>
    %436 = arith.divf %434, %435 : vector<2x32xf32>
    %437 = arith.mulf %428, %420 : vector<2x32xf32>
    %438 = arith.mulf %427, %430 : vector<2x32xf32>
    %439 = arith.addf %437, %438 : vector<2x32xf32>
    %440 = math.tanh %439 : vector<2x32xf32>
    %441 = arith.mulf %436, %440 : vector<2x32xf32>
    %c1_213 = arith.constant 1 : index
    %c0_214 = arith.constant 0 : index
    %c0_215 = arith.constant 0 : index
    %442 = vector.load %arg14[%c1_213, %c0_214, %c0_215] : memref<2x2x32xf32, #tpu.memory_space<vmem>>, vector<1x2x32xf32>
    %443 = vector.shape_cast %442 : vector<1x2x32xf32> to vector<2x32xf32>
    %444 = vector.shape_cast %441 : vector<2x32xf32> to vector<1x2x32xf32>
    tpu.vector_store %arg14[%c1_213, %c0_214, %c0_215], %444 {strides = array<i32>} : memref<2x2x32xf32, #tpu.memory_space<vmem>>, vector<1x2x32xf32>,
    %c1_216 = arith.constant 1 : index
    %c0_217 = arith.constant 0 : index
    %c0_218 = arith.constant 0 : index
    %445 = vector.load %arg15[%c1_216, %c0_217, %c0_218] : memref<2x2x32xf32, #tpu.memory_space<vmem>>, vector<1x2x32xf32>
    %446 = vector.shape_cast %445 : vector<1x2x32xf32> to vector<2x32xf32>
    %447 = vector.shape_cast %439 : vector<2x32xf32> to vector<1x2x32xf32>
    tpu.vector_store %arg15[%c1_216, %c0_217, %c0_218], %447 {strides = array<i32>} : memref<2x2x32xf32, #tpu.memory_space<vmem>>, vector<1x2x32xf32>,
    %c2_219 = arith.constant 2 : index
    %c0_220 = arith.constant 0 : index
    %c0_221 = arith.constant 0 : index
    %448 = vector.load %arg9[%c2_219, %c0_220, %c0_221] : memref<8x2x32xf32, #tpu.memory_space<vmem>>, vector<1x2x32xf32>
    %449 = vector.shape_cast %448 : vector<1x2x32xf32> to vector<2x32xf32>
    %450 = vector.shape_cast %441 : vector<2x32xf32> to vector<1x2x32xf32>
    tpu.vector_store %arg9[%c2_219, %c0_220, %c0_221], %450 {strides = array<i32>} : memref<8x2x32xf32, #tpu.memory_space<vmem>>, vector<1x2x32xf32>,
    %c6_222 = arith.constant 6 : index
    %c0_223 = arith.constant 0 : index
    %c0_224 = arith.constant 0 : index
    %451 = vector.load %arg2[%c6_222, %c0_223, %c0_224] : memref<8x2x128xf32, #tpu.memory_space<vmem>>, vector<1x2x128xf32>
    %452 = vector.shape_cast %451 : vector<1x2x128xf32> to vector<2x128xf32>
    %c0_225 = arith.constant 0 : index
    %c0_226 = arith.constant 0 : index
    %c0_227 = arith.constant 0 : index
    %453 = vector.load %arg14[%c0_225, %c0_226, %c0_227] : memref<2x2x32xf32, #tpu.memory_space<vmem>>, vector<1x2x32xf32>
    %454 = vector.shape_cast %453 : vector<1x2x32xf32> to vector<2x32xf32>
    %cst_228 = arith.constant dense<0.000000e+00> : vector<2x128xf32>
    %455 = tpu.matmul %454, %3, %cst_228 {dimension_numbers = #tpu.dot_dimension_numbers<[1], [0], [0], [1], [0, 0, 1, 1], [], []>} : vector<2x32xf32>, vector<32x128xf32>, vector<2x128xf32> -> vector<2x128xf32>
    %456 = arith.addf %452, %455 : vector<2x128xf32>
    %c0_229 = arith.constant 0 : index
    %c0_230 = arith.constant 0 : index
    %c0_231 = arith.constant 0 : index
    %457 = vector.load %arg15[%c0_229, %c0_230, %c0_231] : memref<2x2x32xf32, #tpu.memory_space<vmem>>, vector<1x2x32xf32>
    %458 = vector.shape_cast %457 : vector<1x2x32xf32> to vector<2x32xf32>
    %459 = vector.extract_strided_slice %456 {offsets = [0, 0], sizes = [2, 64], strides = [1, 1]} : vector<2x128xf32> to vector<2x64xf32>
    %460 = arith.negf %459 : vector<2x64xf32>
    %461 = math.exp %460 : vector<2x64xf32>
    %cst_232 = arith.constant 1.000000e+00 : f32
    %462 = vector.broadcast %cst_232 : f32 to vector<2x64xf32>
    %463 = arith.addf %462, %461 : vector<2x64xf32>
    %464 = arith.divf %462, %463 : vector<2x64xf32>
    %465 = vector.extract_strided_slice %464 {offsets = [0, 0], sizes = [2, 32], strides = [1, 1]} : vector<2x64xf32> to vector<2x32xf32>
    %466 = vector.extract_strided_slice %464 {offsets = [0, 32], sizes = [2, 32], strides = [1, 1]} : vector<2x64xf32> to vector<2x32xf32>
    %467 = vector.extract_strided_slice %456 {offsets = [0, 64], sizes = [2, 32], strides = [1, 1]} : vector<2x128xf32> to vector<2x32xf32>
    %468 = math.tanh %467 : vector<2x32xf32>
    %469 = vector.extract_strided_slice %456 {offsets = [0, 96], sizes = [2, 32], strides = [1, 1]} : vector<2x128xf32> to vector<2x32xf32>
    %470 = arith.negf %469 : vector<2x32xf32>
    %471 = math.exp %470 : vector<2x32xf32>
    %cst_233 = arith.constant 1.000000e+00 : f32
    %472 = vector.broadcast %cst_233 : f32 to vector<2x32xf32>
    %473 = arith.addf %472, %471 : vector<2x32xf32>
    %474 = arith.divf %472, %473 : vector<2x32xf32>
    %475 = arith.mulf %466, %458 : vector<2x32xf32>
    %476 = arith.mulf %465, %468 : vector<2x32xf32>
    %477 = arith.addf %475, %476 : vector<2x32xf32>
    %478 = math.tanh %477 : vector<2x32xf32>
    %479 = arith.mulf %474, %478 : vector<2x32xf32>
    %c0_234 = arith.constant 0 : index
    %c0_235 = arith.constant 0 : index
    %c0_236 = arith.constant 0 : index
    %480 = vector.load %arg14[%c0_234, %c0_235, %c0_236] : memref<2x2x32xf32, #tpu.memory_space<vmem>>, vector<1x2x32xf32>
    %481 = vector.shape_cast %480 : vector<1x2x32xf32> to vector<2x32xf32>
    %482 = vector.shape_cast %479 : vector<2x32xf32> to vector<1x2x32xf32>
    tpu.vector_store %arg14[%c0_234, %c0_235, %c0_236], %482 {strides = array<i32>} : memref<2x2x32xf32, #tpu.memory_space<vmem>>, vector<1x2x32xf32>,
    %c0_237 = arith.constant 0 : index
    %c0_238 = arith.constant 0 : index
    %c0_239 = arith.constant 0 : index
    %483 = vector.load %arg15[%c0_237, %c0_238, %c0_239] : memref<2x2x32xf32, #tpu.memory_space<vmem>>, vector<1x2x32xf32>
    %484 = vector.shape_cast %483 : vector<1x2x32xf32> to vector<2x32xf32>
    %485 = vector.shape_cast %477 : vector<2x32xf32> to vector<1x2x32xf32>
    tpu.vector_store %arg15[%c0_237, %c0_238, %c0_239], %485 {strides = array<i32>} : memref<2x2x32xf32, #tpu.memory_space<vmem>>, vector<1x2x32xf32>,
    %cst_240 = arith.constant dense<0.000000e+00> : vector<2x128xf32>
    %486 = tpu.matmul %479, %4, %cst_240 {dimension_numbers = #tpu.dot_dimension_numbers<[1], [0], [0], [1], [0, 0, 1, 1], [], []>} : vector<2x32xf32>, vector<32x128xf32>, vector<2x128xf32> -> vector<2x128xf32>
    %c1_241 = arith.constant 1 : index
    %c0_242 = arith.constant 0 : index
    %c0_243 = arith.constant 0 : index
    %487 = vector.load %arg14[%c1_241, %c0_242, %c0_243] : memref<2x2x32xf32, #tpu.memory_space<vmem>>, vector<1x2x32xf32>
    %488 = vector.shape_cast %487 : vector<1x2x32xf32> to vector<2x32xf32>
    %cst_244 = arith.constant dense<0.000000e+00> : vector<2x128xf32>
    %489 = tpu.matmul %488, %5, %cst_244 {dimension_numbers = #tpu.dot_dimension_numbers<[1], [0], [0], [1], [0, 0, 1, 1], [], []>} : vector<2x32xf32>, vector<32x128xf32>, vector<2x128xf32> -> vector<2x128xf32>
    %490 = arith.addf %486, %489 : vector<2x128xf32>
    %491 = vector.broadcast %6 : vector<1x128xf32> to vector<2x128xf32>
    %492 = arith.addf %490, %491 : vector<2x128xf32>
    %c1_245 = arith.constant 1 : index
    %c0_246 = arith.constant 0 : index
    %c0_247 = arith.constant 0 : index
    %493 = vector.load %arg15[%c1_245, %c0_246, %c0_247] : memref<2x2x32xf32, #tpu.memory_space<vmem>>, vector<1x2x32xf32>
    %494 = vector.shape_cast %493 : vector<1x2x32xf32> to vector<2x32xf32>
    %495 = vector.extract_strided_slice %492 {offsets = [0, 0], sizes = [2, 64], strides = [1, 1]} : vector<2x128xf32> to vector<2x64xf32>
    %496 = arith.negf %495 : vector<2x64xf32>
    %497 = math.exp %496 : vector<2x64xf32>
    %cst_248 = arith.constant 1.000000e+00 : f32
    %498 = vector.broadcast %cst_248 : f32 to vector<2x64xf32>
    %499 = arith.addf %498, %497 : vector<2x64xf32>
    %500 = arith.divf %498, %499 : vector<2x64xf32>
    %501 = vector.extract_strided_slice %500 {offsets = [0, 0], sizes = [2, 32], strides = [1, 1]} : vector<2x64xf32> to vector<2x32xf32>
    %502 = vector.extract_strided_slice %500 {offsets = [0, 32], sizes = [2, 32], strides = [1, 1]} : vector<2x64xf32> to vector<2x32xf32>
    %503 = vector.extract_strided_slice %492 {offsets = [0, 64], sizes = [2, 32], strides = [1, 1]} : vector<2x128xf32> to vector<2x32xf32>
    %504 = math.tanh %503 : vector<2x32xf32>
    %505 = vector.extract_strided_slice %492 {offsets = [0, 96], sizes = [2, 32], strides = [1, 1]} : vector<2x128xf32> to vector<2x32xf32>
    %506 = arith.negf %505 : vector<2x32xf32>
    %507 = math.exp %506 : vector<2x32xf32>
    %cst_249 = arith.constant 1.000000e+00 : f32
    %508 = vector.broadcast %cst_249 : f32 to vector<2x32xf32>
    %509 = arith.addf %508, %507 : vector<2x32xf32>
    %510 = arith.divf %508, %509 : vector<2x32xf32>
    %511 = arith.mulf %502, %494 : vector<2x32xf32>
    %512 = arith.mulf %501, %504 : vector<2x32xf32>
    %513 = arith.addf %511, %512 : vector<2x32xf32>
    %514 = math.tanh %513 : vector<2x32xf32>
    %515 = arith.mulf %510, %514 : vector<2x32xf32>
    %c1_250 = arith.constant 1 : index
    %c0_251 = arith.constant 0 : index
    %c0_252 = arith.constant 0 : index
    %516 = vector.load %arg14[%c1_250, %c0_251, %c0_252] : memref<2x2x32xf32, #tpu.memory_space<vmem>>, vector<1x2x32xf32>
    %517 = vector.shape_cast %516 : vector<1x2x32xf32> to vector<2x32xf32>
    %518 = vector.shape_cast %515 : vector<2x32xf32> to vector<1x2x32xf32>
    tpu.vector_store %arg14[%c1_250, %c0_251, %c0_252], %518 {strides = array<i32>} : memref<2x2x32xf32, #tpu.memory_space<vmem>>, vector<1x2x32xf32>,
    %c1_253 = arith.constant 1 : index
    %c0_254 = arith.constant 0 : index
    %c0_255 = arith.constant 0 : index
    %519 = vector.load %arg15[%c1_253, %c0_254, %c0_255] : memref<2x2x32xf32, #tpu.memory_space<vmem>>, vector<1x2x32xf32>
    %520 = vector.shape_cast %519 : vector<1x2x32xf32> to vector<2x32xf32>
    %521 = vector.shape_cast %513 : vector<2x32xf32> to vector<1x2x32xf32>
    tpu.vector_store %arg15[%c1_253, %c0_254, %c0_255], %521 {strides = array<i32>} : memref<2x2x32xf32, #tpu.memory_space<vmem>>, vector<1x2x32xf32>,
    %c1_256 = arith.constant 1 : index
    %c0_257 = arith.constant 0 : index
    %c0_258 = arith.constant 0 : index
    %522 = vector.load %arg9[%c1_256, %c0_257, %c0_258] : memref<8x2x32xf32, #tpu.memory_space<vmem>>, vector<1x2x32xf32>
    %523 = vector.shape_cast %522 : vector<1x2x32xf32> to vector<2x32xf32>
    %524 = vector.shape_cast %515 : vector<2x32xf32> to vector<1x2x32xf32>
    tpu.vector_store %arg9[%c1_256, %c0_257, %c0_258], %524 {strides = array<i32>} : memref<8x2x32xf32, #tpu.memory_space<vmem>>, vector<1x2x32xf32>,
    %c7_259 = arith.constant 7 : index
    %c0_260 = arith.constant 0 : index
    %c0_261 = arith.constant 0 : index
    %525 = vector.load %arg2[%c7_259, %c0_260, %c0_261] : memref<8x2x128xf32, #tpu.memory_space<vmem>>, vector<1x2x128xf32>
    %526 = vector.shape_cast %525 : vector<1x2x128xf32> to vector<2x128xf32>
    %c0_262 = arith.constant 0 : index
    %c0_263 = arith.constant 0 : index
    %c0_264 = arith.constant 0 : index
    %527 = vector.load %arg14[%c0_262, %c0_263, %c0_264] : memref<2x2x32xf32, #tpu.memory_space<vmem>>, vector<1x2x32xf32>
    %528 = vector.shape_cast %527 : vector<1x2x32xf32> to vector<2x32xf32>
    %cst_265 = arith.constant dense<0.000000e+00> : vector<2x128xf32>
    %529 = tpu.matmul %528, %3, %cst_265 {dimension_numbers = #tpu.dot_dimension_numbers<[1], [0], [0], [1], [0, 0, 1, 1], [], []>} : vector<2x32xf32>, vector<32x128xf32>, vector<2x128xf32> -> vector<2x128xf32>
    %530 = arith.addf %526, %529 : vector<2x128xf32>
    %c0_266 = arith.constant 0 : index
    %c0_267 = arith.constant 0 : index
    %c0_268 = arith.constant 0 : index
    %531 = vector.load %arg15[%c0_266, %c0_267, %c0_268] : memref<2x2x32xf32, #tpu.memory_space<vmem>>, vector<1x2x32xf32>
    %532 = vector.shape_cast %531 : vector<1x2x32xf32> to vector<2x32xf32>
    %533 = vector.extract_strided_slice %530 {offsets = [0, 0], sizes = [2, 64], strides = [1, 1]} : vector<2x128xf32> to vector<2x64xf32>
    %534 = arith.negf %533 : vector<2x64xf32>
    %535 = math.exp %534 : vector<2x64xf32>
    %cst_269 = arith.constant 1.000000e+00 : f32
    %536 = vector.broadcast %cst_269 : f32 to vector<2x64xf32>
    %537 = arith.addf %536, %535 : vector<2x64xf32>
    %538 = arith.divf %536, %537 : vector<2x64xf32>
    %539 = vector.extract_strided_slice %538 {offsets = [0, 0], sizes = [2, 32], strides = [1, 1]} : vector<2x64xf32> to vector<2x32xf32>
    %540 = vector.extract_strided_slice %538 {offsets = [0, 32], sizes = [2, 32], strides = [1, 1]} : vector<2x64xf32> to vector<2x32xf32>
    %541 = vector.extract_strided_slice %530 {offsets = [0, 64], sizes = [2, 32], strides = [1, 1]} : vector<2x128xf32> to vector<2x32xf32>
    %542 = math.tanh %541 : vector<2x32xf32>
    %543 = vector.extract_strided_slice %530 {offsets = [0, 96], sizes = [2, 32], strides = [1, 1]} : vector<2x128xf32> to vector<2x32xf32>
    %544 = arith.negf %543 : vector<2x32xf32>
    %545 = math.exp %544 : vector<2x32xf32>
    %cst_270 = arith.constant 1.000000e+00 : f32
    %546 = vector.broadcast %cst_270 : f32 to vector<2x32xf32>
    %547 = arith.addf %546, %545 : vector<2x32xf32>
    %548 = arith.divf %546, %547 : vector<2x32xf32>
    %549 = arith.mulf %540, %532 : vector<2x32xf32>
    %550 = arith.mulf %539, %542 : vector<2x32xf32>
    %551 = arith.addf %549, %550 : vector<2x32xf32>
    %552 = math.tanh %551 : vector<2x32xf32>
    %553 = arith.mulf %548, %552 : vector<2x32xf32>
    %c0_271 = arith.constant 0 : index
    %c0_272 = arith.constant 0 : index
    %c0_273 = arith.constant 0 : index
    %554 = vector.load %arg14[%c0_271, %c0_272, %c0_273] : memref<2x2x32xf32, #tpu.memory_space<vmem>>, vector<1x2x32xf32>
    %555 = vector.shape_cast %554 : vector<1x2x32xf32> to vector<2x32xf32>
    %556 = vector.shape_cast %553 : vector<2x32xf32> to vector<1x2x32xf32>
    tpu.vector_store %arg14[%c0_271, %c0_272, %c0_273], %556 {strides = array<i32>} : memref<2x2x32xf32, #tpu.memory_space<vmem>>, vector<1x2x32xf32>,
    %c0_274 = arith.constant 0 : index
    %c0_275 = arith.constant 0 : index
    %c0_276 = arith.constant 0 : index
    %557 = vector.load %arg15[%c0_274, %c0_275, %c0_276] : memref<2x2x32xf32, #tpu.memory_space<vmem>>, vector<1x2x32xf32>
    %558 = vector.shape_cast %557 : vector<1x2x32xf32> to vector<2x32xf32>
    %559 = vector.shape_cast %551 : vector<2x32xf32> to vector<1x2x32xf32>
    tpu.vector_store %arg15[%c0_274, %c0_275, %c0_276], %559 {strides = array<i32>} : memref<2x2x32xf32, #tpu.memory_space<vmem>>, vector<1x2x32xf32>,
    %cst_277 = arith.constant dense<0.000000e+00> : vector<2x128xf32>
    %560 = tpu.matmul %553, %4, %cst_277 {dimension_numbers = #tpu.dot_dimension_numbers<[1], [0], [0], [1], [0, 0, 1, 1], [], []>} : vector<2x32xf32>, vector<32x128xf32>, vector<2x128xf32> -> vector<2x128xf32>
    %c1_278 = arith.constant 1 : index
    %c0_279 = arith.constant 0 : index
    %c0_280 = arith.constant 0 : index
    %561 = vector.load %arg14[%c1_278, %c0_279, %c0_280] : memref<2x2x32xf32, #tpu.memory_space<vmem>>, vector<1x2x32xf32>
    %562 = vector.shape_cast %561 : vector<1x2x32xf32> to vector<2x32xf32>
    %cst_281 = arith.constant dense<0.000000e+00> : vector<2x128xf32>
    %563 = tpu.matmul %562, %5, %cst_281 {dimension_numbers = #tpu.dot_dimension_numbers<[1], [0], [0], [1], [0, 0, 1, 1], [], []>} : vector<2x32xf32>, vector<32x128xf32>, vector<2x128xf32> -> vector<2x128xf32>
    %564 = arith.addf %560, %563 : vector<2x128xf32>
    %565 = vector.broadcast %6 : vector<1x128xf32> to vector<2x128xf32>
    %566 = arith.addf %564, %565 : vector<2x128xf32>
    %c1_282 = arith.constant 1 : index
    %c0_283 = arith.constant 0 : index
    %c0_284 = arith.constant 0 : index
    %567 = vector.load %arg15[%c1_282, %c0_283, %c0_284] : memref<2x2x32xf32, #tpu.memory_space<vmem>>, vector<1x2x32xf32>
    %568 = vector.shape_cast %567 : vector<1x2x32xf32> to vector<2x32xf32>
    %569 = vector.extract_strided_slice %566 {offsets = [0, 0], sizes = [2, 64], strides = [1, 1]} : vector<2x128xf32> to vector<2x64xf32>
    %570 = arith.negf %569 : vector<2x64xf32>
    %571 = math.exp %570 : vector<2x64xf32>
    %cst_285 = arith.constant 1.000000e+00 : f32
    %572 = vector.broadcast %cst_285 : f32 to vector<2x64xf32>
    %573 = arith.addf %572, %571 : vector<2x64xf32>
    %574 = arith.divf %572, %573 : vector<2x64xf32>
    %575 = vector.extract_strided_slice %574 {offsets = [0, 0], sizes = [2, 32], strides = [1, 1]} : vector<2x64xf32> to vector<2x32xf32>
    %576 = vector.extract_strided_slice %574 {offsets = [0, 32], sizes = [2, 32], strides = [1, 1]} : vector<2x64xf32> to vector<2x32xf32>
    %577 = vector.extract_strided_slice %566 {offsets = [0, 64], sizes = [2, 32], strides = [1, 1]} : vector<2x128xf32> to vector<2x32xf32>
    %578 = math.tanh %577 : vector<2x32xf32>
    %579 = vector.extract_strided_slice %566 {offsets = [0, 96], sizes = [2, 32], strides = [1, 1]} : vector<2x128xf32> to vector<2x32xf32>
    %580 = arith.negf %579 : vector<2x32xf32>
    %581 = math.exp %580 : vector<2x32xf32>
    %cst_286 = arith.constant 1.000000e+00 : f32
    %582 = vector.broadcast %cst_286 : f32 to vector<2x32xf32>
    %583 = arith.addf %582, %581 : vector<2x32xf32>
    %584 = arith.divf %582, %583 : vector<2x32xf32>
    %585 = arith.mulf %576, %568 : vector<2x32xf32>
    %586 = arith.mulf %575, %578 : vector<2x32xf32>
    %587 = arith.addf %585, %586 : vector<2x32xf32>
    %588 = math.tanh %587 : vector<2x32xf32>
    %589 = arith.mulf %584, %588 : vector<2x32xf32>
    %c1_287 = arith.constant 1 : index
    %c0_288 = arith.constant 0 : index
    %c0_289 = arith.constant 0 : index
    %590 = vector.load %arg14[%c1_287, %c0_288, %c0_289] : memref<2x2x32xf32, #tpu.memory_space<vmem>>, vector<1x2x32xf32>
    %591 = vector.shape_cast %590 : vector<1x2x32xf32> to vector<2x32xf32>
    %592 = vector.shape_cast %589 : vector<2x32xf32> to vector<1x2x32xf32>
    tpu.vector_store %arg14[%c1_287, %c0_288, %c0_289], %592 {strides = array<i32>} : memref<2x2x32xf32, #tpu.memory_space<vmem>>, vector<1x2x32xf32>,
    %c1_290 = arith.constant 1 : index
    %c0_291 = arith.constant 0 : index
    %c0_292 = arith.constant 0 : index
    %593 = vector.load %arg15[%c1_290, %c0_291, %c0_292] : memref<2x2x32xf32, #tpu.memory_space<vmem>>, vector<1x2x32xf32>
    %594 = vector.shape_cast %593 : vector<1x2x32xf32> to vector<2x32xf32>
    %595 = vector.shape_cast %587 : vector<2x32xf32> to vector<1x2x32xf32>
    tpu.vector_store %arg15[%c1_290, %c0_291, %c0_292], %595 {strides = array<i32>} : memref<2x2x32xf32, #tpu.memory_space<vmem>>, vector<1x2x32xf32>,
    %c0_293 = arith.constant 0 : index
    %c0_294 = arith.constant 0 : index
    %c0_295 = arith.constant 0 : index
    %596 = vector.load %arg9[%c0_293, %c0_294, %c0_295] : memref<8x2x32xf32, #tpu.memory_space<vmem>>, vector<1x2x32xf32>
    %597 = vector.shape_cast %596 : vector<1x2x32xf32> to vector<2x32xf32>
    %598 = vector.shape_cast %589 : vector<2x32xf32> to vector<1x2x32xf32>
    tpu.vector_store %arg9[%c0_293, %c0_294, %c0_295], %598 {strides = array<i32>} : memref<8x2x32xf32, #tpu.memory_space<vmem>>, vector<1x2x32xf32>,
    return
  }
  func.func @transform_0(%arg0: i32, %arg1: i32) -> (i32, i32, i32) {
    %c0_i32 = arith.constant 0 : i32
    %c0_i32_0 = arith.constant 0 : i32
    return %arg1, %arg0, %c0_i32 : i32, i32, i32
  }
  func.func @transform_1(%arg0: i32, %arg1: i32) -> (i32, i32, i32) {
    %c0_i32 = arith.constant 0 : i32
    %c0_i32_0 = arith.constant 0 : i32
    %c0_i32_1 = arith.constant 0 : i32
    return %c0_i32, %arg0, %c0_i32_0 : i32, i32, i32
  }
  func.func @transform_2(%arg0: i32, %arg1: i32) -> (i32, i32, i32) {
    %c0_i32 = arith.constant 0 : i32
    %c0_i32_0 = arith.constant 0 : i32
    %c0_i32_1 = arith.constant 0 : i32
    return %c0_i32, %arg0, %c0_i32_0 : i32, i32, i32
  }
  func.func @transform_7(%arg0: i32, %arg1: i32) -> (i32, i32, i32) {
    %c0_i32 = arith.constant 0 : i32
    %0 = arith.subi %c0_i32, %arg1 : i32
    %c0_i32_0 = arith.constant 0 : i32
    %c0_i32_1 = arith.constant 0 : i32
    return %0, %arg0, %c0_i32_0 : i32, i32, i32
  }
}

</mosaic_0001>

<bundles_post_ra>
// kernel: tpu_custom_call.1
= control target key start
LH: loop header
LB: loop body
LE: loop exit
PB: predicated region body
PF: predicated region fallthrough
CT: control target
= control target key end

     0   :  { %12 = vsyncpa [#allocation10], 0  ;;  %s4002_s0 = inlined_call_operand.hbm [shape: f32[8,2,128], index: 0, kind: input, shape index: {}]   ;;  %s4003_s1 = inlined_call_operand.hbm [shape: f32[2,2,32], index: 1, kind: input, shape index: {}]   ;;  %s4004_s2 = inlined_call_operand.vmem [shape: f32[2,2,32], index: 2, kind: input, shape index: {}]   ;;  %s4005_s3 = inlined_call_operand.hbm [shape: f32[32,128], index: 3, kind: input, shape index: {}]   ;;  %s4006_s4 = inlined_call_operand.hbm [shape: f32[32,128], index: 4, kind: input, shape index: {}]   ;;  %s4007_s5 = inlined_call_operand.hbm [shape: f32[32,128], index: 5, kind: input, shape index: {}]   ;;  %s4008_s6 = inlined_call_operand.vmem [shape: f32[1,128], index: 6, kind: input, shape index: {}]   ;;  %s4009_s7 = inlined_call_operand.hbm [shape: f32[8,2,32], index: 7, kind: output, shape index: {}]  }
   0x1   :  { %13 = vsyncpa [#allocation13], 0 }
   0x2   :  { %14 = vsyncpa [#allocation11], 0  ;;  %s3527_s24 = smov [#allocation9]   ;;  %s3381_s28 = scalar_lea.hbm %s4002_s0, 256 }
   0x3   :  { %s20_s25 = sshll.u32 %s3527_s24, 4  ;;  %p3382_p0 = scmp.ne.s32.totalorder %s4002_s0, %s3381_s28  ;;  %s21_s25 = int_to_ptr.vmem [resolvable:$true] %s20_s25 }
   0x4   :  { %p3385_p1 = scmp.lt.u32.totalorder %s3381_s28, %s4002_s0 }
   0x6   :  { %p3387_p2 = pnand %p3385_p1, %p3382_p0 }
   0x8   :  { %3390 = shalt.err (!%p3387_p2)
}
   0x9   :  { %s3391_s10 = scalar_lea.vmem %s21_s25, 256  ;;  %p3396_p4 = scmp.lt.s32.totalorder %s21_s25, %s21_s25 }
   0xa   :  { %p3392_p3 = scmp.ne.s32.totalorder %s21_s25, %s3391_s10  ;;  %p3397_p5 = scmp.lt.s32.totalorder %s3391_s10, %s3391_s10 }
   0xc   :  { %p3398_p6 = por %p3397_p5, %p3396_p4 }
   0xe   :  { %p3399_p7 = pnand %p3398_p6, %p3392_p3 }
  0x10   :  { %3402 = shalt.err (!%p3399_p7)
}
  0x11   :  { %s3528_s11 = smov 32   ;;  %s3529_s12 = smov 2  }
  0x12   :  { %26 = dma.hbm_to_vmem [thread:$0]  %s4002_s0, 256, %s21_s25, [#allocation10], %s3528_s11, %s3528_s11, %s3529_s12  }
  0x13   :  { %s3530_s15 = smov [#allocation12]   ;;  %s3403_s19 = scalar_lea.hbm %s4003_s1, 64 }
  0x14   :  { %s32_s16 = sshll.u32 %s3530_s15, 4  ;;  %p3404_p8 = scmp.ne.s32.totalorder %s4003_s1, %s3403_s19  ;;  %s33_s16 = int_to_ptr.vmem [resolvable:$true] %s32_s16 }
  0x15   :  { %p3407_p9 = scmp.lt.u32.totalorder %s3403_s19, %s4003_s1 }
  0x17   :  { %p3409_p10 = pnand %p3407_p9, %p3404_p8 }
  0x19   :  { %3412 = shalt.err (!%p3409_p10)
}
  0x1a   :  { %s3413_s24 = scalar_lea.vmem %s33_s16, 64  ;;  %p3418_p12 = scmp.lt.s32.totalorder %s33_s16, %s33_s16 }
  0x1b   :  { %p3414_p11 = scmp.ne.s32.totalorder %s33_s16, %s3413_s24  ;;  %p3419_p13 = scmp.lt.s32.totalorder %s3413_s24, %s3413_s24 }
  0x1d   :  { %p3420_p0 = por %p3419_p13, %p3418_p12 }
  0x1f   :  { %p3421_p1 = pnand %p3420_p0, %p3414_p11 }
  0x21   :  { %3424 = shalt.err (!%p3421_p1)
}
  0x22   :  { %38 = dma.hbm_to_vmem [thread:$0]  %s4003_s1, 64, %s33_s16, [#allocation13], %s3528_s11, %s3528_s11, %s3529_s12  }
  0x23   :  { %3513 = dma.done.wait [#allocation10], 256  }
  0x24   :  { %3514 = vsyncadd [#allocation10], 4294967040 }
  0x25   :  { %3515 = dma.done.wait [#allocation13], 64  }
  0x26   :  { %3516 = vsyncadd [#allocation13], 4294967232  ;;  %s3531_s26 = smov [#allocation2]   ;;  %s3532_s28 = smov [#allocation3]  }
  0x27   :  { %s60_s27 = sshll.u32 %s3531_s26, 4  ;;  %s72_s29 = sshll.u32 %s3532_s28, 4  ;;  %s61_s27 = int_to_ptr.vmem [resolvable:$true] %s60_s27  ;;  %s73_s29 = int_to_ptr.vmem [resolvable:$true] %s72_s29 }
  0x28   :  { %s3425_s9 = scalar_lea.hbm %s4005_s3, 512 }
  0x29   :  { %p3426_p2 = scmp.ne.s32.totalorder %s4005_s3, %s3425_s9  ;;  %p3429_p3 = scmp.lt.u32.totalorder %s3425_s9, %s4005_s3 }
  0x2b   :  { %p3431_p4 = pnand %p3429_p3, %p3426_p2 }
  0x2d   :  { %3434 = shalt.err (!%p3431_p4)  }
  0x2e   :  { %s3435_s15 = scalar_lea.vmem %s61_s27, 512  ;;  %p3440_p6 = scmp.lt.s32.totalorder %s61_s27, %s61_s27 }
  0x2f   :  { %p3436_p5 = scmp.ne.s32.totalorder %s61_s27, %s3435_s15  ;;  %p3441_p7 = scmp.lt.s32.totalorder %s3435_s15, %s3435_s15 }
  0x31   :  { %p3442_p8 = por %p3441_p7, %p3440_p6 }
  0x33   :  { %p3443_p9 = pnand %p3442_p8, %p3436_p5 }
  0x35   :  { %3446 = shalt.err (!%p3443_p9)  }
  0x36   :  { %63 = dma.hbm_to_vmem [thread:$0]  %s4005_s3, 512, %s61_s27, [#allocation8] }
  0x37   :  { %s3447_s20 = scalar_lea.hbm %s4006_s4, 512 }
  0x38   :  { %p3448_p10 = scmp.ne.s32.totalorder %s4006_s4, %s3447_s20  ;;  %p3451_p11 = scmp.lt.u32.totalorder %s3447_s20, %s4006_s4 }
  0x3a   :  { %p3453_p12 = pnand %p3451_p11, %p3448_p10 }
  0x3c   :  { %3456 = shalt.err (!%p3453_p12)  }
  0x3d   :  { %s3457_s0 = scalar_lea.vmem %s73_s29, 512  ;;  %p3462_p0 = scmp.lt.s32.totalorder %s73_s29, %s73_s29 }
  0x3e   :  { %p3458_p13 = scmp.ne.s32.totalorder %s73_s29, %s3457_s0  ;;  %p3463_p1 = scmp.lt.s32.totalorder %s3457_s0, %s3457_s0 }
  0x40   :  { %p3464_p2 = por %p3463_p1, %p3462_p0 }
  0x42   :  { %p3465_p3 = pnand %p3464_p2, %p3458_p13 }
  0x44   :  { %3468 = shalt.err (!%p3465_p3)  }
  0x45   :  { %75 = dma.hbm_to_vmem [thread:$0]  %s4006_s4, 512, %s73_s29, [#allocation8 + $0x1]  ;;  %v106_v0 = vld [vmem:[%s4008_s6] sm:$0x1] }
  0x46   :  { %s3533_s26 = smov [#allocation4]   ;;  %s3469_s10 = scalar_lea.hbm %s4007_s5, 512 }
  0x47   :  { %s84_s27 = sshll.u32 %s3533_s26, 4  ;;  %p3470_p4 = scmp.ne.s32.totalorder %s4007_s5, %s3469_s10  ;;  %s85_s27 = int_to_ptr.vmem [resolvable:$true] %s84_s27 }
  0x48   :  { %p3473_p5 = scmp.lt.u32.totalorder %s3469_s10, %s4007_s5 }
  0x4a   :  { %p3475_p6 = pnand %p3473_p5, %p3470_p4 }
  0x4c   :  { %3478 = shalt.err (!%p3475_p6)  }
  0x4d   :  { %s3479_s4 = scalar_lea.vmem %s85_s27, 512  ;;  %p3484_p8 = scmp.lt.s32.totalorder %s85_s27, %s85_s27 }
  0x4e   :  { %p3480_p7 = scmp.ne.s32.totalorder %s85_s27, %s3479_s4  ;;  %p3485_p9 = scmp.lt.s32.totalorder %s3479_s4, %s3479_s4 }
  0x50   :  { %p3486_p10 = por %p3485_p9, %p3484_p8 }
  0x52   :  { %p3487_p11 = pnand %p3486_p10, %p3480_p7 }
  0x54   :  { %3490 = shalt.err (!%p3487_p11)  }
  0x55   :  { %87 = dma.hbm_to_vmem [thread:$0]  %s4007_s5, 512, %s85_s27, [#allocation8 + $0x2]  ;;  %107 = vst [vmem:[#allocation5] sm:$0x1] %v106_v0 }
  0x56   :  { %132 = vsyncadd [#allocation8 + $0x3], 16  ;;  %v133_v1 = vld [vmem:[#allocation12] sm:$0x3]  ;;  %vm135_vm0 = vcmask 254976  }
  0x57   :  { %136 = vst.msk [vmem:[#allocation6] sm:$0x3] %vm135_vm0, %v133_v1  ;;  %v134_v2 = vld [vmem:[#allocation12 + $0x2] sm:$0x3]  ;;  %v138_v3 = vld [vmem:[%s4004_s2] sm:$0x3] }
  0x58   :  { %v139_v4 = vld [vmem:[%s4004_s2 + $0x2] sm:$0x3]  ;;  %137 = vst.msk [vmem:[#allocation6 + $0x2] sm:$0x3] %vm135_vm0, %v134_v2  ;;  %140 = vst.msk [vmem:[#allocation7] sm:$0x3] %vm135_vm0, %v138_v3 }
  0x59   :  { %141 = vst.msk [vmem:[#allocation7 + $0x2] sm:$0x3] %vm135_vm0, %v139_v4 }
  0x5a   :  { %3517 = dma.done.wait [#allocation8], 512 }
  0x5b   :  { %3518 = vsyncadd [#allocation8], 4294966784 }
  0x5c   :  { %3519 = dma.done.wait [#allocation8 + $0x1], 512 }
  0x5d   :  { %3520 = vsyncadd [#allocation8 + $0x1], 4294966784 }
  0x5e   :  { %3521 = dma.done.wait [#allocation8 + $0x2], 512 }
  0x5f   :  { %3522 = vsyncadd [#allocation8 + $0x2], 4294966784 }
  0x60   :  { %3523 = dma.done.wait [#allocation8 + $0x3], 16 }
  0x61   :  { %3524 = vsyncadd [#allocation8 + $0x3], 4294967280  ;;  %v3534_v5 = vmov 0.0|0.0   ;;  %vm3535_vm1 = vmmov 0   ;;  %v3536_v6 = vmov 0.0   ;;  %v152_v7 = vld [vmem:[#allocation2] sm:$0xff] }
  0x62   :  { %3095 = vmatprep.subr.bf16.mxu0 %v3534_v5  ;;  %2839 = vmatprep.mubr.msk.f32.mxu0 %vm3535_vm1, %v3536_v6  ;;  %v153_v8 = vld [vmem:[#allocation2 + $0x8] sm:$0xff]  ;;  %v154_v9 = vld [vmem:[#allocation2 + $0x10] sm:$0xff]  ;;  %v155_v11 = vld [vmem:[#allocation2 + $0x18] sm:$0xff]  ;;  %vm167_vm2 = vcmask 261120   ;;  %s3537_s2 = smov 64   ;;  %s3538_s5 = smov 96  }
  0x63   :  { %3101 = vmatprep.subr.bf16.mxu1 %v3534_v5  ;;  %2850 = vmatprep.mubr.msk.f32.mxu1 %vm3535_vm1, %v3536_v6  ;;  %v3665_v10 = vpack.c.bf16 %v153_v8, %v152_v7  ;;  %v3668_v12 = vpack.c.bf16 %v155_v11, %v154_v9  ;;  %v166_v13 = vld [vmem:[#allocation6] sm:$0x3]  ;;  %v165_v14 = vld [vmem:[#allocation9] sm:$0x3]  ;;  %v242_v19 = vld [vmem:[#allocation7] sm:$0x3] }
  0x64   :  { %v160_v30 = vld [vmem:[#allocation4] sm:$0xff]  ;;  %v161_v31 = vld [vmem:[#allocation4 + $0x8] sm:$0xff]  ;;  %v162_v35 = vld [vmem:[#allocation4 + $0x10] sm:$0xff]  ;;  %s3539_s20 = smov [#allocation14]  }
  0x65   :  { %3097 = vmatpush3.bf16.msra.mxu0 %v3665_v10  ;;  %v156_v32 = vld [vmem:[#allocation3] sm:$0xff]  ;;  %v3679_v33 = vpack.c.bf16 %v161_v31, %v160_v30  ;;  %v157_v34 = vld [vmem:[#allocation3 + $0x8] sm:$0xff]  ;;  %v163_v36 = vld [vmem:[#allocation4 + $0x18] sm:$0xff]  ;;  %s2614_s21 = sshll.u32 %s3539_s20, 4  ;;  %s2615_s21 = int_to_ptr.vmem [resolvable:$true] %s2614_s21 }
  0x66   :  { %3098 = vmatprep.subr.bf16.mxu0 %v3534_v5  ;;  %v3681_v37 = vpack.c.bf16 %v157_v34, %v156_v32  ;;  %v158_v38 = vld [vmem:[#allocation3 + $0x10] sm:$0xff]  ;;  %v159_v39 = vld [vmem:[#allocation3 + $0x18] sm:$0xff]  ;;  %v3684_v40 = vpack.c.bf16 %v163_v36, %v162_v35  ;;  %v283_v42 = vld [vmem:[#allocation6 + $0x2] sm:$0x3]  ;;  %s3491_s22 = scalar_lea.vmem %s2615_s21, 256  ;;  %p3496_p13 = scmp.lt.s32.totalorder %s2615_s21, %s2615_s21 }
  0x67   :  { %3103 = vmatpush3.bf16.msra.mxu1 %v3679_v33  ;;  %v3688_v41 = vpack.c.bf16 %v159_v39, %v158_v38  ;;  %v3721_v51 = vld [vmem:[#allocation5] ss:$0 sm:$0xff]  ;;  %v479_v56 = vld [vmem:[#allocation9 + $0x2] sm:$0x3]  ;;  %v437_v61 = vld [vmem:[#allocation7 + $0x2] sm:$0x3]  ;;  %p3492_p12 = scmp.ne.s32.totalorder %s2615_s21, %s3491_s22  ;;  %p3497_p0 = scmp.lt.s32.totalorder %s3491_s22, %s3491_s22 }
  0x68   :  { %3104 = vmatprep.subr.bf16.mxu1 %v3534_v5 }
  0x69   :  { %3100 = vmatpush3.bf16.msra.mxu0 %v3668_v12  ;;  %p3498_p1 = por %p3497_p0, %p3496_p13 }
  0x6a   :  { %3107 = vmatprep.subr.bf16.mxu0 %v3534_v5 }
  0x6b   :  { %3106 = vmatpush3.bf16.msra.mxu1 %v3684_v40  ;;  %p3499_p2 = pnand %p3498_p1, %p3492_p12 }
  0x6c   :  { %2840 = vmatmul.mubr.msk.f32.vlgmr.msra.gmra.mrb[0].mxu0 %vm167_vm2, %v166_v13  ;;  %3113 = vmatprep.subr.bf16.mxu1 %v3534_v5 }
  0x6d   :  { %2861 = vmatprep.mubr.msk.f32.mxu0 %vm3535_vm1, %v3536_v6  ;;  %3109 = vmatpush3.bf16.msra.mxu0 %v3681_v37 }
  0x6e   :  { %3110 = vmatprep.subr.bf16.mxu0 %v3534_v5  ;;  %2851 = vmatmul.mubr.msk.f32.vlgmr.msra.gmra.mrb[0].mxu1 %vm167_vm2, %v283_v42 }
  0x6f   :  { %3115 = vmatpush3.bf16.msra.mxu1 %v3665_v10  ;;  %2872 = vmatprep.mubr.msk.f32.mxu1 %vm3535_vm1, %v3536_v6 }
  0x70   :  { %3116 = vmatprep.subr.bf16.mxu1 %v3534_v5 }
  0x71   :  { %3112 = vmatpush3.bf16.msra.mxu0 %v3688_v41 }
  0x72   :  { %3119 = vmatprep.subr.bf16.mxu0 %v3534_v5 }
  0x73   :  { %3118 = vmatpush3.bf16.msra.mxu1 %v3668_v12 }
  0x74   :  { %3125 = vmatprep.subr.bf16.mxu1 %v3534_v5 }
 0x13f   :  { %v237_v15 = vpop.f32.mrb[0].mxu0 }
 0x140   :  { %v241_v16 = vadd.f32 %v237_v15, %v165_v14  ;;  %v2841_v17 = vpop.f32.mrb[1].mxu0 }
 0x141   :  { %v353_v47 = vpop.f32.mrb[0].mxu1 }
 0x142   :  { %3252 = vtanh.f32 %v241_v16  ;;  %v2667_v20 = vmul.f32 -1.442695, %v241_v16  ;;  %v2852_v48 = vpop.f32.mrb[1].mxu1 }
 0x144   :  { %3254 = vpow2.f32 %v2667_v20 }
 0x14c   :  { %v3253_v18 = vpop.eup %3252 }
 0x14d   :  { %256 = vrot.lane.b32.xlu0 %v3253_v18, %s3537_s2 }
 0x14e   :  { %v3255_v21 = vpop.eup %3254 }
 0x14f   :  { %v246_v22 = vadd.f32 1.0, %v3255_v21 }
 0x151   :  { %251 = vrot.lane.b32.xlu0 %v242_v19, %s3528_s11  ;;  %3256 = vrcp.f32 %v246_v22 }
 0x15b   :  { %v3257_v23 = vpop.eup %3256 }
 0x1bf   :  { %v257_v24 = vpop.permute.xlu0 %256 }
 0x1c0   :  { %v259_v25 = vmul.f32 %v3257_v23, %v257_v24 }
 0x1c2   :  { %261 = vrot.lane.b32.xlu1 %v259_v25, %s3528_s11 }
 0x1c3   :  { %v252_v26 = vpop.permute.xlu0 %251 }
 0x1c4   :  { %v254_v27 = vmul.f32 %v3257_v23, %v252_v26 }
 0x234   :  { %v262_v28 = vpop.permute.xlu1 %261 }
 0x235   :  { %v264_v29 = vadd.f32 %v262_v28, %v254_v27 }
 0x237   :  { %3258 = vtanh.f32 %v264_v29 }
 0x241   :  { %v3259_v43 = vpop.eup %3258 }
 0x242   :  { %267 = vrot.lane.b32.xlu1 %v3259_v43, %s3537_s2 }
 0x246   :  { %278 = vrot.lane.b32.xlu1 %v264_v29, %s3538_s5 }
 0x2b4   :  { %v268_v44 = vpop.permute.xlu1 %267 }
 0x2b5   :  { %v270_v45 = vmul.f32 %v3257_v23, %v268_v44 }
 0x2b7   :  { %272 = vrot.lane.b32.xlu0 %v270_v45, %s3528_s11 }
 0x2b8   :  { %v279_v46 = vpop.permute.xlu1 %278 }
 0x2b9   :  { %281 = vst.msk [vmem:[#allocation7] sm:$0x3] %vm135_vm0, %v279_v46  ;;  %v783_v46 = vld [vmem:[#allocation9 + $0x4] sm:$0x3] }
 0x2c0   :  { %v555_v63 = vld [vmem:[#allocation7] sm:$0x3] }
 0x329   :  { %v273_v49 = vpop.permute.xlu0 %272 }
 0x32a   :  { %276 = vst.msk [vmem:[#allocation6] sm:$0x3] %vm135_vm0, %v273_v49  ;;  %2862 = vmatmul.mubr.msk.f32.vlgmr.msra.gmra.mrb[2].mxu0 %vm167_vm2, %v273_v49 }
 0x32b   :  { %3121 = vmatpush3.bf16.msra.mxu0 %v3679_v33  ;;  %2883 = vmatprep.mubr.msk.f32.mxu0 %vm3535_vm1, %v3536_v6 }
 0x32c   :  { %3122 = vmatprep.subr.bf16.mxu0 %v3534_v5 }
 0x32f   :  { %3124 = vmatpush3.bf16.msra.mxu0 %v3684_v40 }
 0x330   :  { %3131 = vmatprep.subr.bf16.mxu0 %v3534_v5 }
 0x331   :  { %v480_v50 = vld [vmem:[#allocation6] sm:$0x3] }
 0x332   :  { %2873 = vmatmul.mubr.msk.f32.vlgmr.msra.gmra.mrb[2].mxu1 %vm167_vm2, %v480_v50 }
 0x333   :  { %3127 = vmatpush3.bf16.msra.mxu1 %v3681_v37  ;;  %2894 = vmatprep.mubr.msk.f32.mxu1 %vm3535_vm1, %v3536_v6 }
 0x334   :  { %3128 = vmatprep.subr.bf16.mxu1 %v3534_v5 }
 0x337   :  { %3130 = vmatpush3.bf16.msra.mxu1 %v3688_v41 }
 0x338   :  { %3137 = vmatprep.subr.bf16.mxu1 %v3534_v5 }
 0x3fd   :  { %v425_v52 = vpop.f32.mrb[2].mxu0 }
 0x3fe   :  { %v426_v53 = vadd.f32 %v425_v52, %v353_v47  ;;  %v2863_v54 = vpop.f32.mrb[3].mxu0 }
 0x400   :  { %v435_v55 = vadd.f32 %v3721_v51, %v426_v53 }
 0x402   :  { %3260 = vtanh.f32 %v435_v55  ;;  %v2671_v0 = vmul.f32 -1.442695, %v435_v55 }
 0x405   :  { %v550_v57 = vpop.f32.mrb[2].mxu1 }
 0x406   :  { %v554_v58 = vadd.f32 %v550_v57, %v479_v56  ;;  %v2874_v59 = vpop.f32.mrb[3].mxu1 }
 0x408   :  { %3262 = vtanh.f32 %v554_v58  ;;  %v2673_v1 = vmul.f32 -1.442695, %v554_v58 }
 0x409   :  { %3264 = vpow2.f32 %v2671_v0 }
 0x40a   :  { %3266 = vpow2.f32 %v2673_v1 }
 0x40c   :  { %v3261_v60 = vpop.eup %3260 }
 0x40d   :  { %451 = vrot.lane.b32.xlu0 %v3261_v60, %s3537_s2 }
 0x411   :  { %446 = vrot.lane.b32.xlu0 %v437_v61, %s3528_s11 }
 0x412   :  { %v3263_v62 = vpop.eup %3262 }
 0x413   :  { %569 = vrot.lane.b32.xlu1 %v3263_v62, %s3537_s2  ;;  %v3265_v2 = vpop.eup %3264 }
 0x414   :  { %v441_v3 = vadd.f32 1.0, %v3265_v2  ;;  %v3267_v4 = vpop.eup %3266 }
 0x415   :  { %564 = vrot.lane.b32.xlu0 %v555_v63, %s3528_s11  ;;  %v559_v7 = vadd.f32 1.0, %v3267_v4 }
 0x416   :  { %3268 = vrcp.f32 %v441_v3 }
 0x417   :  { %3270 = vrcp.f32 %v559_v7 }
 0x420   :  { %v3269_v8 = vpop.eup %3268 }
 0x421   :  { %v3271_v13 = vpop.eup %3270 }
 0x47f   :  { %v452_v9 = vpop.permute.xlu0 %451 }
 0x480   :  { %v454_v11 = vmul.f32 %v3269_v8, %v452_v9 }
 0x482   :  { %456 = vrot.lane.b32.xlu1 %v454_v11, %s3528_s11 }
 0x483   :  { %v447_v16 = vpop.permute.xlu0 %446 }
 0x484   :  { %v449_v17 = vmul.f32 %v3269_v8, %v447_v16 }
 0x485   :  { %v570_v14 = vpop.permute.xlu1 %569 }
 0x486   :  { %v572_v15 = vmul.f32 %v3271_v13, %v570_v14 }
 0x487   :  { %v565_v20 = vpop.permute.xlu0 %564 }
 0x488   :  { %574 = vrot.lane.b32.xlu1 %v572_v15, %s3528_s11  ;;  %v567_v21 = vmul.f32 %v3271_v13, %v565_v20 }
 0x4f4   :  { %v457_v18 = vpop.permute.xlu1 %456 }
 0x4f5   :  { %v459_v19 = vadd.f32 %v457_v18, %v449_v17 }
 0x4f7   :  { %3272 = vtanh.f32 %v459_v19 }
 0x4fa   :  { %v575_v22 = vpop.permute.xlu1 %574 }
 0x4fb   :  { %v577_v23 = vadd.f32 %v575_v22, %v567_v21 }
 0x4fd   :  { %3274 = vtanh.f32 %v577_v23 }
 0x501   :  { %v3273_v24 = vpop.eup %3272 }
 0x502   :  { %462 = vrot.lane.b32.xlu0 %v3273_v24, %s3537_s2 }
 0x507   :  { %v3275_v25 = vpop.eup %3274 }
 0x508   :  { %580 = vrot.lane.b32.xlu1 %v3275_v25, %s3537_s2 }
 0x574   :  { %v463_v26 = vpop.permute.xlu0 %462 }
 0x575   :  { %v465_v27 = vmul.f32 %v3269_v8, %v463_v26 }
 0x577   :  { %467 = vrot.lane.b32.xlu0 %v465_v27, %s3528_s11 }
 0x57a   :  { %v581_v28 = vpop.permute.xlu1 %580 }
 0x57b   :  { %v583_v29 = vmul.f32 %v3271_v13, %v581_v28  ;;  %472 = vrot.lane.b32.xlu0 %v459_v19, %s3538_s5 }
 0x57d   :  { %585 = vrot.lane.b32.xlu1 %v583_v29, %s3528_s11 }
 0x581   :  { %590 = vrot.lane.b32.xlu1 %v577_v23, %s3538_s5 }
 0x5e9   :  { %v468_v30 = vpop.permute.xlu0 %467 }
 0x5ea   :  { %470 = vst.msk [vmem:[#allocation6 + $0x2] sm:$0x3] %vm135_vm0, %v468_v30  ;;  %477 = vst.msk [vmem:[#allocation14 + $0xe] sm:$0x3] %vm135_vm0, %v468_v30 }
 0x5ed   :  { %v473_v31 = vpop.permute.xlu0 %472 }
 0x5ee   :  { %475 = vst.msk [vmem:[#allocation7 + $0x2] sm:$0x3] %vm135_vm0, %v473_v31 }
 0x5ef   :  { %v586_v32 = vpop.permute.xlu1 %585 }
 0x5f0   :  { %588 = vst.msk [vmem:[#allocation6] sm:$0x3] %vm135_vm0, %v586_v32  ;;  %2895 = vmatmul.mubr.msk.f32.vlgmr.msra.gmra.mrb[4].mxu1 %vm167_vm2, %v586_v32 }
 0x5f1   :  { %v594_v34 = vld [vmem:[#allocation6 + $0x2] sm:$0x3]  ;;  %3139 = vmatpush3.bf16.msra.mxu1 %v3679_v33  ;;  %2916 = vmatprep.mubr.msk.f32.mxu1 %vm3535_vm1, %v3536_v6 }
 0x5f2   :  { %2884 = vmatmul.mubr.msk.f32.vlgmr.msra.gmra.mrb[4].mxu0 %vm167_vm2, %v594_v34  ;;  %3140 = vmatprep.subr.bf16.mxu1 %v3534_v5  ;;  %v1087_v34 = vld [vmem:[#allocation9 + $0x6] sm:$0x3] }
 0x5f3   :  { %3133 = vmatpush3.bf16.msra.mxu0 %v3665_v10  ;;  %v591_v35 = vpop.permute.xlu1 %590  ;;  %2905 = vmatprep.mubr.msk.f32.mxu0 %vm3535_vm1, %v3536_v6 }
 0x5f4   :  { %593 = vst.msk [vmem:[#allocation7] sm:$0x3] %vm135_vm0, %v591_v35  ;;  %3134 = vmatprep.subr.bf16.mxu0 %v3534_v5 }
 0x5f5   :  { %3142 = vmatpush3.bf16.msra.mxu1 %v3684_v40  ;;  %v741_v52 = vld [vmem:[#allocation7 + $0x2] sm:$0x3] }
 0x5f6   :  { %3149 = vmatprep.subr.bf16.mxu1 %v3534_v5 }
 0x5f7   :  { %3136 = vmatpush3.bf16.msra.mxu0 %v3668_v12  ;;  %v784_v36 = vld [vmem:[#allocation6] sm:$0x3] }
 0x5f8   :  { %3143 = vmatprep.subr.bf16.mxu0 %v3534_v5 }
 0x5fa   :  { %2906 = vmatmul.mubr.msk.f32.vlgmr.msra.gmra.mrb[6].mxu0 %vm167_vm2, %v784_v36 }
 0x5fb   :  { %3145 = vmatpush3.bf16.msra.mxu0 %v3681_v37  ;;  %2927 = vmatprep.mubr.msk.f32.mxu0 %vm3535_vm1, %v3536_v6  ;;  %v859_v54 = vld [vmem:[#allocation7] sm:$0x3] }
 0x5fc   :  { %3146 = vmatprep.subr.bf16.mxu0 %v3534_v5 }
 0x5ff   :  { %3148 = vmatpush3.bf16.msra.mxu0 %v3688_v41 }
 0x600   :  { %3155 = vmatprep.subr.bf16.mxu0 %v3534_v5 }
 0x6c3   :  { %v736_v38 = vpop.f32.mrb[4].mxu1 }
 0x6c4   :  { %v2896_v39 = vpop.f32.mrb[5].mxu1 }
 0x6c5   :  { %v664_v42 = vpop.f32.mrb[4].mxu0 }
 0x6c6   :  { %v737_v43 = vadd.f32 %v736_v38, %v664_v42  ;;  %v2885_v44 = vpop.f32.mrb[5].mxu0 }
 0x6c8   :  { %v740_v45 = vadd.f32 %v3721_v51, %v737_v43 }
 0x6ca   :  { %3276 = vtanh.f32 %v740_v45  ;;  %v2676_v55 = vmul.f32 -1.442695, %v740_v45 }
 0x6cd   :  { %v854_v47 = vpop.f32.mrb[6].mxu0 }
 0x6ce   :  { %v858_v48 = vadd.f32 %v854_v47, %v783_v46  ;;  %v2907_v49 = vpop.f32.mrb[7].mxu0 }
 0x6d0   :  { %3278 = vtanh.f32 %v858_v48  ;;  %v2678_v56 = vmul.f32 -1.442695, %v858_v48 }
 0x6d1   :  { %3280 = vpow2.f32 %v2676_v55 }
 0x6d2   :  { %3282 = vpow2.f32 %v2678_v56 }
 0x6d4   :  { %v3277_v50 = vpop.eup %3276 }
 0x6d5   :  { %755 = vrot.lane.b32.xlu0 %v3277_v50, %s3537_s2 }
 0x6d9   :  { %750 = vrot.lane.b32.xlu0 %v741_v52, %s3528_s11 }
 0x6da   :  { %v3279_v53 = vpop.eup %3278 }
 0x6db   :  { %873 = vrot.lane.b32.xlu1 %v3279_v53, %s3537_s2  ;;  %v3281_v57 = vpop.eup %3280 }
 0x6dc   :  { %v745_v58 = vadd.f32 1.0, %v3281_v57  ;;  %v3283_v59 = vpop.eup %3282 }
 0x6dd   :  { %868 = vrot.lane.b32.xlu0 %v859_v54, %s3528_s11  ;;  %v863_v60 = vadd.f32 1.0, %v3283_v59 }
 0x6de   :  { %3284 = vrcp.f32 %v745_v58 }
 0x6df   :  { %3286 = vrcp.f32 %v863_v60 }
 0x6e8   :  { %v3285_v61 = vpop.eup %3284 }
 0x6e9   :  { %v3287_v0 = vpop.eup %3286 }
 0x747   :  { %v756_v62 = vpop.permute.xlu0 %755 }
 0x748   :  { %v758_v63 = vmul.f32 %v3285_v61, %v756_v62 }
 0x74a   :  { %760 = vrot.lane.b32.xlu1 %v758_v63, %s3528_s11 }
 0x74b   :  { %v751_v3 = vpop.permute.xlu0 %750 }
 0x74c   :  { %v753_v4 = vmul.f32 %v3285_v61, %v751_v3 }
 0x74d   :  { %v874_v1 = vpop.permute.xlu1 %873 }
 0x74e   :  { %v876_v2 = vmul.f32 %v3287_v0, %v874_v1 }
 0x74f   :  { %v869_v9 = vpop.permute.xlu0 %868 }
 0x750   :  { %878 = vrot.lane.b32.xlu1 %v876_v2, %s3528_s11  ;;  %v871_v11 = vmul.f32 %v3287_v0, %v869_v9 }
 0x7bc   :  { %v761_v7 = vpop.permute.xlu1 %760 }
 0x7bd   :  { %v763_v8 = vadd.f32 %v761_v7, %v753_v4 }
 0x7bf   :  { %3288 = vtanh.f32 %v763_v8 }
 0x7c2   :  { %v879_v13 = vpop.permute.xlu1 %878 }
 0x7c3   :  { %v881_v14 = vadd.f32 %v879_v13, %v871_v11 }
 0x7c5   :  { %3290 = vtanh.f32 %v881_v14 }
 0x7c9   :  { %v3289_v15 = vpop.eup %3288 }
 0x7ca   :  { %766 = vrot.lane.b32.xlu0 %v3289_v15, %s3537_s2 }
 0x7cf   :  { %v3291_v16 = vpop.eup %3290 }
 0x7d0   :  { %884 = vrot.lane.b32.xlu1 %v3291_v16, %s3537_s2 }
 0x83c   :  { %v767_v17 = vpop.permute.xlu0 %766 }
 0x83d   :  { %v769_v18 = vmul.f32 %v3285_v61, %v767_v17 }
 0x83f   :  { %771 = vrot.lane.b32.xlu0 %v769_v18, %s3528_s11 }
 0x842   :  { %v885_v19 = vpop.permute.xlu1 %884 }
 0x843   :  { %v887_v20 = vmul.f32 %v3287_v0, %v885_v19  ;;  %776 = vrot.lane.b32.xlu0 %v763_v8, %s3538_s5 }
 0x845   :  { %889 = vrot.lane.b32.xlu1 %v887_v20, %s3528_s11 }
 0x849   :  { %894 = vrot.lane.b32.xlu1 %v881_v14, %s3538_s5 }
 0x8b1   :  { %v772_v21 = vpop.permute.xlu0 %771 }
 0x8b2   :  { %774 = vst.msk [vmem:[#allocation6 + $0x2] sm:$0x3] %vm135_vm0, %v772_v21  ;;  %781 = vst.msk [vmem:[#allocation14 + $0xc] sm:$0x3] %vm135_vm0, %v772_v21 }
 0x8b5   :  { %v777_v22 = vpop.permute.xlu0 %776 }
 0x8b6   :  { %779 = vst.msk [vmem:[#allocation7 + $0x2] sm:$0x3] %vm135_vm0, %v777_v22 }
 0x8b7   :  { %v890_v23 = vpop.permute.xlu1 %889 }
 0x8b8   :  { %892 = vst.msk [vmem:[#allocation6] sm:$0x3] %vm135_vm0, %v890_v23  ;;  %2928 = vmatmul.mubr.msk.f32.vlgmr.msra.gmra.mrb[8].mxu0 %vm167_vm2, %v890_v23 }
 0x8b9   :  { %v898_v24 = vld [vmem:[#allocation6 + $0x2] sm:$0x3]  ;;  %3157 = vmatpush3.bf16.msra.mxu0 %v3679_v33  ;;  %2949 = vmatprep.mubr.msk.f32.mxu0 %vm3535_vm1, %v3536_v6 }
 0x8ba   :  { %2917 = vmatmul.mubr.msk.f32.vlgmr.msra.gmra.mrb[6].mxu1 %vm167_vm2, %v898_v24  ;;  %3158 = vmatprep.subr.bf16.mxu0 %v3534_v5  ;;  %v1391_v24 = vld [vmem:[#allocation9 + $0x8] sm:$0x3] }
 0x8bb   :  { %3151 = vmatpush3.bf16.msra.mxu1 %v3665_v10  ;;  %v895_v25 = vpop.permute.xlu1 %894  ;;  %2938 = vmatprep.mubr.msk.f32.mxu1 %vm3535_vm1, %v3536_v6 }
 0x8bc   :  { %897 = vst.msk [vmem:[#allocation7] sm:$0x3] %vm135_vm0, %v895_v25  ;;  %3152 = vmatprep.subr.bf16.mxu1 %v3534_v5 }
 0x8bd   :  { %3160 = vmatpush3.bf16.msra.mxu0 %v3684_v40  ;;  %v1045_v42 = vld [vmem:[#allocation7 + $0x2] sm:$0x3] }
 0x8be   :  { %3167 = vmatprep.subr.bf16.mxu0 %v3534_v5 }
 0x8bf   :  { %3154 = vmatpush3.bf16.msra.mxu1 %v3668_v12  ;;  %v1088_v26 = vld [vmem:[#allocation6] sm:$0x3] }
 0x8c0   :  { %3161 = vmatprep.subr.bf16.mxu1 %v3534_v5 }
 0x8c2   :  { %2939 = vmatmul.mubr.msk.f32.vlgmr.msra.gmra.mrb[8].mxu1 %vm167_vm2, %v1088_v26 }
 0x8c3   :  { %3163 = vmatpush3.bf16.msra.mxu1 %v3681_v37  ;;  %2960 = vmatprep.mubr.msk.f32.mxu1 %vm3535_vm1, %v3536_v6  ;;  %v1163_v44 = vld [vmem:[#allocation7] sm:$0x3] }
 0x8c4   :  { %3164 = vmatprep.subr.bf16.mxu1 %v3534_v5 }
 0x8c7   :  { %3166 = vmatpush3.bf16.msra.mxu1 %v3688_v41 }
 0x8c8   :  { %3173 = vmatprep.subr.bf16.mxu1 %v3534_v5 }
 0x98b   :  { %v1040_v27 = vpop.f32.mrb[8].mxu0 }
 0x98c   :  { %v2929_v28 = vpop.f32.mrb[9].mxu0 }
 0x98d   :  { %v968_v29 = vpop.f32.mrb[6].mxu1 }
 0x98e   :  { %v1041_v30 = vadd.f32 %v1040_v27, %v968_v29  ;;  %v2918_v31 = vpop.f32.mrb[7].mxu1 }
 0x990   :  { %v1044_v32 = vadd.f32 %v3721_v51, %v1041_v30 }
 0x992   :  { %3292 = vtanh.f32 %v1044_v32  ;;  %v2681_v45 = vmul.f32 -1.442695, %v1044_v32 }
 0x995   :  { %v1158_v35 = vpop.f32.mrb[8].mxu1 }
 0x996   :  { %v1162_v36 = vadd.f32 %v1158_v35, %v1087_v34  ;;  %v2940_v38 = vpop.f32.mrb[9].mxu1 }
 0x998   :  { %3294 = vtanh.f32 %v1162_v36  ;;  %v2683_v46 = vmul.f32 -1.442695, %v1162_v36 }
 0x999   :  { %3296 = vpow2.f32 %v2681_v45 }
 0x99a   :  { %3298 = vpow2.f32 %v2683_v46 }
 0x99c   :  { %v3293_v39 = vpop.eup %3292 }
 0x99d   :  { %1059 = vrot.lane.b32.xlu0 %v3293_v39, %s3537_s2 }
 0x9a1   :  { %1054 = vrot.lane.b32.xlu0 %v1045_v42, %s3528_s11 }
 0x9a2   :  { %v3295_v43 = vpop.eup %3294 }
 0x9a3   :  { %1177 = vrot.lane.b32.xlu1 %v3295_v43, %s3537_s2  ;;  %v3297_v47 = vpop.eup %3296 }
 0x9a4   :  { %v1049_v48 = vadd.f32 1.0, %v3297_v47  ;;  %v3299_v49 = vpop.eup %3298 }
 0x9a5   :  { %1172 = vrot.lane.b32.xlu0 %v1163_v44, %s3528_s11  ;;  %v1167_v50 = vadd.f32 1.0, %v3299_v49 }
 0x9a6   :  { %3300 = vrcp.f32 %v1049_v48 }
 0x9a7   :  { %3302 = vrcp.f32 %v1167_v50 }
 0x9b0   :  { %v3301_v52 = vpop.eup %3300 }
 0x9b1   :  { %v3303_v55 = vpop.eup %3302 }
 0xa0f   :  { %v1060_v53 = vpop.permute.xlu0 %1059 }
 0xa10   :  { %v1062_v54 = vmul.f32 %v3301_v52, %v1060_v53 }
 0xa12   :  { %1064 = vrot.lane.b32.xlu1 %v1062_v54, %s3528_s11 }
 0xa13   :  { %v1055_v58 = vpop.permute.xlu0 %1054 }
 0xa14   :  { %v1057_v59 = vmul.f32 %v3301_v52, %v1055_v58 }
 0xa15   :  { %v1178_v56 = vpop.permute.xlu1 %1177 }
 0xa16   :  { %v1180_v57 = vmul.f32 %v3303_v55, %v1178_v56 }
 0xa17   :  { %v1173_v62 = vpop.permute.xlu0 %1172 }
 0xa18   :  { %1182 = vrot.lane.b32.xlu1 %v1180_v57, %s3528_s11  ;;  %v1175_v63 = vmul.f32 %v3303_v55, %v1173_v62 }
 0xa84   :  { %v1065_v60 = vpop.permute.xlu1 %1064 }
 0xa85   :  { %v1067_v61 = vadd.f32 %v1065_v60, %v1057_v59 }
 0xa87   :  { %3304 = vtanh.f32 %v1067_v61 }
 0xa8a   :  { %v1183_v0 = vpop.permute.xlu1 %1182 }
 0xa8b   :  { %v1185_v1 = vadd.f32 %v1183_v0, %v1175_v63 }
 0xa8d   :  { %3306 = vtanh.f32 %v1185_v1 }
 0xa91   :  { %v3305_v2 = vpop.eup %3304 }
 0xa92   :  { %1070 = vrot.lane.b32.xlu0 %v3305_v2, %s3537_s2 }
 0xa97   :  { %v3307_v3 = vpop.eup %3306 }
 0xa98   :  { %1188 = vrot.lane.b32.xlu1 %v3307_v3, %s3537_s2 }
 0xb04   :  { %v1071_v4 = vpop.permute.xlu0 %1070 }
 0xb05   :  { %v1073_v7 = vmul.f32 %v3301_v52, %v1071_v4 }
 0xb07   :  { %1075 = vrot.lane.b32.xlu0 %v1073_v7, %s3528_s11 }
 0xb0a   :  { %v1189_v8 = vpop.permute.xlu1 %1188 }
 0xb0b   :  { %v1191_v9 = vmul.f32 %v3303_v55, %v1189_v8  ;;  %1080 = vrot.lane.b32.xlu0 %v1067_v61, %s3538_s5 }
 0xb0d   :  { %1193 = vrot.lane.b32.xlu1 %v1191_v9, %s3528_s11 }
 0xb11   :  { %1198 = vrot.lane.b32.xlu1 %v1185_v1, %s3538_s5 }
 0xb79   :  { %v1076_v11 = vpop.permute.xlu0 %1075 }
 0xb7a   :  { %1078 = vst.msk [vmem:[#allocation6 + $0x2] sm:$0x3] %vm135_vm0, %v1076_v11  ;;  %1085 = vst.msk [vmem:[#allocation14 + $0xa] sm:$0x3] %vm135_vm0, %v1076_v11 }
 0xb7d   :  { %v1081_v13 = vpop.permute.xlu0 %1080 }
 0xb7e   :  { %1083 = vst.msk [vmem:[#allocation7 + $0x2] sm:$0x3] %vm135_vm0, %v1081_v13 }
 0xb7f   :  { %v1194_v14 = vpop.permute.xlu1 %1193 }
 0xb80   :  { %1196 = vst.msk [vmem:[#allocation6] sm:$0x3] %vm135_vm0, %v1194_v14  ;;  %2961 = vmatmul.mubr.msk.f32.vlgmr.msra.gmra.mrb[10].mxu1 %vm167_vm2, %v1194_v14 }
 0xb81   :  { %v1202_v15 = vld [vmem:[#allocation6 + $0x2] sm:$0x3]  ;;  %3175 = vmatpush3.bf16.msra.mxu1 %v3679_v33  ;;  %2982 = vmatprep.mubr.msk.f32.mxu1 %vm3535_vm1, %v3536_v6 }
 0xb82   :  { %2950 = vmatmul.mubr.msk.f32.vlgmr.msra.gmra.mrb[10].mxu0 %vm167_vm2, %v1202_v15  ;;  %3176 = vmatprep.subr.bf16.mxu1 %v3534_v5  ;;  %v1695_v15 = vld [vmem:[#allocation9 + $0xa] sm:$0x3] }
 0xb83   :  { %v1199_v16 = vpop.permute.xlu1 %1198  ;;  %3169 = vmatpush3.bf16.msra.mxu0 %v3665_v10  ;;  %2971 = vmatprep.mubr.msk.f32.mxu0 %vm3535_vm1, %v3536_v6 }
 0xb84   :  { %1201 = vst.msk [vmem:[#allocation7] sm:$0x3] %vm135_vm0, %v1199_v16  ;;  %3170 = vmatprep.subr.bf16.mxu0 %v3534_v5 }
 0xb85   :  { %3178 = vmatpush3.bf16.msra.mxu1 %v3684_v40  ;;  %v1349_v29 = vld [vmem:[#allocation7 + $0x2] sm:$0x3] }
 0xb86   :  { %3185 = vmatprep.subr.bf16.mxu1 %v3534_v5 }
 0xb87   :  { %3172 = vmatpush3.bf16.msra.mxu0 %v3668_v12  ;;  %v1392_v17 = vld [vmem:[#allocation6] sm:$0x3] }
 0xb88   :  { %3179 = vmatprep.subr.bf16.mxu0 %v3534_v5 }
 0xb8a   :  { %2972 = vmatmul.mubr.msk.f32.vlgmr.msra.gmra.mrb[12].mxu0 %vm167_vm2, %v1392_v17 }
 0xb8b   :  { %3181 = vmatpush3.bf16.msra.mxu0 %v3681_v37  ;;  %2993 = vmatprep.mubr.msk.f32.mxu0 %vm3535_vm1, %v3536_v6  ;;  %v1467_v31 = vld [vmem:[#allocation7] sm:$0x3] }
 0xb8c   :  { %3182 = vmatprep.subr.bf16.mxu0 %v3534_v5 }
 0xb8f   :  { %3184 = vmatpush3.bf16.msra.mxu0 %v3688_v41 }
 0xb90   :  { %3191 = vmatprep.subr.bf16.mxu0 %v3534_v5 }
 0xc53   :  { %v1344_v18 = vpop.f32.mrb[10].mxu1 }
 0xc54   :  { %v2962_v19 = vpop.f32.mrb[11].mxu1 }
 0xc55   :  { %v1272_v20 = vpop.f32.mrb[10].mxu0 }
 0xc56   :  { %v1345_v21 = vadd.f32 %v1344_v18, %v1272_v20  ;;  %v2951_v22 = vpop.f32.mrb[11].mxu0 }
 0xc58   :  { %v1348_v23 = vadd.f32 %v3721_v51, %v1345_v21 }
 0xc5a   :  { %3308 = vtanh.f32 %v1348_v23  ;;  %v2686_v32 = vmul.f32 -1.442695, %v1348_v23 }
 0xc5d   :  { %v1462_v25 = vpop.f32.mrb[12].mxu0 }
 0xc5e   :  { %v1466_v26 = vadd.f32 %v1462_v25, %v1391_v24  ;;  %v2973_v27 = vpop.f32.mrb[13].mxu0 }
 0xc60   :  { %3310 = vtanh.f32 %v1466_v26  ;;  %v2688_v34 = vmul.f32 -1.442695, %v1466_v26 }
 0xc61   :  { %3312 = vpow2.f32 %v2686_v32 }
 0xc62   :  { %3314 = vpow2.f32 %v2688_v34 }
 0xc64   :  { %v3309_v28 = vpop.eup %3308 }
 0xc65   :  { %1363 = vrot.lane.b32.xlu0 %v3309_v28, %s3537_s2 }
 0xc69   :  { %1358 = vrot.lane.b32.xlu0 %v1349_v29, %s3528_s11 }
 0xc6a   :  { %v3311_v30 = vpop.eup %3310 }
 0xc6b   :  { %1481 = vrot.lane.b32.xlu1 %v3311_v30, %s3537_s2  ;;  %v3313_v35 = vpop.eup %3312 }
 0xc6c   :  { %v1353_v36 = vadd.f32 1.0, %v3313_v35  ;;  %v3315_v38 = vpop.eup %3314 }
 0xc6d   :  { %1476 = vrot.lane.b32.xlu0 %v1467_v31, %s3528_s11  ;;  %v1471_v39 = vadd.f32 1.0, %v3315_v38 }
 0xc6e   :  { %3316 = vrcp.f32 %v1353_v36 }
 0xc6f   :  { %3318 = vrcp.f32 %v1471_v39 }
 0xc78   :  { %v3317_v42 = vpop.eup %3316 }
 0xc79   :  { %v3319_v45 = vpop.eup %3318 }
 0xcd7   :  { %v1364_v43 = vpop.permute.xlu0 %1363 }
 0xcd8   :  { %v1366_v44 = vmul.f32 %v3317_v42, %v1364_v43 }
 0xcda   :  { %1368 = vrot.lane.b32.xlu1 %v1366_v44, %s3528_s11 }
 0xcdb   :  { %v1359_v48 = vpop.permute.xlu0 %1358 }
 0xcdc   :  { %v1361_v49 = vmul.f32 %v3317_v42, %v1359_v48 }
 0xcdd   :  { %v1482_v46 = vpop.permute.xlu1 %1481 }
 0xcde   :  { %v1484_v47 = vmul.f32 %v3319_v45, %v1482_v46 }
 0xcdf   :  { %v1477_v53 = vpop.permute.xlu0 %1476 }
 0xce0   :  { %1486 = vrot.lane.b32.xlu1 %v1484_v47, %s3528_s11  ;;  %v1479_v54 = vmul.f32 %v3319_v45, %v1477_v53 }
 0xd4c   :  { %v1369_v50 = vpop.permute.xlu1 %1368 }
 0xd4d   :  { %v1371_v52 = vadd.f32 %v1369_v50, %v1361_v49 }
 0xd4f   :  { %3320 = vtanh.f32 %v1371_v52 }
 0xd52   :  { %v1487_v55 = vpop.permute.xlu1 %1486 }
 0xd53   :  { %v1489_v56 = vadd.f32 %v1487_v55, %v1479_v54 }
 0xd55   :  { %3322 = vtanh.f32 %v1489_v56 }
 0xd59   :  { %v3321_v57 = vpop.eup %3320 }
 0xd5a   :  { %1374 = vrot.lane.b32.xlu0 %v3321_v57, %s3537_s2 }
 0xd5f   :  { %v3323_v58 = vpop.eup %3322 }
 0xd60   :  { %1492 = vrot.lane.b32.xlu1 %v3323_v58, %s3537_s2 }
 0xdcc   :  { %v1375_v59 = vpop.permute.xlu0 %1374 }
 0xdcd   :  { %v1377_v60 = vmul.f32 %v3317_v42, %v1375_v59 }
 0xdcf   :  { %1379 = vrot.lane.b32.xlu0 %v1377_v60, %s3528_s11 }
 0xdd2   :  { %v1493_v61 = vpop.permute.xlu1 %1492 }
 0xdd3   :  { %v1495_v62 = vmul.f32 %v3319_v45, %v1493_v61  ;;  %1384 = vrot.lane.b32.xlu0 %v1371_v52, %s3538_s5 }
 0xdd5   :  { %1497 = vrot.lane.b32.xlu1 %v1495_v62, %s3528_s11 }
 0xdd9   :  { %1502 = vrot.lane.b32.xlu1 %v1489_v56, %s3538_s5 }
 0xe41   :  { %v1380_v63 = vpop.permute.xlu0 %1379 }
 0xe42   :  { %1382 = vst.msk [vmem:[#allocation6 + $0x2] sm:$0x3] %vm135_vm0, %v1380_v63  ;;  %1389 = vst.msk [vmem:[#allocation14 + $0x8] sm:$0x3] %vm135_vm0, %v1380_v63 }
 0xe45   :  { %v1385_v0 = vpop.permute.xlu0 %1384 }
 0xe46   :  { %1387 = vst.msk [vmem:[#allocation7 + $0x2] sm:$0x3] %vm135_vm0, %v1385_v0 }
 0xe47   :  { %v1498_v1 = vpop.permute.xlu1 %1497 }
 0xe48   :  { %1500 = vst.msk [vmem:[#allocation6] sm:$0x3] %vm135_vm0, %v1498_v1  ;;  %2994 = vmatmul.mubr.msk.f32.vlgmr.msra.gmra.mrb[14].mxu0 %vm167_vm2, %v1498_v1 }
 0xe49   :  { %v1506_v2 = vld [vmem:[#allocation6 + $0x2] sm:$0x3]  ;;  %3193 = vmatpush3.bf16.msra.mxu0 %v3679_v33  ;;  %3015 = vmatprep.mubr.msk.f32.mxu0 %vm3535_vm1, %v3536_v6 }
 0xe4a   :  { %2983 = vmatmul.mubr.msk.f32.vlgmr.msra.gmra.mrb[12].mxu1 %vm167_vm2, %v1506_v2  ;;  %3194 = vmatprep.subr.bf16.mxu0 %v3534_v5  ;;  %v1999_v2 = vld [vmem:[#allocation9 + $0xc] sm:$0x3] }
 0xe4b   :  { %3187 = vmatpush3.bf16.msra.mxu1 %v3665_v10  ;;  %v1503_v3 = vpop.permute.xlu1 %1502  ;;  %3004 = vmatprep.mubr.msk.f32.mxu1 %vm3535_vm1, %v3536_v6 }
 0xe4c   :  { %1505 = vst.msk [vmem:[#allocation7] sm:$0x3] %vm135_vm0, %v1503_v3  ;;  %3188 = vmatprep.subr.bf16.mxu1 %v3534_v5 }
 0xe4d   :  { %3196 = vmatpush3.bf16.msra.mxu0 %v3684_v40  ;;  %v1653_v20 = vld [vmem:[#allocation7 + $0x2] sm:$0x3] }
 0xe4e   :  { %3203 = vmatprep.subr.bf16.mxu0 %v3534_v5 }
 0xe4f   :  { %3190 = vmatpush3.bf16.msra.mxu1 %v3668_v12  ;;  %v1696_v4 = vld [vmem:[#allocation6] sm:$0x3] }
 0xe50   :  { %3197 = vmatprep.subr.bf16.mxu1 %v3534_v5 }
 0xe52   :  { %3005 = vmatmul.mubr.msk.f32.vlgmr.msra.gmra.mrb[14].mxu1 %vm167_vm2, %v1696_v4 }
 0xe53   :  { %3199 = vmatpush3.bf16.msra.mxu1 %v3681_v37  ;;  %3026 = vmatprep.mubr.msk.f32.mxu1 %vm3535_vm1, %v3536_v6  ;;  %v1771_v22 = vld [vmem:[#allocation7] sm:$0x3] }
 0xe54   :  { %3200 = vmatprep.subr.bf16.mxu1 %v3534_v5 }
 0xe57   :  { %3202 = vmatpush3.bf16.msra.mxu1 %v3688_v41 }
 0xe58   :  { %3209 = vmatprep.subr.bf16.mxu1 %v3534_v5 }
 0xf1b   :  { %v1648_v7 = vpop.f32.mrb[14].mxu0 }
 0xf1c   :  { %v2995_v8 = vpop.f32.mrb[15].mxu0 }
 0xf1d   :  { %v1576_v9 = vpop.f32.mrb[12].mxu1 }
 0xf1e   :  { %v1649_v11 = vadd.f32 %v1648_v7, %v1576_v9  ;;  %v2984_v13 = vpop.f32.mrb[13].mxu1 }
 0xf20   :  { %v1652_v14 = vadd.f32 %v3721_v51, %v1649_v11 }
 0xf22   :  { %3324 = vtanh.f32 %v1652_v14  ;;  %v2691_v23 = vmul.f32 -1.442695, %v1652_v14 }
 0xf25   :  { %v1766_v16 = vpop.f32.mrb[14].mxu1 }
 0xf26   :  { %v1770_v17 = vadd.f32 %v1766_v16, %v1695_v15  ;;  %v3006_v18 = vpop.f32.mrb[15].mxu1 }
 0xf28   :  { %3326 = vtanh.f32 %v1770_v17  ;;  %v2693_v24 = vmul.f32 -1.442695, %v1770_v17 }
 0xf29   :  { %3328 = vpow2.f32 %v2691_v23 }
 0xf2a   :  { %3330 = vpow2.f32 %v2693_v24 }
 0xf2c   :  { %v3325_v19 = vpop.eup %3324 }
 0xf2d   :  { %1667 = vrot.lane.b32.xlu0 %v3325_v19, %s3537_s2 }
 0xf31   :  { %1662 = vrot.lane.b32.xlu0 %v1653_v20, %s3528_s11 }
 0xf32   :  { %v3327_v21 = vpop.eup %3326 }
 0xf33   :  { %1785 = vrot.lane.b32.xlu1 %v3327_v21, %s3537_s2  ;;  %v3329_v25 = vpop.eup %3328 }
 0xf34   :  { %v1657_v26 = vadd.f32 1.0, %v3329_v25  ;;  %v3331_v27 = vpop.eup %3330 }
 0xf35   :  { %1780 = vrot.lane.b32.xlu0 %v1771_v22, %s3528_s11  ;;  %v1775_v28 = vadd.f32 1.0, %v3331_v27 }
 0xf36   :  { %3332 = vrcp.f32 %v1657_v26 }
 0xf37   :  { %3334 = vrcp.f32 %v1775_v28 }
 0xf40   :  { %v3333_v29 = vpop.eup %3332 }
 0xf41   :  { %v3335_v32 = vpop.eup %3334 }
 0xf9f   :  { %v1668_v30 = vpop.permute.xlu0 %1667 }
 0xfa0   :  { %v1670_v31 = vmul.f32 %v3333_v29, %v1668_v30 }
 0xfa2   :  { %1672 = vrot.lane.b32.xlu1 %v1670_v31, %s3528_s11 }
 0xfa3   :  { %v1663_v36 = vpop.permute.xlu0 %1662 }
 0xfa4   :  { %v1665_v38 = vmul.f32 %v3333_v29, %v1663_v36 }
 0xfa5   :  { %v1786_v34 = vpop.permute.xlu1 %1785 }
 0xfa6   :  { %v1788_v35 = vmul.f32 %v3335_v32, %v1786_v34 }
 0xfa7   :  { %v1781_v43 = vpop.permute.xlu0 %1780 }
 0xfa8   :  { %1790 = vrot.lane.b32.xlu1 %v1788_v35, %s3528_s11  ;;  %v1783_v44 = vmul.f32 %v3335_v32, %v1781_v43 }
0x1014   :  { %v1673_v39 = vpop.permute.xlu1 %1672 }
0x1015   :  { %v1675_v42 = vadd.f32 %v1673_v39, %v1665_v38 }
0x1017   :  { %3336 = vtanh.f32 %v1675_v42 }
0x101a   :  { %v1791_v45 = vpop.permute.xlu1 %1790 }
0x101b   :  { %v1793_v46 = vadd.f32 %v1791_v45, %v1783_v44 }
0x101d   :  { %3338 = vtanh.f32 %v1793_v46 }
0x1021   :  { %v3337_v47 = vpop.eup %3336 }
0x1022   :  { %1678 = vrot.lane.b32.xlu0 %v3337_v47, %s3537_s2 }
0x1027   :  { %v3339_v48 = vpop.eup %3338 }
0x1028   :  { %1796 = vrot.lane.b32.xlu1 %v3339_v48, %s3537_s2 }
0x1094   :  { %v1679_v49 = vpop.permute.xlu0 %1678 }
0x1095   :  { %v1681_v50 = vmul.f32 %v3333_v29, %v1679_v49 }
0x1097   :  { %1683 = vrot.lane.b32.xlu0 %v1681_v50, %s3528_s11 }
0x109a   :  { %v1797_v52 = vpop.permute.xlu1 %1796 }
0x109b   :  { %v1799_v53 = vmul.f32 %v3335_v32, %v1797_v52  ;;  %1688 = vrot.lane.b32.xlu0 %v1675_v42, %s3538_s5 }
0x109d   :  { %1801 = vrot.lane.b32.xlu1 %v1799_v53, %s3528_s11  ;;  %v2303_v53 = vld [vmem:[#allocation9 + $0xe] sm:$0x3] }
0x10a1   :  { %1806 = vrot.lane.b32.xlu1 %v1793_v46, %s3538_s5 }
0x1109   :  { %v1684_v54 = vpop.permute.xlu0 %1683 }
0x110a   :  { %1686 = vst.msk [vmem:[#allocation6 + $0x2] sm:$0x3] %vm135_vm0, %v1684_v54  ;;  %1693 = vst.msk [vmem:[#allocation14 + $0x6] sm:$0x3] %vm135_vm0, %v1684_v54 }
0x110d   :  { %v1689_v55 = vpop.permute.xlu0 %1688 }
0x110e   :  { %1691 = vst.msk [vmem:[#allocation7 + $0x2] sm:$0x3] %vm135_vm0, %v1689_v55 }
0x110f   :  { %v1802_v56 = vpop.permute.xlu1 %1801 }
0x1110   :  { %1804 = vst.msk [vmem:[#allocation6] sm:$0x3] %vm135_vm0, %v1802_v56  ;;  %3027 = vmatmul.mubr.msk.f32.vlgmr.msra.gmra.mrb[16].mxu1 %vm167_vm2, %v1802_v56 }
0x1111   :  { %v1810_v57 = vld [vmem:[#allocation6 + $0x2] sm:$0x3]  ;;  %3211 = vmatpush3.bf16.msra.mxu1 %v3679_v33  ;;  %3048 = vmatprep.mubr.msk.f32.mxu1 %vm3535_vm1, %v3536_v6 }
0x1112   :  { %3016 = vmatmul.mubr.msk.f32.vlgmr.msra.gmra.mrb[16].mxu0 %vm167_vm2, %v1810_v57  ;;  %3212 = vmatprep.subr.bf16.mxu1 %v3534_v5 }
0x1113   :  { %v1807_v58 = vpop.permute.xlu1 %1806  ;;  %3205 = vmatpush3.bf16.msra.mxu0 %v3665_v10  ;;  %3037 = vmatprep.mubr.msk.f32.mxu0 %vm3535_vm1, %v3536_v6 }
0x1114   :  { %1809 = vst.msk [vmem:[#allocation7] sm:$0x3] %vm135_vm0, %v1807_v58  ;;  %3206 = vmatprep.subr.bf16.mxu0 %v3534_v5 }
0x1115   :  { %3214 = vmatpush3.bf16.msra.mxu1 %v3684_v40  ;;  %v1957_v9 = vld [vmem:[#allocation7 + $0x2] sm:$0x3] }
0x1116   :  { %3221 = vmatprep.subr.bf16.mxu1 %v3534_v5 }
0x1117   :  { %3208 = vmatpush3.bf16.msra.mxu0 %v3668_v12  ;;  %v2000_v59 = vld [vmem:[#allocation6] sm:$0x3] }
0x1118   :  { %3215 = vmatprep.subr.bf16.mxu0 %v3534_v5 }
0x111a   :  { %3038 = vmatmul.mubr.msk.f32.vlgmr.msra.gmra.mrb[18].mxu0 %vm167_vm2, %v2000_v59 }
0x111b   :  { %3217 = vmatpush3.bf16.msra.mxu0 %v3681_v37  ;;  %3059 = vmatprep.mubr.msk.f32.mxu0 %vm3535_vm1, %v3536_v6  ;;  %v2075_v13 = vld [vmem:[#allocation7] sm:$0x3] }
0x111c   :  { %3218 = vmatprep.subr.bf16.mxu0 %v3534_v5 }
0x111f   :  { %3220 = vmatpush3.bf16.msra.mxu0 %v3688_v41 }
0x1120   :  { %3227 = vmatprep.subr.bf16.mxu0 %v3534_v5 }
0x11e3   :  { %v1952_v60 = vpop.f32.mrb[16].mxu1 }
0x11e4   :  { %v3028_v61 = vpop.f32.mrb[17].mxu1 }
0x11e5   :  { %v1880_v62 = vpop.f32.mrb[16].mxu0 }
0x11e6   :  { %v1953_v63 = vadd.f32 %v1952_v60, %v1880_v62  ;;  %v3017_v0 = vpop.f32.mrb[17].mxu0 }
0x11e8   :  { %v1956_v1 = vadd.f32 %v3721_v51, %v1953_v63 }
0x11ea   :  { %3340 = vtanh.f32 %v1956_v1  ;;  %v2696_v14 = vmul.f32 -1.442695, %v1956_v1 }
0x11ed   :  { %v2070_v3 = vpop.f32.mrb[18].mxu0 }
0x11ee   :  { %v2074_v4 = vadd.f32 %v2070_v3, %v1999_v2  ;;  %v3039_v7 = vpop.f32.mrb[19].mxu0 }
0x11f0   :  { %3342 = vtanh.f32 %v2074_v4  ;;  %v2698_v51 = vmul.f32 -1.442695, %v2074_v4 }
0x11f1   :  { %3344 = vpow2.f32 %v2696_v14 }
0x11f2   :  { %3346 = vpow2.f32 %v2698_v51 }
0x11f4   :  { %v3341_v8 = vpop.eup %3340 }
0x11f5   :  { %1971 = vrot.lane.b32.xlu0 %v3341_v8, %s3537_s2 }
0x11f9   :  { %1966 = vrot.lane.b32.xlu0 %v1957_v9, %s3528_s11 }
0x11fa   :  { %v3343_v11 = vpop.eup %3342 }
0x11fb   :  { %2089 = vrot.lane.b32.xlu1 %v3343_v11, %s3537_s2  ;;  %v3345_v15 = vpop.eup %3344 }
0x11fc   :  { %v1961_v16 = vadd.f32 1.0, %v3345_v15  ;;  %v3347_v17 = vpop.eup %3346 }
0x11fd   :  { %2084 = vrot.lane.b32.xlu0 %v2075_v13, %s3528_s11  ;;  %v2079_v18 = vadd.f32 1.0, %v3347_v17 }
0x11fe   :  { %3348 = vrcp.f32 %v1961_v16 }
0x11ff   :  { %3350 = vrcp.f32 %v2079_v18 }
0x1208   :  { %v3349_v19 = vpop.eup %3348 }
0x1209   :  { %v3351_v22 = vpop.eup %3350 }
0x1267   :  { %v1972_v20 = vpop.permute.xlu0 %1971 }
0x1268   :  { %v1974_v21 = vmul.f32 %v3349_v19, %v1972_v20 }
0x126a   :  { %1976 = vrot.lane.b32.xlu1 %v1974_v21, %s3528_s11 }
0x126b   :  { %v1967_v25 = vpop.permute.xlu0 %1966 }
0x126c   :  { %v1969_v26 = vmul.f32 %v3349_v19, %v1967_v25 }
0x126d   :  { %v2090_v23 = vpop.permute.xlu1 %2089 }
0x126e   :  { %v2092_v24 = vmul.f32 %v3351_v22, %v2090_v23 }
0x126f   :  { %v2085_v29 = vpop.permute.xlu0 %2084 }
0x1270   :  { %2094 = vrot.lane.b32.xlu1 %v2092_v24, %s3528_s11  ;;  %v2087_v30 = vmul.f32 %v3351_v22, %v2085_v29 }
0x12dc   :  { %v1977_v27 = vpop.permute.xlu1 %1976 }
0x12dd   :  { %v1979_v28 = vadd.f32 %v1977_v27, %v1969_v26 }
0x12df   :  { %3352 = vtanh.f32 %v1979_v28 }
0x12e2   :  { %v2095_v31 = vpop.permute.xlu1 %2094 }
0x12e3   :  { %v2097_v32 = vadd.f32 %v2095_v31, %v2087_v30 }
0x12e5   :  { %3354 = vtanh.f32 %v2097_v32 }
0x12e9   :  { %v3353_v34 = vpop.eup %3352 }
0x12ea   :  { %1982 = vrot.lane.b32.xlu0 %v3353_v34, %s3537_s2 }
0x12ef   :  { %v3355_v35 = vpop.eup %3354 }
0x12f0   :  { %2100 = vrot.lane.b32.xlu1 %v3355_v35, %s3537_s2 }
0x135c   :  { %v1983_v36 = vpop.permute.xlu0 %1982 }
0x135d   :  { %v1985_v38 = vmul.f32 %v3349_v19, %v1983_v36 }
0x135f   :  { %1987 = vrot.lane.b32.xlu0 %v1985_v38, %s3528_s11 }
0x1362   :  { %v2101_v39 = vpop.permute.xlu1 %2100 }
0x1363   :  { %v2103_v42 = vmul.f32 %v3351_v22, %v2101_v39  ;;  %1992 = vrot.lane.b32.xlu0 %v1979_v28, %s3538_s5 }
0x1365   :  { %2105 = vrot.lane.b32.xlu1 %v2103_v42, %s3528_s11 }
0x1369   :  { %2110 = vrot.lane.b32.xlu1 %v2097_v32, %s3538_s5 }
0x13d1   :  { %v1988_v43 = vpop.permute.xlu0 %1987 }
0x13d2   :  { %1990 = vst.msk [vmem:[#allocation6 + $0x2] sm:$0x3] %vm135_vm0, %v1988_v43  ;;  %1997 = vst.msk [vmem:[#allocation14 + $0x4] sm:$0x3] %vm135_vm0, %v1988_v43 }
0x13d5   :  { %v1993_v44 = vpop.permute.xlu0 %1992 }
0x13d6   :  { %1995 = vst.msk [vmem:[#allocation7 + $0x2] sm:$0x3] %vm135_vm0, %v1993_v44 }
0x13d7   :  { %v2106_v45 = vpop.permute.xlu1 %2105 }
0x13d8   :  { %2108 = vst.msk [vmem:[#allocation6] sm:$0x3] %vm135_vm0, %v2106_v45  ;;  %3060 = vmatmul.mubr.msk.f32.vlgmr.msra.gmra.mrb[20].mxu0 %vm167_vm2, %v2106_v45 }
0x13d9   :  { %v2114_v46 = vld [vmem:[#allocation6 + $0x2] sm:$0x3]  ;;  %3229 = vmatpush3.bf16.msra.mxu0 %v3679_v33  ;;  %3081 = vmatprep.mubr.msk.f32.mxu0 %vm3535_vm1, %v3536_v6 }
0x13da   :  { %3049 = vmatmul.mubr.msk.f32.vlgmr.msra.gmra.mrb[18].mxu1 %vm167_vm2, %v2114_v46  ;;  %3230 = vmatprep.subr.bf16.mxu0 %v3534_v5 }
0x13db   :  { %3223 = vmatpush3.bf16.msra.mxu1 %v3665_v10  ;;  %v2111_v47 = vpop.permute.xlu1 %2110  ;;  %3070 = vmatprep.mubr.msk.f32.mxu1 %vm3535_vm1, %v3536_v6 }
0x13dc   :  { %2113 = vst.msk [vmem:[#allocation7] sm:$0x3] %vm135_vm0, %v2111_v47  ;;  %3224 = vmatprep.subr.bf16.mxu1 %v3534_v5 }
0x13dd   :  { %3232 = vmatpush3.bf16.msra.mxu0 %v3684_v40 }
0x13df   :  { %3226 = vmatpush3.bf16.msra.mxu1 %v3668_v12  ;;  %v2304_v33 = vld [vmem:[#allocation6] sm:$0x3]  ;;  %v3955_v12 = vld [vmem:[#allocation5] ss:$0 sm:$0xff] }
0x13e0   :  { %3233 = vmatprep.subr.bf16.mxu1 %v3534_v5 }
0x13e2   :  { %3071 = vmatmul.mubr.msk.f32.vlgmr.msra.gmra.mrb[20].mxu1 %vm167_vm2, %v2304_v33 }
0x13e3   :  { %3235 = vmatpush3.bf16.msra.mxu1 %v3681_v37  ;;  %3092 = vmatprep.mubr.msk.f32.mxu1 %vm3535_vm1, %v3536_v6  ;;  %v2379_v56 = vld [vmem:[#allocation7] sm:$0x3] }
0x13e4   :  { %3236 = vmatprep.subr.bf16.mxu1 %v3534_v5  ;;  %v2261_v5 = vld [vmem:[#allocation7 + $0x2] sm:$0x3] }
0x13e7   :  { %3238 = vmatpush3.bf16.msra.mxu1 %v3688_v41 }
0x14ab   :  { %v2256_v10 = vpop.f32.mrb[20].mxu0 }
0x14ac   :  { %v3061_v48 = vpop.f32.mrb[21].mxu0 }
0x14ad   :  { %v2184_v49 = vpop.f32.mrb[18].mxu1 }
0x14ae   :  { %v2257_v40 = vadd.f32 %v2256_v10, %v2184_v49  ;;  %v3050_v50 = vpop.f32.mrb[19].mxu1 }
0x14b0   :  { %v2260_v52 = vadd.f32 %v3955_v12, %v2257_v40 }
0x14b2   :  { %3356 = vtanh.f32 %v2260_v52  ;;  %v2701_v57 = vmul.f32 -1.442695, %v2260_v52 }
0x14b5   :  { %v2374_v54 = vpop.f32.mrb[20].mxu1 }
0x14b6   :  { %v2378_v37 = vadd.f32 %v2374_v54, %v2303_v53  ;;  %v3072_v55 = vpop.f32.mrb[21].mxu1 }
0x14b8   :  { %3358 = vtanh.f32 %v2378_v37  ;;  %v2703_v58 = vmul.f32 -1.442695, %v2378_v37 }
0x14b9   :  { %3360 = vpow2.f32 %v2701_v57 }
0x14ba   :  { %3362 = vpow2.f32 %v2703_v58 }
0x14bc   :  { %v3357_v6 = vpop.eup %3356 }
0x14bd   :  { %2275 = vrot.lane.b32.xlu0 %v3357_v6, %s3537_s2 }
0x14c1   :  { %2270 = vrot.lane.b32.xlu0 %v2261_v5, %s3528_s11 }
0x14c2   :  { %v3359_v41 = vpop.eup %3358 }
0x14c3   :  { %2393 = vrot.lane.b32.xlu1 %v3359_v41, %s3537_s2  ;;  %v3361_v59 = vpop.eup %3360 }
0x14c4   :  { %v2265_v60 = vadd.f32 1.0, %v3361_v59  ;;  %v3363_v61 = vpop.eup %3362 }
0x14c5   :  { %2388 = vrot.lane.b32.xlu0 %v2379_v56, %s3528_s11  ;;  %v2383_v62 = vadd.f32 1.0, %v3363_v61 }
0x14c6   :  { %3364 = vrcp.f32 %v2265_v60 }
0x14c7   :  { %3366 = vrcp.f32 %v2383_v62 }
0x14d0   :  { %v3365_v63 = vpop.eup %3364 }
0x14d1   :  { %v3367_v2 = vpop.eup %3366 }
0x152f   :  { %v2276_v0 = vpop.permute.xlu0 %2275 }
0x1530   :  { %v2278_v1 = vmul.f32 %v3365_v63, %v2276_v0 }
0x1532   :  { %2280 = vrot.lane.b32.xlu1 %v2278_v1, %s3528_s11 }
0x1533   :  { %v2271_v7 = vpop.permute.xlu0 %2270 }
0x1534   :  { %v2273_v8 = vmul.f32 %v3365_v63, %v2271_v7 }
0x1535   :  { %v2394_v3 = vpop.permute.xlu1 %2393 }
0x1536   :  { %v2396_v4 = vmul.f32 %v3367_v2, %v2394_v3 }
0x1537   :  { %v2389_v13 = vpop.permute.xlu0 %2388 }
0x1538   :  { %2398 = vrot.lane.b32.xlu1 %v2396_v4, %s3528_s11  ;;  %v2391_v14 = vmul.f32 %v3367_v2, %v2389_v13 }
0x15a4   :  { %v2281_v9 = vpop.permute.xlu1 %2280 }
0x15a5   :  { %v2283_v11 = vadd.f32 %v2281_v9, %v2273_v8 }
0x15a7   :  { %3368 = vtanh.f32 %v2283_v11 }
0x15aa   :  { %v2399_v51 = vpop.permute.xlu1 %2398 }
0x15ab   :  { %v2401_v15 = vadd.f32 %v2399_v51, %v2391_v14 }
0x15ad   :  { %3370 = vtanh.f32 %v2401_v15 }
0x15b1   :  { %v3369_v16 = vpop.eup %3368 }
0x15b2   :  { %2286 = vrot.lane.b32.xlu0 %v3369_v16, %s3537_s2 }
0x15b7   :  { %v3371_v17 = vpop.eup %3370 }
0x15b8   :  { %2404 = vrot.lane.b32.xlu1 %v3371_v17, %s3537_s2 }
0x1624   :  { %v2287_v18 = vpop.permute.xlu0 %2286 }
0x1625   :  { %v2289_v19 = vmul.f32 %v3365_v63, %v2287_v18 }
0x1627   :  { %2291 = vrot.lane.b32.xlu0 %v2289_v19, %s3528_s11 }
0x162a   :  { %v2405_v20 = vpop.permute.xlu1 %2404 }
0x162b   :  { %v2407_v21 = vmul.f32 %v3367_v2, %v2405_v20  ;;  %2296 = vrot.lane.b32.xlu0 %v2283_v11, %s3538_s5 }
0x162d   :  { %2409 = vrot.lane.b32.xlu1 %v2407_v21, %s3528_s11 }
0x1699   :  { %v2292_v22 = vpop.permute.xlu0 %2291 }
0x169a   :  { %2294 = vst.msk [vmem:[#allocation6 + $0x2] sm:$0x3] %vm135_vm0, %v2292_v22  ;;  %2301 = vst.msk [vmem:[#allocation14 + $0x2] sm:$0x3] %vm135_vm0, %v2292_v22 }
0x169d   :  { %v2297_v23 = vpop.permute.xlu0 %2296 }
0x169e   :  { %2299 = vst.msk [vmem:[#allocation7 + $0x2] sm:$0x3] %vm135_vm0, %v2297_v23 }
0x169f   :  { %v2410_v24 = vpop.permute.xlu1 %2409 }
0x16a0   :  { %2412 = vst.msk [vmem:[#allocation6] sm:$0x3] %vm135_vm0, %v2410_v24  ;;  %3093 = vmatmul.mubr.msk.f32.vlgmr.msra.gmra.mrb[22].mxu1 %vm167_vm2, %v2410_v24 }
0x16a1   :  { %v2418_v25 = vld [vmem:[#allocation6 + $0x2] sm:$0x3] }
0x16a2   :  { %3082 = vmatmul.mubr.msk.f32.vlgmr.msra.gmra.mrb[22].mxu0 %vm167_vm2, %v2418_v25 }
0x16a5   :  { %v2565_v26 = vld [vmem:[#allocation7 + $0x2] sm:$0x3] }
0x16a6   :  { %2574 = vrot.lane.b32.xlu0 %v2565_v26, %s3528_s11 }
0x1718   :  { %v2575_v44 = vpop.permute.xlu0 %2574 }
0x1773   :  { %v2560_v27 = vpop.f32.mrb[22].mxu1 }
0x1774   :  { %v3094_v28 = vpop.f32.mrb[23].mxu1 }
0x1775   :  { %v2488_v29 = vpop.f32.mrb[22].mxu0 }
0x1776   :  { %v2561_v30 = vadd.f32 %v2560_v27, %v2488_v29  ;;  %v3083_v31 = vpop.f32.mrb[23].mxu0 }
0x1778   :  { %v2564_v32 = vadd.f32 %v3955_v12, %v2561_v30 }
0x177a   :  { %3372 = vtanh.f32 %v2564_v32  ;;  %v2706_v35 = vmul.f32 -1.442695, %v2564_v32 }
0x177c   :  { %3374 = vpow2.f32 %v2706_v35 }
0x1784   :  { %v3373_v34 = vpop.eup %3372 }
0x1785   :  { %2579 = vrot.lane.b32.xlu1 %v3373_v34, %s3537_s2 }
0x1786   :  { %v3375_v36 = vpop.eup %3374 }
0x1787   :  { %v2569_v38 = vadd.f32 1.0, %v3375_v36 }
0x1789   :  { %3376 = vrcp.f32 %v2569_v38 }
0x1793   :  { %v3377_v39 = vpop.eup %3376 }
0x1794   :  { %v2577_v45 = vmul.f32 %v3377_v39, %v2575_v44 }
0x17f7   :  { %v2580_v42 = vpop.permute.xlu1 %2579 }
0x17f8   :  { %v2582_v43 = vmul.f32 %v3377_v39, %v2580_v42 }
0x17fa   :  { %2584 = vrot.lane.b32.xlu1 %v2582_v43, %s3528_s11 }
0x186c   :  { %v2585_v46 = vpop.permute.xlu1 %2584 }
0x186d   :  { %v2587_v47 = vadd.f32 %v2585_v46, %v2577_v45 }
0x186f   :  { %3378 = vtanh.f32 %v2587_v47 }
0x1879   :  { %v3379_v33 = vpop.eup %3378 }
0x187a   :  { %2590 = vrot.lane.b32.xlu0 %v3379_v33, %s3537_s2 }
0x187e   :  { %2414 = vrot.lane.b32.xlu0 %v2401_v15, %s3538_s5 }
0x18ec   :  { %v2591_v10 = vpop.permute.xlu0 %2590 }
0x18ed   :  { %v2593_v48 = vmul.f32 %v3377_v39, %v2591_v10 }
0x18ef   :  { %2595 = vrot.lane.b32.xlu1 %v2593_v48, %s3528_s11 }
0x18f0   :  { %v2415_v49 = vpop.permute.xlu0 %2414 }
0x18f1   :  { %2417 = vst.msk [vmem:[#allocation7] sm:$0x3] %vm135_vm0, %v2415_v49 }
0x18f3   :  { %2600 = vrot.lane.b32.xlu1 %v2587_v47, %s3538_s5 }
0x1961   :  { %v2596_v40 = vpop.permute.xlu1 %2595 }
0x1962   :  { %2598 = vst.msk [vmem:[#allocation6 + $0x2] sm:$0x3] %vm135_vm0, %v2596_v40  ;;  %2604 = vst.msk [vmem:[#allocation14] sm:$0x3] %vm135_vm0, %v2596_v40 }
0x1963   :  { %3502 = shalt.err (!%p3499_p2)
}
0x1964   :  { %s3503_s0 = scalar_lea.hbm %s4009_s7, 256 }
0x1965   :  { %p3504_p3 = scmp.ne.s32.totalorder %s4009_s7, %s3503_s0  ;;  %p3507_p4 = scmp.lt.u32.totalorder %s3503_s0, %s4009_s7 }
0x1967   :  { %p3509_p5 = pnand %p3507_p4, %p3504_p3 }
0x1969   :  { %3512 = shalt.err (!%p3509_p5)
}
0x196a   :  { %2620 = dma.vmem_to_hbm [thread:$0]  %s2615_s21, 256, %s4009_s7, [#allocation11], %s3528_s11, %s3528_s11, %s3529_s12   ;;  %v2601_v50 = vpop.permute.xlu1 %2600 }
0x196b   :  { %2603 = vst.msk [vmem:[#allocation7 + $0x2] sm:$0x3] %vm135_vm0, %v2601_v50 }
0x196c   :  { %3525 = dma.done.wait [#allocation11], 256  }
0x196d   :  { %3526 = vsyncadd [#allocation11], 4294967040 }
0x196e   :  { %2624 = vsyncpa [#allocation10], 1 }
0x196f   :  { %2625 = vsyncpa [#allocation13], 1 }
0x1970   :  { %2626 = vsyncpa [#allocation11], 1 }
0x1971   :  { %2627 = vsyncmov [#allocation8] }
0x1974   :  { %s2628_s8 = vpop.sfrf %2627 }
0x1975   :  { %p2707_p6 = scmp.ne.s32.totalorder %s2628_s8, 0 }
0x1977   :  { %2632 = shalt.err (%p2707_p6)  }
0x1978   :  { %2634 = vsyncmov [#allocation8 + $0x1] }
0x197b   :  { %s2635_s9 = vpop.sfrf %2634 }
0x197c   :  { %p2708_p7 = scmp.ne.s32.totalorder %s2635_s9, 0 }
0x197e   :  { %2639 = shalt.err (%p2708_p7)  }
0x197f   :  { %2641 = vsyncmov [#allocation8 + $0x2] }
0x1982   :  { %s2642_s10 = vpop.sfrf %2641 }
0x1983   :  { %p2709_p8 = scmp.ne.s32.totalorder %s2642_s10, 0 }
0x1985   :  { %2646 = shalt.err (%p2709_p8)  }
0x1986   :  { %2648 = vsyncmov [#allocation8 + $0x3] }
0x1989   :  { %s2649_s7 = vpop.sfrf %2648 }
0x198a   :  { %p2710_p9 = scmp.ne.s32.totalorder %s2649_s7, 0 }
0x198c   :  { %2653 = shalt.err (%p2710_p9)  }

</bundles_post_ra>
